<compile_context>
chip_gen: v5e
topology: v5e:2x2
jax: 0.10.0
libtpu: 0.0.40
codegen_flags: <defaults>
</compile_context>

<pallas_src>
import functools

import jax
import jax.numpy as jnp
from jax.experimental import pallas as pl
from jax.experimental.pallas import tpu as pltpu

EPS = 1e-5
LANE = 128


def _round_up(x, m):
    return (x + m - 1) // m * m


def _vmem_limit_bytes():
    """Generation-aware VMEM budget: ~3/4 of physical capacity (≈96 MiB on
    v5e/v6e with 128 MiB VMEM, ≈48 MiB on v7x with 64 MiB).  Conservative
    fallback if the query is unavailable."""
    try:
        cap = int(pltpu.get_tpu_info().vmem_capacity_bytes)
    except Exception:
        return 48 * 1024 * 1024
    return max(min(cap * 3 // 4, 100 * 1024 * 1024), 16 * 1024 * 1024)


def _stage_vmem_bytes(n, th, w, cin_p, cout_p):
    """Rough per-grid-step VMEM footprint of one conv stage (pipelined blocks
    double-buffered; kernel intermediates single-buffered)."""
    halo = 2 * n * 1 * w * cin_p * 2          # prev + next halo rows (bf16)
    cen = n * th * w * cin_p * 2              # center tile (bf16)
    wgt = 9 * cin_p * cout_p * 2              # 3 x (3*cin_p, cout_p) bf16
    vec = 2 * cin_p * 4                       # scale / shift
    yout = n * th * w * cout_p * 2            # bf16 output tile
    stats = 2 * cout_p * 4
    pipelined = 2 * (halo + cen + wgt + vec + yout + stats)
    win = n * (th + 2) * w * cin_p * 2        # bf16 window
    win_f32 = n * (th + 2) * w * cin_p * 4    # stage-2 activation temporaries
    patches = n * th * w * 3 * cin_p * 2      # dy-stacked operand (bf16)
    zbuf = 5 * n * th * w * cout_p * 4        # f32 partial results / shifts
    return pipelined + win + win_f32 + patches + zbuf


def _pick_tile_h(n, h, w, cin_p, cout_p, vmem_limit):
    """Largest H tile (divisor of H) whose working set fits ~60% of the VMEM
    budget: pushes the MXU M dim past 256/512 and amortizes the ~0.35us
    per-grid-step overhead; whole-H tiles at low-resolution Unet levels."""
    budget = int(vmem_limit * 0.6)
    best = 1
    for th in range(1, h + 1):
        if h % th == 0 and _stage_vmem_bytes(n, th, w, cin_p, cout_p) <= budget:
            best = th
    return best


# --------------------------------------------------------------------------
# Kernels
# --------------------------------------------------------------------------
def _conv_stage_kernel(prev_ref, cen_ref, next_ref, w_ref, scale_ref, shift_ref,
                       y_ref, stats_ref, *, apply_input_act: bool):
    """3x3 'same' conv over one H tile (rows [i*TH, (i+1)*TH)).

    prev_ref / next_ref carry the 1-row halo above/below the tile.  At the
    image border the index_map clamps them to a valid row and they are zeroed
    here via a scalar mask, implementing the conv's zero padding along H.

    dx-split / dy-stacked formulation: one dy-stacked patch operand
    (K = 3*Cin) is shared by three MXU matmuls, one per kx tap column; the
    kx=0 / kx=2 results are shifted by one column (zero at the W border) and
    accumulated in f32.

    If `apply_input_act`, the folded BatchNorm affine + ReLU of the *previous*
    conv is applied to the input rows on the fly (bf16 out), so conv2 consumes
    conv1's pre-BN output directly.

    Outputs: the pre-BN conv result for the tile (bf16) and per-tile partial
    BN statistics [sum, sum_sq] (single-pass variance; finalized outside).
    Conv bias is intentionally omitted: it cancels in training-mode BN.
    """
    i = pl.program_id(0)
    nt = pl.num_programs(0)
    n, th, w, cin = cen_ref.shape
    cout = y_ref.shape[-1]

    if apply_input_act:
        scale = scale_ref[...].reshape(1, 1, 1, cin)   # hoisted: reused 3x below
        shift = shift_ref[...].reshape(1, 1, 1, cin)

        def _act(v):
            v = v.astype(jnp.float32) * scale + shift
            return jnp.maximum(v, 0.0).astype(jnp.bfloat16)
    else:
        def _act(v):
            return v                                    # already bf16

    keep_top = (i != 0).astype(jnp.bfloat16)            # scalar border masks
    keep_bot = (i != nt - 1).astype(jnp.bfloat16)
    top = _act(prev_ref[...]) * keep_top
    mid = _act(cen_ref[...])
    bot = _act(next_ref[...]) * keep_bot

    win = jnp.concatenate([top, mid, bot], axis=1)       # (n, th+2, w, cin) bf16

    # dy-stacked patches: K = 3*cin, built from cheap H-axis slices; shared by
    # all three dx matmuls (no 9x im2col, no W-axis zero-column window build).
    patches = jnp.concatenate(
        [win[:, 0:th], win[:, 1:th + 1], win[:, 2:th + 2]], axis=-1)
    patches = patches.reshape(n * th * w, 3 * cin)

    z = [jnp.dot(patches, w_ref[dx], preferred_element_type=jnp.float32)
             .reshape(n, th, w, cout) for dx in range(3)]

    # Combine the three kx taps: y[..., x, :] = z0[..., x-1, :] + z1[..., x, :]
    #                                          + z2[..., x+1, :]
    zero_col = jnp.zeros((n, th, 1, cout), jnp.float32)
    acc = (z[1]
           + jnp.concatenate([zero_col, z[0][:, :, :w - 1]], axis=2)
           + jnp.concatenate([z[2][:, :, 1:], zero_col], axis=2))

    # Single-pass partial BN stats (sum & sum of squares), finalized outside.
    flat = acc.reshape(n * th * w, cout)
    s1 = jnp.sum(flat, axis=0, keepdims=True)
    s2 = jnp.sum(flat * flat, axis=0, keepdims=True)
    stats_ref[...] = jnp.concatenate([s1, s2], axis=0)[None]

    y_ref[...] = acc.astype(y_ref.dtype)


def _bn_relu_kernel(y_ref, scale_ref, shift_ref, o_ref):
    c = y_ref.shape[-1]
    v = y_ref[...].astype(jnp.float32)
    scale = scale_ref[...].reshape(1, 1, 1, c)
    shift = shift_ref[...].reshape(1, 1, 1, c)
    o_ref[...] = jnp.maximum(v * scale + shift, 0.0).astype(o_ref.dtype)


# --------------------------------------------------------------------------
# Wrappers
# --------------------------------------------------------------------------
def _prep_weight(w, cin_p, cout_p):
    """torch (Cout, Cin, 3, 3) -> (3, 3*Cin_p, Cout_p) bf16: dx-major stack of
    dy-stacked (3*Cin_p, Cout_p) tap matrices (matches the patches layout)."""
    cout, cin = w.shape[0], w.shape[1]
    wt = jnp.transpose(w, (2, 3, 1, 0))                        # (ky, kx, cin, cout)
    wt = jnp.pad(wt, ((0, 0), (0, 0), (0, cin_p - cin), (0, cout_p - cout)))
    wt = jnp.transpose(wt, (1, 0, 2, 3))                       # (kx, ky, cin_p, cout_p)
    return wt.reshape(3, 3 * cin_p, cout_p).astype(jnp.bfloat16)


def _finalize_bn(stats, gamma_p, beta_p, count):
    """Reduce per-tile partials -> folded BN scale/shift (training-mode stats)."""
    s = jnp.sum(stats, axis=0)                                 # (2, C)
    mean = s[0] / count
    var = jnp.maximum(s[1] / count - mean * mean, 0.0)         # biased variance
    scale = gamma_p * jax.lax.rsqrt(var + EPS)
    shift = beta_p - mean * scale
    return (scale.reshape(1, -1).astype(jnp.float32),
            shift.reshape(1, -1).astype(jnp.float32))


def _conv_stage(x, w_stack, scale, shift, tile_h, apply_input_act, vmem_limit):
    n, h, w, cin_p = x.shape
    cout_p = w_stack.shape[-1]
    nt = h // tile_h
    kernel = functools.partial(_conv_stage_kernel,
                               apply_input_act=apply_input_act)

    prev_spec = pl.BlockSpec(
        (n, 1, w, cin_p), lambda i: (0, jnp.maximum(i * tile_h - 1, 0), 0, 0))
    cen_spec = pl.BlockSpec((n, tile_h, w, cin_p), lambda i: (0, i, 0, 0))
    next_spec = pl.BlockSpec(
        (n, 1, w, cin_p), lambda i: (0, jnp.minimum((i + 1) * tile_h, h - 1), 0, 0))
    # TODO(synk): the constant blocks (weight, scale/shift) are still
    # double-buffered by the default pipeline; at deep Unet levels (C >= 512),
    # single-buffer them / K-tile the weight (esp. on v7x's 64 MiB VMEM) and
    # add a second parallel grid axis (batch or Cout tiles) for v7x megacore.
    w_spec = pl.BlockSpec((3, 3 * cin_p, cout_p), lambda i: (0, 0, 0))
    vec_spec = pl.BlockSpec((1, cin_p), lambda i: (0, 0))

    y_spec = pl.BlockSpec((n, tile_h, w, cout_p), lambda i: (0, i, 0, 0))
    stats_spec = pl.BlockSpec((1, 2, cout_p), lambda i: (i, 0, 0))

    return pl.pallas_call(
        kernel,
        grid=(nt,),
        in_specs=(prev_spec, cen_spec, next_spec, w_spec, vec_spec, vec_spec),
        out_specs=(y_spec, stats_spec),
        out_shape=(jax.ShapeDtypeStruct((n, h, w, cout_p), jnp.bfloat16),
                   jax.ShapeDtypeStruct((nt, 2, cout_p), jnp.float32)),
        compiler_params=pltpu.CompilerParams(
            dimension_semantics=("parallel",),
            vmem_limit_bytes=vmem_limit),
    )(x, x, x, w_stack, scale, shift)


def convblock_nhwc(x_nhwc, params):
    """Fused ConvBlock, NHWC in/out (channels unpadded), training-mode BN."""
    w1, b1, g1, be1, w2, b2, g2, be2 = params  # conv biases unused: cancel in BN
    del b1, b2
    n, h, w, cin = x_nhwc.shape
    cout = w1.shape[0]
    cin_p = _round_up(cin, LANE)
    cout_p = _round_up(cout, LANE)
    vmem_limit = _vmem_limit_bytes()
    tile_h = _pick_tile_h(n, h, w, max(cin_p, cout_p), cout_p, vmem_limit)
    nt = h // tile_h
    count = n * h * w

    # Single fused wrapper-side copy: lane-pad channels + cast to bf16.
    # Spatial zero padding is handled inside the kernels (halo masks + shifts).
    xk = jnp.pad(x_nhwc, ((0, 0), (0, 0), (0, 0), (0, cin_p - cin))).astype(jnp.bfloat16)

    # TODO(synk): for the stem conv (Cin <= 16) pack the 9 taps jointly before
    # lane-padding instead of padding Cin to 128 per tap.
    w1k = _prep_weight(w1, cin_p, cout_p)      # (3, 3*Cin_p, Cout_p) bf16
    w2k = _prep_weight(w2, cout_p, cout_p)
    g1p = jnp.pad(g1, (0, cout_p - cout))
    be1p = jnp.pad(be1, (0, cout_p - cout))
    g2p = jnp.pad(g2, (0, cout_p - cout))
    be2p = jnp.pad(be2, (0, cout_p - cout))

    ones = jnp.ones((1, cin_p), jnp.float32)
    zeros = jnp.zeros((1, cin_p), jnp.float32)

    # Stage 1: conv1 (pre-BN) + per-tile BN1 partials.
    y1, st1 = _conv_stage(xk, w1k, ones, zeros, tile_h, False, vmem_limit)
    scale1, shift1 = _finalize_bn(st1, g1p, be1p, count)

    # Stage 2: BN1+ReLU applied on the fly (bf16), conv2 (pre-BN) + BN2 partials.
    y2, st2 = _conv_stage(y1, w2k, scale1, shift1, tile_h, True, vmem_limit)
    scale2, shift2 = _finalize_bn(st2, g2p, be2p, count)

    # Stage 3: BN2 + ReLU, lane-dense bf16 writeback (halves the extra HBM pass).
    # TODO(synk): in a full Unet, fuse this into the consumer (next ConvBlock's
    # stage-1 apply_input_act path or the following maxpool) to remove the pass.
    out_p = pl.pallas_call(
        _bn_relu_kernel,
        grid=(nt,),
        in_specs=(pl.BlockSpec((n, tile_h, w, cout_p), lambda i: (0, i, 0, 0)),
                  pl.BlockSpec((1, cout_p), lambda i: (0, 0)),
                  pl.BlockSpec((1, cout_p), lambda i: (0, 0))),
        out_specs=pl.BlockSpec((n, tile_h, w, cout_p), lambda i: (0, i, 0, 0)),
        out_shape=jax.ShapeDtypeStruct((n, h, w, cout_p), jnp.bfloat16),
        compiler_params=pltpu.CompilerParams(
            dimension_semantics=("parallel",),
            vmem_limit_bytes=vmem_limit),
    )(y2, scale2, shift2)

    return out_p[..., :cout].astype(jnp.float32)


def convblock_pallas(x_nchw, params):
    """PyTorch-layout entry point: (N, Cin, H, W) f32 -> (N, Cout, H, W) f32."""
    x_nhwc = jnp.transpose(x_nchw, (0, 2, 3, 1))
    out = convblock_nhwc(x_nhwc, params)
    return jnp.transpose(out, (0, 3, 1, 2))


# --------------------------------------------------------------------------
# Pure-JAX reference (matches PyTorch ConvBlock.forward, training-mode BN, f32)
# --------------------------------------------------------------------------
def convblock_ref(x_nchw, params):
    w1, b1, g1, be1, w2, b2, g2, be2 = params

    def conv(x, w, b):
        y = jax.lax.conv_general_dilated(
            x, w, window_strides=(1, 1), padding="SAME",
            dimension_numbers=("NCHW", "OIHW", "NCHW"))
        return y + b[None, :, None, None]

    def bn(x, g, be):
        mean = jnp.mean(x, axis=(0, 2, 3), keepdims=True)
        var = jnp.mean((x - mean) ** 2, axis=(0, 2, 3), keepdims=True)
        xn = (x - mean) * jax.lax.rsqrt(var + EPS)
        return xn * g[None, :, None, None] + be[None, :, None, None]

    y = jax.nn.relu(bn(conv(x_nchw, w1, b1), g1, be1))
    y = jax.nn.relu(bn(conv(y, w2, b2), g2, be2))
    return y


def init_params(key, in_channels, out_channels):
    k1, k2, k3, k4 = jax.random.split(key, 4)
    scale1 = 1.0 / (in_channels * 9) ** 0.5
    scale2 = 1.0 / (out_channels * 9) ** 0.5
    w1 = jax.random.uniform(k1, (out_channels, in_channels, 3, 3),
                            jnp.float32, -scale1, scale1)
    b1 = jax.random.uniform(k2, (out_channels,), jnp.float32, -scale1, scale1)
    w2 = jax.random.uniform(k3, (out_channels, out_channels, 3, 3),
                            jnp.float32, -scale2, scale2)
    b2 = jax.random.uniform(k4, (out_channels,), jnp.float32, -scale2, scale2)
    g1 = jnp.ones((out_channels,), jnp.float32)
    be1 = jnp.zeros((out_channels,), jnp.float32)
    g2 = jnp.ones((out_channels,), jnp.float32)
    be2 = jnp.zeros((out_channels,), jnp.float32)
    return (w1, b1, g1, be1, w2, b2, g2, be2)


if __name__ == "__main__":
    key = jax.random.PRNGKey(0)
    kx, kp = jax.random.split(key)

    N, Cin, Cout, H, W = 2, 4, 8, 16, 16
    x = jax.random.normal(kx, (N, Cin, H, W), jnp.float32)
    params = init_params(kp, Cin, Cout)

    out = jax.block_until_ready(convblock_pallas(x, params))
    ref = jax.block_until_ready(convblock_ref(x, params))

    assert out.shape == (N, Cout, H, W), out.shape
    err = float(jnp.max(jnp.abs(out - ref)))
    # bf16 MXU operands / bf16 writeback vs. the pure-f32 reference.
    assert jnp.allclose(out, ref, atol=5e-2, rtol=5e-2), err
    print("KERNEL_OK")
</pallas_src>

<mosaic_0001>
module attributes {stable_mosaic.version = 11 : i64} {
  func.func @_conv_stage_kernel(%arg0: i32, %arg1: memref<2x1x16x128xbf16, #tpu.memory_space<vmem>>, %arg2: memref<2x16x16x128xbf16, #tpu.memory_space<vmem>>, %arg3: memref<2x1x16x128xbf16, #tpu.memory_space<vmem>>, %arg4: memref<3x384x128xbf16, #tpu.memory_space<vmem>>, %arg5: memref<1x128xf32, #tpu.memory_space<vmem>>, %arg6: memref<1x128xf32, #tpu.memory_space<vmem>>, %arg7: memref<2x16x16x128xbf16, #tpu.memory_space<vmem>>, %arg8: memref<1x2x128xf32, #tpu.memory_space<vmem>>) attributes {dimension_semantics = [#tpu.dimension_semantics<parallel>], iteration_bounds = array<i64: 1>, scalar_prefetch = 0 : i64, scratch_operands = 0 : i64, tpu.core_type = #tpu.core_type<tc>, window_params = [{transform_indices = @transform_0, window_bounds = array<i64: 2, 1, 16, 128>}, {transform_indices = @transform_1, window_bounds = array<i64: 2, 16, 16, 128>}, {transform_indices = @transform_2, window_bounds = array<i64: 2, 1, 16, 128>}, {pipeline_mode = #tpu.pipeline_mode<synchronous>, transform_indices = @transform_3, window_bounds = array<i64: 3, 384, 128>}, {pipeline_mode = #tpu.pipeline_mode<synchronous>, transform_indices = @transform_4, window_bounds = array<i64: 1, 128>}, {pipeline_mode = #tpu.pipeline_mode<synchronous>, transform_indices = @transform_5, window_bounds = array<i64: 1, 128>}, {transform_indices = @transform_6, window_bounds = array<i64: 2, 16, 16, 128>}, {transform_indices = @transform_7, window_bounds = array<i64: 1, 2, 128>}]} {
    %c0_i32 = arith.constant 0 : i32
    %0 = arith.cmpi ne, %arg0, %c0_i32 : i32
    %1 = arith.extui %0 : i1 to i32
    %2 = arith.sitofp %1 : i32 to f32
    %3 = arith.truncf %2 : f32 to bf16
    %c0_i32_0 = arith.constant 0 : i32
    %4 = arith.cmpi ne, %arg0, %c0_i32_0 : i32
    %5 = arith.extui %4 : i1 to i32
    %6 = arith.sitofp %5 : i32 to f32
    %7 = arith.truncf %6 : f32 to bf16
    %c0 = arith.constant 0 : index
    %c0_1 = arith.constant 0 : index
    %c0_2 = arith.constant 0 : index
    %c0_3 = arith.constant 0 : index
    %8 = vector.load %arg1[%c0, %c0_1, %c0_2, %c0_3] : memref<2x1x16x128xbf16, #tpu.memory_space<vmem>>, vector<2x1x16x128xbf16>
    %9 = vector.broadcast %3 : bf16 to vector<2x1x16x128xbf16>
    %10 = arith.mulf %8, %9 : vector<2x1x16x128xbf16>
    %c0_4 = arith.constant 0 : index
    %c0_5 = arith.constant 0 : index
    %c0_6 = arith.constant 0 : index
    %c0_7 = arith.constant 0 : index
    %11 = vector.load %arg2[%c0_4, %c0_5, %c0_6, %c0_7] : memref<2x16x16x128xbf16, #tpu.memory_space<vmem>>, vector<2x16x16x128xbf16>
    %c0_8 = arith.constant 0 : index
    %c0_9 = arith.constant 0 : index
    %c0_10 = arith.constant 0 : index
    %c0_11 = arith.constant 0 : index
    %12 = vector.load %arg3[%c0_8, %c0_9, %c0_10, %c0_11] : memref<2x1x16x128xbf16, #tpu.memory_space<vmem>>, vector<2x1x16x128xbf16>
    %13 = vector.broadcast %7 : bf16 to vector<2x1x16x128xbf16>
    %14 = arith.mulf %12, %13 : vector<2x1x16x128xbf16>
    %15 = tpu.concatenate %10, %11, %14 in 1 : vector<2x1x16x128xbf16>, vector<2x16x16x128xbf16>, vector<2x1x16x128xbf16> -> vector<2x18x16x128xbf16>
    %16 = vector.extract_strided_slice %15 {offsets = [0, 0, 0, 0], sizes = [2, 16, 16, 128], strides = [1, 1, 1, 1]} : vector<2x18x16x128xbf16> to vector<2x16x16x128xbf16>
    %17 = vector.extract_strided_slice %15 {offsets = [0, 1, 0, 0], sizes = [2, 16, 16, 128], strides = [1, 1, 1, 1]} : vector<2x18x16x128xbf16> to vector<2x16x16x128xbf16>
    %18 = vector.extract_strided_slice %15 {offsets = [0, 2, 0, 0], sizes = [2, 16, 16, 128], strides = [1, 1, 1, 1]} : vector<2x18x16x128xbf16> to vector<2x16x16x128xbf16>
    %19 = tpu.concatenate %16, %17, %18 in 3 : vector<2x16x16x128xbf16>, vector<2x16x16x128xbf16>, vector<2x16x16x128xbf16> -> vector<2x16x16x384xbf16>
    %20 = vector.shape_cast %19 : vector<2x16x16x384xbf16> to vector<512x384xbf16>
    %c0_12 = arith.constant 0 : index
    %c0_13 = arith.constant 0 : index
    %c0_14 = arith.constant 0 : index
    %21 = vector.load %arg4[%c0_12, %c0_13, %c0_14] : memref<3x384x128xbf16, #tpu.memory_space<vmem>>, vector<1x384x128xbf16>
    %22 = vector.shape_cast %21 : vector<1x384x128xbf16> to vector<384x128xbf16>
    %cst = arith.constant dense<0.000000e+00> : vector<512x128xf32>
    %23 = tpu.matmul %20, %22, %cst {dimension_numbers = #tpu.dot_dimension_numbers<[1], [0], [0], [1], [0, 0, 1, 1], [], []>} : vector<512x384xbf16>, vector<384x128xbf16>, vector<512x128xf32> -> vector<512x128xf32>
    %24 = vector.shape_cast %23 : vector<512x128xf32> to vector<2x16x16x128xf32>
    %c1 = arith.constant 1 : index
    %c0_15 = arith.constant 0 : index
    %c0_16 = arith.constant 0 : index
    %25 = vector.load %arg4[%c1, %c0_15, %c0_16] : memref<3x384x128xbf16, #tpu.memory_space<vmem>>, vector<1x384x128xbf16>
    %26 = vector.shape_cast %25 : vector<1x384x128xbf16> to vector<384x128xbf16>
    %cst_17 = arith.constant dense<0.000000e+00> : vector<512x128xf32>
    %27 = tpu.matmul %20, %26, %cst_17 {dimension_numbers = #tpu.dot_dimension_numbers<[1], [0], [0], [1], [0, 0, 1, 1], [], []>} : vector<512x384xbf16>, vector<384x128xbf16>, vector<512x128xf32> -> vector<512x128xf32>
    %28 = vector.shape_cast %27 : vector<512x128xf32> to vector<2x16x16x128xf32>
    %c2 = arith.constant 2 : index
    %c0_18 = arith.constant 0 : index
    %c0_19 = arith.constant 0 : index
    %29 = vector.load %arg4[%c2, %c0_18, %c0_19] : memref<3x384x128xbf16, #tpu.memory_space<vmem>>, vector<1x384x128xbf16>
    %30 = vector.shape_cast %29 : vector<1x384x128xbf16> to vector<384x128xbf16>
    %cst_20 = arith.constant dense<0.000000e+00> : vector<512x128xf32>
    %31 = tpu.matmul %20, %30, %cst_20 {dimension_numbers = #tpu.dot_dimension_numbers<[1], [0], [0], [1], [0, 0, 1, 1], [], []>} : vector<512x384xbf16>, vector<384x128xbf16>, vector<512x128xf32> -> vector<512x128xf32>
    %32 = vector.shape_cast %31 : vector<512x128xf32> to vector<2x16x16x128xf32>
    %cst_21 = arith.constant 0.000000e+00 : f32
    %33 = vector.broadcast %cst_21 : f32 to vector<2x16x1x128xf32>
    %34 = vector.extract_strided_slice %24 {offsets = [0, 0, 0, 0], sizes = [2, 16, 15, 128], strides = [1, 1, 1, 1]} : vector<2x16x16x128xf32> to vector<2x16x15x128xf32>
    %35 = tpu.concatenate %33, %34 in 2 : vector<2x16x1x128xf32>, vector<2x16x15x128xf32> -> vector<2x16x16x128xf32>
    %36 = arith.addf %28, %35 : vector<2x16x16x128xf32>
    %37 = vector.extract_strided_slice %32 {offsets = [0, 0, 1, 0], sizes = [2, 16, 15, 128], strides = [1, 1, 1, 1]} : vector<2x16x16x128xf32> to vector<2x16x15x128xf32>
    %38 = tpu.concatenate %37, %33 in 2 : vector<2x16x15x128xf32>, vector<2x16x1x128xf32> -> vector<2x16x16x128xf32>
    %39 = arith.addf %36, %38 : vector<2x16x16x128xf32>
    %40 = vector.shape_cast %39 : vector<2x16x16x128xf32> to vector<512x128xf32>
    %cst_22 = arith.constant dense<0.000000e+00> : vector<128xf32>
    %41 = vector.multi_reduction <add>, %40, %cst_22 [0] : vector<512x128xf32> to vector<128xf32>
    %42 = vector.shape_cast %41 : vector<128xf32> to vector<1x128xf32>
    %43 = arith.mulf %40, %40 : vector<512x128xf32>
    %cst_23 = arith.constant dense<0.000000e+00> : vector<128xf32>
    %44 = vector.multi_reduction <add>, %43, %cst_23 [0] : vector<512x128xf32> to vector<128xf32>
    %45 = vector.shape_cast %44 : vector<128xf32> to vector<1x128xf32>
    %46 = tpu.concatenate %42, %45 in 0 : vector<1x128xf32>, vector<1x128xf32> -> vector<2x128xf32>
    %47 = vector.shape_cast %46 : vector<2x128xf32> to vector<1x2x128xf32>
    %c0_24 = arith.constant 0 : index
    %c0_25 = arith.constant 0 : index
    %c0_26 = arith.constant 0 : index
    %48 = vector.load %arg8[%c0_24, %c0_25, %c0_26] : memref<1x2x128xf32, #tpu.memory_space<vmem>>, vector<1x2x128xf32>
    tpu.vector_store %arg8[%c0_24, %c0_25, %c0_26], %47 {strides = array<i32>} : memref<1x2x128xf32, #tpu.memory_space<vmem>>, vector<1x2x128xf32>,
    %49 = arith.truncf %39 : vector<2x16x16x128xf32> to vector<2x16x16x128xbf16>
    %c0_27 = arith.constant 0 : index
    %c0_28 = arith.constant 0 : index
    %c0_29 = arith.constant 0 : index
    %c0_30 = arith.constant 0 : index
    %50 = vector.load %arg7[%c0_27, %c0_28, %c0_29, %c0_30] : memref<2x16x16x128xbf16, #tpu.memory_space<vmem>>, vector<2x16x16x128xbf16>
    tpu.vector_store %arg7[%c0_27, %c0_28, %c0_29, %c0_30], %49 {strides = array<i32>} : memref<2x16x16x128xbf16, #tpu.memory_space<vmem>>, vector<2x16x16x128xbf16>,
    return
  }
  func.func @transform_0(%arg0: i32) -> (i32, i32, i32, i32) {
    %c16_i32 = arith.constant 16 : i32
    %0 = arith.muli %arg0, %c16_i32 : i32
    %c1_i32 = arith.constant 1 : i32
    %1 = arith.subi %0, %c1_i32 : i32
    %c0_i32 = arith.constant 0 : i32
    %2 = arith.maxsi %1, %c0_i32 : i32
    %c0_i32_0 = arith.constant 0 : i32
    %c0_i32_1 = arith.constant 0 : i32
    %c0_i32_2 = arith.constant 0 : i32
    %c0_i32_3 = arith.constant 0 : i32
    return %c0_i32_0, %2, %c0_i32_1, %c0_i32_2 : i32, i32, i32, i32
  }
  func.func @transform_1(%arg0: i32) -> (i32, i32, i32, i32) {
    %c0_i32 = arith.constant 0 : i32
    %c0_i32_0 = arith.constant 0 : i32
    %c0_i32_1 = arith.constant 0 : i32
    %c0_i32_2 = arith.constant 0 : i32
    return %c0_i32, %arg0, %c0_i32_0, %c0_i32_1 : i32, i32, i32, i32
  }
  func.func @transform_2(%arg0: i32) -> (i32, i32, i32, i32) {
    %c1_i32 = arith.constant 1 : i32
    %0 = arith.addi %arg0, %c1_i32 : i32
    %c16_i32 = arith.constant 16 : i32
    %1 = arith.muli %0, %c16_i32 : i32
    %c15_i32 = arith.constant 15 : i32
    %2 = arith.minsi %1, %c15_i32 : i32
    %c0_i32 = arith.constant 0 : i32
    %c0_i32_0 = arith.constant 0 : i32
    %c0_i32_1 = arith.constant 0 : i32
    %c0_i32_2 = arith.constant 0 : i32
    return %c0_i32, %2, %c0_i32_0, %c0_i32_1 : i32, i32, i32, i32
  }
  func.func @transform_3(%arg0: i32) -> (i32, i32, i32) {
    %c0_i32 = arith.constant 0 : i32
    %c0_i32_0 = arith.constant 0 : i32
    %c0_i32_1 = arith.constant 0 : i32
    %c0_i32_2 = arith.constant 0 : i32
    return %c0_i32, %c0_i32_0, %c0_i32_1 : i32, i32, i32
  }
  func.func @transform_4(%arg0: i32) -> (i32, i32) {
    %c0_i32 = arith.constant 0 : i32
    %c0_i32_0 = arith.constant 0 : i32
    %c0_i32_1 = arith.constant 0 : i32
    return %c0_i32, %c0_i32_0 : i32, i32
  }
  func.func @transform_5(%arg0: i32) -> (i32, i32) {
    %c0_i32 = arith.constant 0 : i32
    %c0_i32_0 = arith.constant 0 : i32
    %c0_i32_1 = arith.constant 0 : i32
    return %c0_i32, %c0_i32_0 : i32, i32
  }
  func.func @transform_6(%arg0: i32) -> (i32, i32, i32, i32) {
    %c0_i32 = arith.constant 0 : i32
    %c0_i32_0 = arith.constant 0 : i32
    %c0_i32_1 = arith.constant 0 : i32
    %c0_i32_2 = arith.constant 0 : i32
    return %c0_i32, %arg0, %c0_i32_0, %c0_i32_1 : i32, i32, i32, i32
  }
  func.func @transform_7(%arg0: i32) -> (i32, i32, i32) {
    %c0_i32 = arith.constant 0 : i32
    %c0_i32_0 = arith.constant 0 : i32
    %c0_i32_1 = arith.constant 0 : i32
    return %arg0, %c0_i32, %c0_i32_0 : i32, i32, i32
  }
}

</mosaic_0001>

<bundles_post_ra>
// kernel: tpu_custom_call.1
= control target key start
LH: loop header
LB: loop body
LE: loop exit
PB: predicated region body
PF: predicated region fallthrough
CT: control target
= control target key end

     0   :  { %13 = vsyncpa [#allocation3], 0  ;;  %s5751_s0 = inlined_call_operand.hbm [shape: bf16[2,16,16,128], index: 0, kind: input, shape index: {}]   ;;  %s5752_s1 = inlined_call_operand.hbm [shape: bf16[2,16,16,128], index: 1, kind: input, shape index: {}]   ;;  %s5753_s2 = inlined_call_operand.hbm [shape: bf16[2,16,16,128], index: 2, kind: input, shape index: {}]   ;;  %s5754_s3 = inlined_call_operand.hbm [shape: bf16[3,384,128], index: 3, kind: input, shape index: {}]   ;;  %s5755_s4 = inlined_call_operand.vmem [shape: f32[1,128], index: 4, kind: input, shape index: {}]   ;;  %s5756_s5 = inlined_call_operand.vmem [shape: f32[1,128], index: 5, kind: input, shape index: {}]   ;;  %s5757_s6 = inlined_call_operand.hbm [shape: bf16[2,16,16,128], index: 6, kind: output, shape index: {0}]   ;;  %s5758_s7 = inlined_call_operand.hbm [shape: f32[1,2,128], index: 7, kind: output, shape index: {1}]  }
   0x1   :  { %14 = vsyncpa [#allocation6], 0 }
   0x2   :  { %15 = vsyncpa [#allocation9], 0 }
   0x3   :  { %16 = vsyncpa [#allocation4], 0 }
   0x4   :  { %17 = vsyncpa [#allocation12], 0 }
   0x5   :  { %s33_s24 = sld [smem:[#allocation0]]   ;;  %s41_s27 = sshll.u32 %s5751_s0, 4  ;;  %s42_s27 = int_to_ptr.hbm [resolvable:$true] %s41_s27 }
   0x6   :  { %s4532_s4 = smov [#allocation2]   ;;  %s4533_s5 = smov 2048  }
   0x7   :  { %s43_s28 = sshll.u32 %s4532_s4, 4  ;;  %50 = sst [smem:[#allocation14]] %s4533_s5  ;;  %s44_s28 = int_to_ptr.vmem [resolvable:$true] %s43_s28 }
   0x8   :  { %s4534_s29 = smov 128   ;;  %s4535_s8 = smov 2  }
   0x9   :  { %52 = sst [smem:[#allocation14 + $0x1]] %s4534_s29  ;;  %s4536_s10 = smov 64  }
   0xa   :  { %54 = sst [smem:[#allocation14 + $0x2]] %s4535_s8  ;;  %s4537_s11 = smov 4  }
   0xb   :  { %s3606_s30 = sshll.u32 %s33_s24, 26  ;;  %56 = sst [smem:[#allocation14 + $0x3]] %s4536_s10 }
   0xc   :  { %s3607_s9 = sadd.s32 134217728, %s3606_s30  ;;  %58 = sst [smem:[#allocation14 + $0x4]] %s4536_s10 }
   0xd   :  { %60 = sst [smem:[#allocation14 + $0x5]] %s4537_s11  ;;  %s4538_s12 = smov [#allocation3]  }
   0xe   :  { %s4539_s13 = smov [#allocation13]   ;;  %s67_s15 = sshll.u32 %s5752_s1, 4  ;;  %s68_s15 = int_to_ptr.hbm [resolvable:$true] %s67_s15 }
   0xf   :  { %62 = dma.general %s42_s27, 256, %s44_s28, %s4538_s12, %s4539_s13, [#allocation14], %s3607_s9, 0  }
  0x10   :  { %s4540_s16 = smov [#allocation5]   ;;  %s4541_s18 = smov 64  }
  0x11   :  { %s69_s17 = sshll.u32 %s4540_s16, 4  ;;  %s4542_s19 = smov 4   ;;  %s70_s17 = int_to_ptr.vmem [resolvable:$true] %s69_s17 }
  0x12   :  { %75 = dma.hbm_to_vmem [thread:$0]  %s68_s15, 4096, %s70_s17, [#allocation6], %s4541_s18, %s4541_s18, %s4542_s19  }
  0x13   :  { %s86_s22 = scalar_lea.hbm %s5753_s2, 120  ;;  %s91_s23 = sld [smem:[#allocation0]]  }
  0x14   :  { %s99_s24 = sshll.u32 %s86_s22, 4  ;;  %s4543_s25 = smov [#allocation7]   ;;  %s100_s24 = int_to_ptr.hbm [resolvable:$true] %s99_s24 }
  0x15   :  { %s101_s26 = sshll.u32 %s4543_s25, 4  ;;  %s4544_s1 = smov 2048   ;;  %s102_s26 = int_to_ptr.vmem [resolvable:$true] %s101_s26 }
  0x16   :  { %108 = sst [smem:[#allocation16]] %s4544_s1  ;;  %s4545_s27 = smov 128  }
  0x17   :  { %110 = sst [smem:[#allocation16 + $0x1]] %s4545_s27  ;;  %s4546_s28 = smov 2  }
  0x18   :  { %112 = sst [smem:[#allocation16 + $0x2]] %s4546_s28  ;;  %s4547_s29 = smov 64  }
  0x19   :  { %s3608_s4 = sshll.u32 %s91_s23, 26  ;;  %114 = sst [smem:[#allocation16 + $0x3]] %s4547_s29 }
  0x1a   :  { %s3609_s5 = sadd.s32 134217728, %s3608_s4  ;;  %116 = sst [smem:[#allocation16 + $0x4]] %s4547_s29 }
  0x1b   :  { %s4548_s30 = smov 4   ;;  %s4549_s2 = smov [#allocation6]  }
  0x1c   :  { %118 = sst [smem:[#allocation16 + $0x5]] %s4548_s30  ;;  %s4550_s8 = smov [#allocation15]  }
  0x1d   :  { %120 = dma.general %s100_s24, 256, %s102_s26, %s4549_s2, %s4550_s8, [#allocation16], %s3609_s5, 0  }
  0x1e   :  { %s125_s11 = sshll.u32 %s5754_s3, 4  ;;  %s4551_s12 = smov [#allocation8]   ;;  %s126_s11 = int_to_ptr.hbm [resolvable:$true] %s125_s11 }
  0x1f   :  { %s127_s13 = sshll.u32 %s4551_s12, 4  ;;  %s128_s13 = int_to_ptr.vmem [resolvable:$true] %s127_s13 }
  0x20   :  { %133 = dma.hbm_to_vmem [thread:$0]  %s126_s11, 9216, %s128_s13, [#allocation9], %s4541_s18, %s4541_s18, %s4542_s19  }
  0x21   :  { %4522 = dma.done.wait [#allocation3], 256  }
  0x22   :  { %4523 = vsyncadd [#allocation3], 4294967040 }
  0x23   :  { %4524 = dma.done.wait [#allocation6], 4352  }
  0x24   :  { %4525 = vsyncadd [#allocation6], 4294962944 }
  0x25   :  { %4526 = dma.done.wait [#allocation9], 9216  }
  0x26   :  { %4527 = vsyncadd [#allocation9], 4294958080  ;;  %v4065_v0 = vld [vmem:[#allocation8 + $0x38] sm:$0xff]  ;;  %v4064_v1 = vld [vmem:[#allocation8 + $0x30] sm:$0xff]  ;;  %v4552_v8 = vmov 0.0   ;;  %vm2655_vm0 = vcmask 1040384  }
  0x27   :  { %684 = vmatpush.bf16.msra.mxu0 %v4065_v0  ;;  %4339 = vmatpush.bf16.msra.mxu1 %v4065_v0  ;;  %v4063_v2 = vld [vmem:[#allocation8 + $0x28] sm:$0xff]  ;;  %v4062_v3 = vld [vmem:[#allocation8 + $0x20] sm:$0xff]  ;;  %v4613_v9 = vunpack.c.l.bf16 %v4552_v8  ;;  %v4061_v10 = vld [vmem:[#allocation8 + $0x18] sm:$0xff]  ;;  %vm2976_vm1 = vcmask 1046528   ;;  %s4553_s3 = smov [#allocation10]   ;;  %s3571_s16 = sshll.u32 %s5757_s6, 4  ;;  %s3572_s16 = int_to_ptr.hbm [resolvable:$true] %s3571_s16 }
  0x28   :  { %4340 = vmatpush.bf16.msra.mxu2 %v4065_v0  ;;  %4341 = vmatpush.bf16.msra.mxu3 %v4065_v0  ;;  %v4131_v4 = vld [vmem:[#allocation2] sm:$0xff]   ;;  %v4306_v5 = vld [vmem:[#allocation2 + $0x8] sm:$0xff]   ;;  %v4060_v15 = vld [vmem:[#allocation8 + $0x10] sm:$0xff]  ;;  %s3569_s0 = sshll.u32 %s4553_s3, 4  ;;  %s4554_s6 = smov [#allocation11]   ;;  %s3570_s0 = int_to_ptr.vmem [resolvable:$true] %s3569_s0 }
  0x29   :  { %v4132_v6 = vunpack.c.l.bf16 %v4131_v4  ;;  %v4133_v7 = vunpack.c.h.bf16 %v4131_v4  ;;  %v4136_v11 = vunpack.c.l.bf16 %v4306_v5  ;;  %v4137_v12 = vunpack.c.h.bf16 %v4306_v5  ;;  %v4059_v20 = vld [vmem:[#allocation8 + $0x8] sm:$0xff]  ;;  %v4058_v25 = vld [vmem:[#allocation8] sm:$0xff]  ;;  %v4081_v28 = vld [vmem:[#allocation8 + $0xb8] sm:$0xff]  ;;  %s3583_s17 = sshll.u32 %s4554_s6, 4  ;;  %s3585_s22 = sshll.u32 %s5758_s7, 4  ;;  %s3584_s17 = int_to_ptr.vmem [resolvable:$true] %s3583_s17  ;;  %s3586_s22 = int_to_ptr.hbm [resolvable:$true] %s3585_s22 }
  0x2a   :  { %v4089_v29 = vld [vmem:[#allocation8 + $0xf8] sm:$0xff]  ;;  %v4621_v31 = vld [vmem:[#allocation5 + $0x38] sm:$0xff]  ;;  %v4080_v36 = vld [vmem:[#allocation8 + $0xb0] sm:$0xff] }
  0x2b   :  { %685 = vmatpush.bf16.msra.mxu0 %v4064_v1  ;;  %4342 = vmatpush.bf16.msra.mxu1 %v4064_v1  ;;  %v188_v13 = vmul.f32 %v4132_v6, %v4613_v9  ;;  %v189_v14 = vmul.f32 %v4133_v7, %v4613_v9  ;;  %v190_v16 = vmul.f32 %v4136_v11, %v4613_v9  ;;  %v4049_v33 = vld [vmem:[#allocation5 + $0xb8] sm:$0xff]  ;;  %v4097_v34 = vld [vmem:[#allocation8 + $0x138] sm:$0xff]  ;;  %v4088_v37 = vld [vmem:[#allocation8 + $0xf0] sm:$0xff] }
  0x2c   :  { %4343 = vmatpush.bf16.msra.mxu2 %v4064_v1  ;;  %4344 = vmatpush.bf16.msra.mxu3 %v4064_v1  ;;  %v191_v17 = vmul.f32 %v4137_v12, %v4613_v9  ;;  %v4073_v35 = vld [vmem:[#allocation8 + $0x78] sm:$0xff]  ;;  %v4096_v38 = vld [vmem:[#allocation8 + $0x130] sm:$0xff]  ;;  %v4079_v40 = vld [vmem:[#allocation8 + $0xa8] sm:$0xff] }
  0x2d   :  { %v192_v18 = vpack.c.bf16 %v188_v13, %v188_v13  ;;  %v193_v19 = vpack.c.bf16 %v189_v14, %v189_v14  ;;  %v194_v21 = vpack.c.bf16 %v190_v16, %v190_v16  ;;  %v4072_v39 = vld [vmem:[#allocation8 + $0x70] sm:$0xff]  ;;  %v4087_v41 = vld [vmem:[#allocation8 + $0xe8] sm:$0xff]  ;;  %v4078_v48 = vld [vmem:[#allocation8 + $0xa0] sm:$0xff] }
  0x2e   :  { %v195_v22 = vpack.c.bf16 %v191_v17, %v191_v17  ;;  %v4095_v42 = vld [vmem:[#allocation8 + $0x128] sm:$0xff]  ;;  %v4628_v44 = vld [vmem:[#allocation5] sm:$0xff]  ;;  %v4086_v49 = vld [vmem:[#allocation8 + $0xe0] sm:$0xff] }
  0x2f   :  { %686 = vmatpush.bf16.msra.mxu0 %v4063_v2  ;;  %4345 = vmatpush.bf16.msra.mxu1 %v4063_v2  ;;  %v340_v23 = vunpack.c.l.b16 %v192_v18  ;;  %v341_v24 = vunpack.c.l.b16 %v193_v19  ;;  %v372_v26 = vunpack.c.l.b16 %v194_v21  ;;  %v4071_v43 = vld [vmem:[#allocation8 + $0x68] sm:$0xff]  ;;  %v4630_v45 = vld [vmem:[#allocation5 + $0x40] sm:$0xff]  ;;  %v4094_v50 = vld [vmem:[#allocation8 + $0x120] sm:$0xff] }
  0x30   :  { %4346 = vmatpush.bf16.msra.mxu2 %v4063_v2  ;;  %4347 = vmatpush.bf16.msra.mxu3 %v4063_v2  ;;  %v373_v27 = vunpack.c.l.b16 %v195_v22  ;;  %v4632_v46 = vld [vmem:[#allocation5 + $0x80] sm:$0xff]  ;;  %v4070_v51 = vld [vmem:[#allocation8 + $0x60] sm:$0xff]  ;;  %v4637_v52 = vld [vmem:[#allocation5 + $0x8] sm:$0xff] }
  0x31   :  { %v4619_v30 = vpack.c.b16 %v341_v24, %v340_v23  ;;  %v4050_v47 = vld [vmem:[#allocation5 + $0xc0] sm:$0xff]  ;;  %v4639_v53 = vld [vmem:[#allocation5 + $0x48] sm:$0xff]  ;;  %v4646_v60 = vld [vmem:[#allocation5 + $0x10] sm:$0xff] }
  0x32   :  { %v4623_v32 = vpack.c.b16 %v373_v27, %v372_v26  ;;  %v4641_v54 = vld [vmem:[#allocation5 + $0x88] sm:$0xff]  ;;  %v4648_v61 = vld [vmem:[#allocation5 + $0x50] sm:$0xff]  ;;  %v4076_v0 = vld [vmem:[#allocation8 + $0x90] sm:$0xff] }
  0x33   :  { %687 = vmatpush.bf16.msra.mxu0 %v4062_v3  ;;  %4348 = vmatpush.bf16.msra.mxu1 %v4062_v3  ;;  %5814 = vst [vmem:[#allocation22_spill] sm:$0xff] %v4619_v30  ;;  %v4051_v55 = vld [vmem:[#allocation5 + $0xc8] sm:$0xff]  ;;  %v4650_v62 = vld [vmem:[#allocation5 + $0x90] sm:$0xff]  ;;  %v4084_v1 = vld [vmem:[#allocation8 + $0xd0] sm:$0xff] }
  0x34   :  { %4349 = vmatpush.bf16.msra.mxu2 %v4062_v3  ;;  %4350 = vmatpush.bf16.msra.mxu3 %v4062_v3  ;;  %v4077_v56 = vld [vmem:[#allocation8 + $0x98] sm:$0xff]  ;;  %v4052_v63 = vld [vmem:[#allocation5 + $0xd0] sm:$0xff]  ;;  %v4092_v2 = vld [vmem:[#allocation8 + $0x110] sm:$0xff] }
  0x35   :  { %v4085_v57 = vld [vmem:[#allocation8 + $0xd8] sm:$0xff]  ;;  %v4068_v3 = vld [vmem:[#allocation8 + $0x50] sm:$0xff]  ;;  %v4655_v4 = vld [vmem:[#allocation5 + $0x18] sm:$0xff] }
  0x36   :  { %v4093_v58 = vld [vmem:[#allocation8 + $0x118] sm:$0xff]  ;;  %v4657_v5 = vld [vmem:[#allocation5 + $0x58] sm:$0xff]  ;;  %v4664_v13 = vld [vmem:[#allocation5 + $0x20] sm:$0xff] }
  0x37   :  { %688 = vmatpush.bf16.msra.mxu0 %v4061_v10  ;;  %4351 = vmatpush.bf16.msra.mxu1 %v4061_v10  ;;  %v4069_v59 = vld [vmem:[#allocation8 + $0x58] sm:$0xff]  ;;  %v4659_v6 = vld [vmem:[#allocation5 + $0x98] sm:$0xff]  ;;  %v4666_v14 = vld [vmem:[#allocation5 + $0x60] sm:$0xff] }
  0x38   :  { %4352 = vmatpush.bf16.msra.mxu2 %v4061_v10  ;;  %4353 = vmatpush.bf16.msra.mxu3 %v4061_v10  ;;  %v4053_v7 = vld [vmem:[#allocation5 + $0xd8] sm:$0xff]  ;;  %v4054_v16 = vld [vmem:[#allocation5 + $0xe0] sm:$0xff]  ;;  %v4074_v17 = vld [vmem:[#allocation8 + $0x80] sm:$0xff] }
  0x39   :  { %v4075_v8 = vld [vmem:[#allocation8 + $0x88] sm:$0xff]  ;;  %v4082_v18 = vld [vmem:[#allocation8 + $0xc0] sm:$0xff]  ;;  %v4673_v21 = vld [vmem:[#allocation5 + $0x28] sm:$0xff] }
  0x3a   :  { %v4083_v10 = vld [vmem:[#allocation8 + $0xc8] sm:$0xff]  ;;  %v4090_v19 = vld [vmem:[#allocation8 + $0x100] sm:$0xff]  ;;  %v4675_v22 = vld [vmem:[#allocation5 + $0x68] sm:$0xff] }
  0x3b   :  { %689 = vmatpush.bf16.msra.mxu0 %v4060_v15  ;;  %4354 = vmatpush.bf16.msra.mxu1 %v4060_v15  ;;  %v4091_v11 = vld [vmem:[#allocation8 + $0x108] sm:$0xff]  ;;  %v4677_v23 = vld [vmem:[#allocation5 + $0xa8] sm:$0xff] }
  0x3c   :  { %4355 = vmatpush.bf16.msra.mxu2 %v4060_v15  ;;  %4356 = vmatpush.bf16.msra.mxu3 %v4060_v15  ;;  %v4067_v12 = vld [vmem:[#allocation8 + $0x48] sm:$0xff]  ;;  %v4668_v15 = vld [vmem:[#allocation5 + $0xa0] sm:$0xff]  ;;  %v4055_v24 = vld [vmem:[#allocation5 + $0xe8] sm:$0xff] }
  0x3d   :  { %v4121_v26 = vld [vmem:[#allocation8 + $0x1f8] sm:$0xff] }
  0x3e   :  { %v4129_v27 = vld [vmem:[#allocation8 + $0x238] sm:$0xff] }
  0x3f   :  { %690 = vmatpush.bf16.msra.mxu0 %v4059_v20  ;;  %4357 = vmatpush.bf16.msra.mxu1 %v4059_v20 }
  0x40   :  { %4358 = vmatpush.bf16.msra.mxu2 %v4059_v20  ;;  %4359 = vmatpush.bf16.msra.mxu3 %v4059_v20  ;;  %v4066_v20 = vld [vmem:[#allocation8 + $0x40] sm:$0xff] }
  0x43   :  { %691 = vmatpush.bf16.msra.mxu0 %v4058_v25  ;;  %4360 = vmatpush.bf16.msra.mxu1 %v4058_v25 }
  0x44   :  { %4361 = vmatpush.bf16.msra.mxu2 %v4058_v25  ;;  %4362 = vmatpush.bf16.msra.mxu3 %v4058_v25  ;;  %v4113_v25 = vld [vmem:[#allocation8 + $0x1b8] sm:$0xff] }
  0x46   :  { %692 = vmatmul.bf16.vlgmr.msra.gmra.mxu0 %v4619_v30  ;;  %732 = vmatmul.bf16.vlgmr.msra.gmra.mxu1 %v4621_v31 }
  0x47   :  { %772 = vmatmul.bf16.vlgmr.msra.gmra.mxu2 %v4623_v32  ;;  %812 = vmatmul.bf16.vlgmr.msra.gmra.mxu3 %v4049_v33  ;;  %v4105_v33 = vld [vmem:[#allocation8 + $0x178] sm:$0xff] }
  0x48   :  { %1022 = vmatpush.bf16.msrb.mxu2 %v4081_v28  ;;  %1384 = vmatpush.bf16.msrb.mxu3 %v4089_v29  ;;  %v4682_v28 = vld [vmem:[#allocation5 + $0x30] sm:$0xff] }
  0x49   :  { %1553 = vmatpush.bf16.msrb.mxu0 %v4097_v34  ;;  %853 = vmatpush.bf16.msrb.mxu1 %v4073_v35  ;;  %v4684_v29 = vld [vmem:[#allocation5 + $0x70] sm:$0xff] }
  0x4a   :  { %v4686_v34 = vld [vmem:[#allocation5 + $0xb0] sm:$0xff] }
  0x4b   :  { %v4056_v35 = vld [vmem:[#allocation5 + $0xf0] sm:$0xff] }
  0x4c   :  { %1023 = vmatpush.bf16.msrb.mxu2 %v4080_v36  ;;  %1385 = vmatpush.bf16.msrb.mxu3 %v4088_v37 }
  0x4d   :  { %1554 = vmatpush.bf16.msrb.mxu0 %v4096_v38  ;;  %854 = vmatpush.bf16.msrb.mxu1 %v4072_v39 }
  0x50   :  { %1024 = vmatpush.bf16.msrb.mxu2 %v4079_v40  ;;  %1386 = vmatpush.bf16.msrb.mxu3 %v4087_v41 }
  0x51   :  { %1555 = vmatpush.bf16.msrb.mxu0 %v4095_v42  ;;  %855 = vmatpush.bf16.msrb.mxu1 %v4071_v43 }
  0x54   :  { %1025 = vmatpush.bf16.msrb.mxu2 %v4078_v48  ;;  %1387 = vmatpush.bf16.msrb.mxu3 %v4086_v49 }
  0x55   :  { %1556 = vmatpush.bf16.msrb.mxu0 %v4094_v50  ;;  %856 = vmatpush.bf16.msrb.mxu1 %v4070_v51 }
  0x56   :  { %697 = vmatmul.bf16.gmra.mxu0 %v4628_v44  ;;  %737 = vmatmul.bf16.gmra.mxu1 %v4630_v45 }
  0x57   :  { %777 = vmatmul.bf16.gmra.mxu2 %v4632_v46  ;;  %817 = vmatmul.bf16.gmra.mxu3 %v4050_v47 }
  0x58   :  { %1026 = vmatpush.bf16.msrb.mxu2 %v4077_v56  ;;  %1388 = vmatpush.bf16.msrb.mxu3 %v4085_v57 }
  0x59   :  { %1557 = vmatpush.bf16.msrb.mxu0 %v4093_v58  ;;  %857 = vmatpush.bf16.msrb.mxu1 %v4069_v59 }
  0x5c   :  { %1027 = vmatpush.bf16.msrb.mxu2 %v4076_v0  ;;  %1389 = vmatpush.bf16.msrb.mxu3 %v4084_v1 }
  0x5d   :  { %1558 = vmatpush.bf16.msrb.mxu0 %v4092_v2  ;;  %858 = vmatpush.bf16.msrb.mxu1 %v4068_v3 }
  0x60   :  { %1028 = vmatpush.bf16.msrb.mxu2 %v4075_v8  ;;  %1390 = vmatpush.bf16.msrb.mxu3 %v4083_v10 }
  0x61   :  { %1559 = vmatpush.bf16.msrb.mxu0 %v4091_v11  ;;  %859 = vmatpush.bf16.msrb.mxu1 %v4067_v12  ;;  %v4104_v11 = vld [vmem:[#allocation8 + $0x170] sm:$0xff] }
  0x64   :  { %1029 = vmatpush.bf16.msrb.mxu2 %v4074_v17  ;;  %1391 = vmatpush.bf16.msrb.mxu3 %v4082_v18 }
  0x65   :  { %1560 = vmatpush.bf16.msrb.mxu0 %v4090_v19  ;;  %860 = vmatpush.bf16.msrb.mxu1 %v4066_v20 }
  0x66   :  { %702 = vmatmul.bf16.gmra.mxu0 %v4637_v52  ;;  %742 = vmatmul.bf16.gmra.mxu1 %v4639_v53 }
  0x67   :  { %782 = vmatmul.bf16.gmra.mxu2 %v4641_v54  ;;  %822 = vmatmul.bf16.gmra.mxu3 %v4051_v55 }
  0x68   :  { %2084 = vmatpush.bf16.msra.mxu2 %v4113_v25  ;;  %2253 = vmatpush.bf16.msra.mxu3 %v4121_v26 }
  0x69   :  { %2422 = vmatpush.bf16.msra.mxu0 %v4129_v27  ;;  %1722 = vmatpush.bf16.msra.mxu1 %v4105_v33 }
  0x6d   :  { %1723 = vmatpush.bf16.msra.mxu1 %v4104_v11 }
  0x76   :  { %707 = vmatmul.bf16.gmra.mxu0 %v4646_v60  ;;  %747 = vmatmul.bf16.gmra.mxu1 %v4648_v61 }
  0x77   :  { %787 = vmatmul.bf16.gmra.mxu2 %v4650_v62  ;;  %827 = vmatmul.bf16.gmra.mxu3 %v4052_v63  ;;  %v4120_v63 = vld [vmem:[#allocation8 + $0x1f0] sm:$0xff] }
  0x78   :  { %2254 = vmatpush.bf16.msra.mxu3 %v4120_v63 }
  0x86   :  { %712 = vmatmul.bf16.gmra.mxu0 %v4655_v4  ;;  %752 = vmatmul.bf16.gmra.mxu1 %v4657_v5 }
  0x87   :  { %792 = vmatmul.bf16.gmra.mxu2 %v4659_v6  ;;  %832 = vmatmul.bf16.gmra.mxu3 %v4053_v7  ;;  %v4128_v7 = vld [vmem:[#allocation8 + $0x230] sm:$0xff] }
  0x88   :  { %2423 = vmatpush.bf16.msra.mxu0 %v4128_v7 }
  0x96   :  { %717 = vmatmul.bf16.gmra.mxu0 %v4664_v13  ;;  %757 = vmatmul.bf16.gmra.mxu1 %v4666_v14 }
  0x97   :  { %797 = vmatmul.bf16.gmra.mxu2 %v4668_v15  ;;  %837 = vmatmul.bf16.gmra.mxu3 %v4054_v16 }
  0xa6   :  { %722 = vmatmul.bf16.gmra.mxu0 %v4673_v21  ;;  %762 = vmatmul.bf16.gmra.mxu1 %v4675_v22 }
  0xa7   :  { %802 = vmatmul.bf16.gmra.mxu2 %v4677_v23  ;;  %842 = vmatmul.bf16.gmra.mxu3 %v4055_v24 }
  0xb6   :  { %727 = vmatmul.bf16.gmra.mxu0 %v4682_v28  ;;  %767 = vmatmul.bf16.gmra.mxu1 %v4684_v29 }
  0xb7   :  { %807 = vmatmul.bf16.gmra.mxu2 %v4686_v34  ;;  %847 = vmatmul.bf16.gmra.mxu3 %v4056_v35 }
  0xc3   :  { %v4691_v36 = vpop.f32.mrf.mxu0  ;;  %v4693_v37 = vpop.f32.mrf.mxu1 }
  0xc6   :  { %861 = vmatmul.bf16.vlgmr.msrb.gmra.mxu1 %v4628_v44  ;;  %1561 = vmatmul.bf16.vlgmr.msrb.gmra.mxu0 %v4628_v44 }
  0xc7   :  { %1030 = vmatmul.bf16.vlgmr.msrb.gmra.mxu2 %v4637_v52  ;;  %1392 = vmatmul.bf16.vlgmr.msrb.gmra.mxu3 %v4619_v30  ;;  %v4127_v30 = vld [vmem:[#allocation8 + $0x228] sm:$0xff] }
  0xc8   :  { %2424 = vmatpush.bf16.msra.mxu0 %v4127_v30 }
  0xca   :  { %v4699_v38 = vpop.f32.mrf.mxu2  ;;  %v4701_v39 = vpop.f32.mrf.mxu3 }
  0xcb   :  { %5815 = vst [vmem:[#allocation23_spill] sm:$0xff] %v4699_v38  ;;  %v4703_v40 = vpop.f32.mrf.mxu0  ;;  %v4705_v41 = vpop.f32.mrf.mxu1 }
  0xcc   :  { %5816 = vst [vmem:[#allocation24_spill] sm:$0xff] %v4701_v39 }
  0xd2   :  { %v4707_v42 = vpop.f32.mrf.mxu2  ;;  %v4709_v43 = vpop.f32.mrf.mxu3 }
  0xd3   :  { %5817 = vst [vmem:[#allocation25_spill] sm:$0xff] %v4707_v42  ;;  %v4711_v47 = vpop.f32.mrf.mxu0  ;;  %v4713_v48 = vpop.f32.mrf.mxu1 }
  0xd4   :  { %5818 = vst [vmem:[#allocation26_spill] sm:$0xff] %v4709_v43 }
  0xd6   :  { %866 = vmatmul.bf16.gmra.mxu1 %v4637_v52  ;;  %1566 = vmatmul.bf16.gmra.mxu0 %v4637_v52 }
  0xd7   :  { %1035 = vmatmul.bf16.gmra.mxu2 %v4646_v60  ;;  %1397 = vmatmul.bf16.gmra.mxu3 %v4628_v44  ;;  %v4112_v44 = vld [vmem:[#allocation8 + $0x1b0] sm:$0xff] }
  0xd8   :  { %2085 = vmatpush.bf16.msra.mxu2 %v4112_v44 }
  0xda   :  { %v4719_v49 = vpop.f32.mrf.mxu2  ;;  %v4721_v50 = vpop.f32.mrf.mxu3 }
  0xdb   :  { %5819 = vst [vmem:[#allocation27_spill] sm:$0xff] %v4719_v49  ;;  %v4723_v51 = vpop.f32.mrf.mxu0  ;;  %v4725_v55 = vpop.f32.mrf.mxu1 }
  0xdc   :  { %5820 = vst [vmem:[#allocation28_spill] sm:$0xff] %v4721_v50 }
  0xe2   :  { %v4727_v56 = vpop.f32.mrf.mxu2  ;;  %v4729_v57 = vpop.f32.mrf.mxu3 }
  0xe3   :  { %5821 = vst [vmem:[#allocation29_spill] sm:$0xff] %v4727_v56  ;;  %v4731_v58 = vpop.f32.mrf.mxu0  ;;  %v4733_v59 = vpop.f32.mrf.mxu1 }
  0xe4   :  { %5822 = vst [vmem:[#allocation30_spill] sm:$0xff] %v4729_v57 }
  0xe6   :  { %871 = vmatmul.bf16.gmra.mxu1 %v4646_v60  ;;  %1571 = vmatmul.bf16.gmra.mxu0 %v4646_v60 }
  0xe7   :  { %1040 = vmatmul.bf16.gmra.mxu2 %v4655_v4  ;;  %1402 = vmatmul.bf16.gmra.mxu3 %v4637_v52 }
  0xea   :  { %v4739_v0 = vpop.f32.mrf.mxu2  ;;  %v4741_v1 = vpop.f32.mrf.mxu3 }
  0xeb   :  { %5823 = vst [vmem:[#allocation31_spill] sm:$0xff] %v4739_v0  ;;  %v4743_v2 = vpop.f32.mrf.mxu0  ;;  %v4745_v3 = vpop.f32.mrf.mxu1 }
  0xec   :  { %5824 = vst [vmem:[#allocation32_spill] sm:$0xff] %v4741_v1 }
  0xf2   :  { %v4747_v8 = vpop.f32.mrf.mxu2  ;;  %v4749_v10 = vpop.f32.mrf.mxu3 }
  0xf3   :  { %5825 = vst [vmem:[#allocation33_spill] sm:$0xff] %v4747_v8  ;;  %v4751_v52 = vpop.f32.mrf.mxu0  ;;  %v4753_v12 = vpop.f32.mrf.mxu1 }
  0xf4   :  { %5826 = vst [vmem:[#allocation34_spill] sm:$0xff] %v4749_v10 }
  0xf6   :  { %876 = vmatmul.bf16.gmra.mxu1 %v4655_v4  ;;  %1576 = vmatmul.bf16.gmra.mxu0 %v4655_v4 }
  0xf7   :  { %1045 = vmatmul.bf16.gmra.mxu2 %v4664_v13  ;;  %1407 = vmatmul.bf16.gmra.mxu3 %v4646_v60 }
  0xfa   :  { %v4759_v16 = vpop.f32.mrf.mxu2  ;;  %v4761_v17 = vpop.f32.mrf.mxu3 }
  0xfb   :  { %5827 = vst [vmem:[#allocation35_spill] sm:$0xff] %v4759_v16  ;;  %v4763_v18 = vpop.f32.mrf.mxu0  ;;  %v4765_v19 = vpop.f32.mrf.mxu1 }
  0xfc   :  { %5828 = vst [vmem:[#allocation36_spill] sm:$0xff] %v4761_v17 }
 0x102   :  { %v4767_v20 = vpop.f32.mrf.mxu2  ;;  %v4769_v24 = vpop.f32.mrf.mxu3 }
 0x103   :  { %5829 = vst [vmem:[#allocation37_spill] sm:$0xff] %v4767_v20  ;;  %v4771_v25 = vpop.f32.mrf.mxu0  ;;  %v4773_v26 = vpop.f32.mrf.mxu1 }
 0x104   :  { %5830 = vst [vmem:[#allocation38_spill] sm:$0xff] %v4769_v24 }
 0x106   :  { %881 = vmatmul.bf16.gmra.mxu1 %v4664_v13  ;;  %1581 = vmatmul.bf16.gmra.mxu0 %v4664_v13 }
 0x107   :  { %1050 = vmatmul.bf16.gmra.mxu2 %v4673_v21  ;;  %1412 = vmatmul.bf16.gmra.mxu3 %v4655_v4 }
 0x10a   :  { %v4779_v60 = vpop.f32.mrf.mxu2  ;;  %v4781_v27 = vpop.f32.mrf.mxu3 }
 0x10b   :  { %5831 = vst [vmem:[#allocation39_spill] sm:$0xff] %v4779_v60  ;;  %v4783_v33 = vpop.f32.mrf.mxu0  ;;  %v4785_v35 = vpop.f32.mrf.mxu1 }
 0x10c   :  { %5832 = vst [vmem:[#allocation40_spill] sm:$0xff] %v4781_v27 }
 0x112   :  { %v4787_v44 = vpop.f32.mrf.mxu2  ;;  %v4789_v63 = vpop.f32.mrf.mxu3 }
 0x113   :  { %5833 = vst [vmem:[#allocation41_spill] sm:$0xff] %v4787_v44  ;;  %v4791_v7 = vpop.f32.mrf.mxu0  ;;  %v4793_v11 = vpop.f32.mrf.mxu1 }
 0x114   :  { %5834 = vst [vmem:[#allocation42_spill] sm:$0xff] %v4789_v63 }
 0x116   :  { %886 = vmatmul.bf16.gmra.mxu1 %v4673_v21  ;;  %1586 = vmatmul.bf16.gmra.mxu0 %v4673_v21 }
 0x117   :  { %1055 = vmatmul.bf16.gmra.mxu2 %v4682_v28  ;;  %1417 = vmatmul.bf16.gmra.mxu3 %v4664_v13  ;;  %v4111_v13 = vld [vmem:[#allocation8 + $0x1a8] sm:$0xff] }
 0x118   :  { %2086 = vmatpush.bf16.msra.mxu2 %v4111_v13  ;;  %v4103_v13 = vld [vmem:[#allocation8 + $0x168] sm:$0xff] }
 0x119   :  { %1724 = vmatpush.bf16.msra.mxu1 %v4103_v13 }
 0x11a   :  { %v4799_v4 = vpop.f32.mrf.mxu2  ;;  %v4801_v27 = vpop.f32.mrf.mxu3 }
 0x11b   :  { %5835 = vst [vmem:[#allocation43_spill] sm:$0xff] %v4799_v4  ;;  %v4803_v24 = vpop.f32.mrf.mxu0  ;;  %v4805_v17 = vpop.f32.mrf.mxu1 }
 0x11c   :  { %5836 = vst [vmem:[#allocation44_spill] sm:$0xff] %v4801_v27  ;;  %v4119_v27 = vld [vmem:[#allocation8 + $0x1e8] sm:$0xff] }
 0x11d   :  { %2255 = vmatpush.bf16.msra.mxu3 %v4119_v27 }
 0x122   :  { %v4807_v63 = vpop.f32.mrf.mxu2  ;;  %v4809_v10 = vpop.f32.mrf.mxu3 }
 0x123   :  { %5837 = vst [vmem:[#allocation45_spill] sm:$0xff] %v4807_v63  ;;  %v4811_v1 = vpop.f32.mrf.mxu0  ;;  %v4813_v57 = vpop.f32.mrf.mxu1 }
 0x124   :  { %5838 = vst [vmem:[#allocation46_spill] sm:$0xff] %v4809_v10 }
 0x126   :  { %891 = vmatmul.bf16.gmra.mxu1 %v4682_v28  ;;  %1591 = vmatmul.bf16.gmra.mxu0 %v4682_v28 }
 0x127   :  { %1060 = vmatmul.bf16.gmra.mxu2 %v4621_v31  ;;  %1422 = vmatmul.bf16.gmra.mxu3 %v4673_v21 }
 0x12a   :  { %v4819_v50 = vpop.f32.mrf.mxu2  ;;  %v4821_v43 = vpop.f32.mrf.mxu3 }
 0x12b   :  { %5839 = vst [vmem:[#allocation47_spill] sm:$0xff] %v4819_v50  ;;  %v4823_v10 = vpop.f32.mrf.mxu0  ;;  %v4825_v39 = vpop.f32.mrf.mxu1 }
 0x12c   :  { %5840 = vst [vmem:[#allocation48_spill] sm:$0xff] %v4821_v43 }
 0x132   :  { %v4827_v63 = vpop.f32.mrf.mxu2  ;;  %v4829_v4 = vpop.f32.mrf.mxu3 }
 0x133   :  { %5841 = vst [vmem:[#allocation49_spill] sm:$0xff] %v4827_v63  ;;  %v4831_v44 = vpop.f32.mrf.mxu0  ;;  %v4833_v21 = vpop.f32.mrf.mxu1 }
 0x134   :  { %5842 = vst [vmem:[#allocation50_spill] sm:$0xff] %v4829_v4 }
 0x136   :  { %896 = vmatmul.bf16.gmra.mxu1 %v4621_v31  ;;  %1596 = vmatmul.bf16.gmra.mxu0 %v4621_v31 }
 0x137   :  { %1065 = vmatmul.bf16.gmra.mxu2 %v4630_v45  ;;  %1427 = vmatmul.bf16.gmra.mxu3 %v4682_v28 }
 0x13a   :  { %v4839_v27 = vpop.f32.mrf.mxu2  ;;  %v4841_v30 = vpop.f32.mrf.mxu3 }
 0x13b   :  { %5843 = vst [vmem:[#allocation51_spill] sm:$0xff] %v4839_v27  ;;  %v4843_v43 = vpop.f32.mrf.mxu0  ;;  %v4845_v4 = vpop.f32.mrf.mxu1 }
 0x13c   :  { %5844 = vst [vmem:[#allocation52_spill] sm:$0xff] %v4841_v30 }
 0x13d   :  { %5845 = vst [vmem:[#allocation53_spill] sm:$0xff] %v4845_v4 }
 0x142   :  { %v4847_v63 = vpop.f32.mrf.mxu2  ;;  %v4849_v50 = vpop.f32.mrf.mxu3 }
 0x143   :  { %5846 = vst [vmem:[#allocation54_spill] sm:$0xff] %v4847_v63  ;;  %v862_v60 = vpop.f32.mrf.mxu1  ;;  %v1562_v20 = vpop.f32.mrf.mxu0 }
 0x144   :  { %5847 = vst [vmem:[#allocation55_spill] sm:$0xff] %v4849_v50  ;;  %v863_v28 = vadd.f32 %v862_v60, %v4691_v36 }
 0x146   :  { %901 = vmatmul.bf16.gmra.mxu1 %v4630_v45  ;;  %1601 = vmatmul.bf16.gmra.mxu0 %v4630_v45 }
 0x147   :  { %1070 = vmatmul.bf16.gmra.mxu2 %v4639_v53  ;;  %1432 = vmatmul.bf16.gmra.mxu3 %v4621_v31 }
 0x14a   :  { %v1031_v13 = vpop.f32.mrf.mxu2  ;;  %v1393_v30 = vpop.f32.mrf.mxu3 }
 0x14b   :  { %v4856_v27 = vadd.f32 %v1031_v13, %v863_v28  ;;  %v4858_v16 = vadd.f32 %v1562_v20, %v1393_v30  ;;  %v864_v63 = vpop.f32.mrf.mxu1  ;;  %v1564_v50 = vpop.f32.mrf.mxu0 }
 0x14c   :  { %v865_v8 = vadd.f32 %v864_v63, %v4703_v40 }
 0x14d   :  { %v5760_v31 = vrot.slane %v4856_v27, 7 }
 0x152   :  { %v1033_v0 = vpop.f32.mrf.mxu2  ;;  %v1395_v56 = vpop.f32.mrf.mxu3 }
 0x153   :  { %v1034_v49 = vadd.f32 %v1033_v0, %v865_v8  ;;  %v4861_v42 = vadd.f32 %v1564_v50, %v1395_v56  ;;  %v867_v38 = vpop.f32.mrf.mxu1  ;;  %v1567_v4 = vpop.f32.mrf.mxu0 }
 0x154   :  { %v868_v50 = vadd.f32 %v867_v38, %v4711_v47  ;;  %v4110_v47 = vld [vmem:[#allocation8 + $0x1a0] sm:$0xff] }
 0x155   :  { %5848 = vst [vmem:[#allocation56_spill] sm:$0xff] %v4861_v42  ;;  %v2657_v36 = vrot.slane %v1034_v49, 7  ;;  %2087 = vmatpush.bf16.msra.mxu2 %v4110_v47 }
 0x156   :  { %906 = vmatmul.bf16.gmra.mxu1 %v4639_v53  ;;  %1606 = vmatmul.bf16.gmra.mxu0 %v4639_v53 }
 0x157   :  { %1075 = vmatmul.bf16.gmra.mxu2 %v4648_v61  ;;  %1437 = vmatmul.bf16.gmra.mxu3 %v4630_v45  ;;  %v4871_v40 = vsel %vm2655_vm0, %v5760_v31, %v2657_v36 }
 0x15a   :  { %v1036_v56 = vpop.f32.mrf.mxu2  ;;  %v1398_v0 = vpop.f32.mrf.mxu3 }
 0x15b   :  { %v4874_v8 = vadd.f32 %v1036_v56, %v868_v50  ;;  %v4876_v49 = vadd.f32 %v1567_v4, %v1398_v0  ;;  %v869_v20 = vpop.f32.mrf.mxu1  ;;  %v1569_v60 = vpop.f32.mrf.mxu0 }
 0x15c   :  { %v870_v63 = vadd.f32 %v869_v20, %v4723_v51  ;;  %v4118_v51 = vld [vmem:[#allocation8 + $0x1e0] sm:$0xff] }
 0x15d   :  { %v5761_v31 = vrot.slane %v4874_v8, 7  ;;  %2256 = vmatpush.bf16.msra.mxu3 %v4118_v51 }
 0x162   :  { %v1038_v30 = vpop.f32.mrf.mxu2  ;;  %v1400_v28 = vpop.f32.mrf.mxu3 }
 0x163   :  { %v1039_v45 = vadd.f32 %v1038_v30, %v870_v63  ;;  %v4879_v13 = vadd.f32 %v1569_v60, %v1400_v28  ;;  %v872_v42 = vpop.f32.mrf.mxu1  ;;  %v1572_v36 = vpop.f32.mrf.mxu0 }
 0x164   :  { %v873_v50 = vadd.f32 %v872_v42, %v4731_v58 }
 0x165   :  { %5849 = vst [vmem:[#allocation57_spill] sm:$0xff] %v4879_v13  ;;  %v2660_v38 = vrot.slane %v1039_v45, 7 }
 0x166   :  { %911 = vmatmul.bf16.gmra.mxu1 %v4648_v61  ;;  %1611 = vmatmul.bf16.gmra.mxu0 %v4648_v61 }
 0x167   :  { %1080 = vmatmul.bf16.gmra.mxu2 %v4657_v5  ;;  %1442 = vmatmul.bf16.gmra.mxu3 %v4639_v53  ;;  %v4889_v4 = vsel %vm2655_vm0, %v5761_v31, %v2660_v38  ;;  %v4126_v53 = vld [vmem:[#allocation8 + $0x220] sm:$0xff] }
 0x168   :  { %2425 = vmatpush.bf16.msra.mxu0 %v4126_v53 }
 0x16a   :  { %v1041_v56 = vpop.f32.mrf.mxu2  ;;  %v1403_v0 = vpop.f32.mrf.mxu3 }
 0x16b   :  { %v4892_v20 = vadd.f32 %v1041_v56, %v873_v50  ;;  %v4894_v60 = vadd.f32 %v1572_v36, %v1403_v0  ;;  %v874_v63 = vpop.f32.mrf.mxu1  ;;  %v1574_v30 = vpop.f32.mrf.mxu0  ;;  %v4102_v50 = vld [vmem:[#allocation8 + $0x160] sm:$0xff] }
 0x16c   :  { %v875_v28 = vadd.f32 %v874_v63, %v4743_v2  ;;  %1725 = vmatpush.bf16.msra.mxu1 %v4102_v50 }
 0x16d   :  { %v5762_v47 = vrot.slane %v4892_v20, 7 }
 0x172   :  { %v1043_v45 = vpop.f32.mrf.mxu2  ;;  %v1405_v13 = vpop.f32.mrf.mxu3 }
 0x173   :  { %v1044_v38 = vadd.f32 %v1043_v45, %v875_v28  ;;  %v4897_v31 = vadd.f32 %v1574_v30, %v1405_v13  ;;  %v877_v42 = vpop.f32.mrf.mxu1  ;;  %v1577_v58 = vpop.f32.mrf.mxu0 }
 0x174   :  { %v878_v13 = vadd.f32 %v877_v42, %v4751_v52 }
 0x175   :  { %5850 = vst [vmem:[#allocation58_spill] sm:$0xff] %v4897_v31  ;;  %v2663_v51 = vrot.slane %v1044_v38, 7 }
 0x176   :  { %916 = vmatmul.bf16.gmra.mxu1 %v4657_v5  ;;  %1616 = vmatmul.bf16.gmra.mxu0 %v4657_v5 }
 0x177   :  { %1085 = vmatmul.bf16.gmra.mxu2 %v4666_v14  ;;  %1447 = vmatmul.bf16.gmra.mxu3 %v4648_v61  ;;  %v4907_v2 = vsel %vm2655_vm0, %v5762_v47, %v2663_v51 }
 0x17a   :  { %v1046_v36 = vpop.f32.mrf.mxu2  ;;  %v1408_v56 = vpop.f32.mrf.mxu3 }
 0x17b   :  { %v4910_v0 = vadd.f32 %v1046_v36, %v878_v13  ;;  %v4912_v63 = vadd.f32 %v1577_v58, %v1408_v56  ;;  %v879_v30 = vpop.f32.mrf.mxu1  ;;  %v1579_v53 = vpop.f32.mrf.mxu0 }
 0x17c   :  { %v880_v28 = vadd.f32 %v879_v30, %v4763_v18 }
 0x17d   :  { %v5763_v50 = vrot.slane %v4910_v0, 7 }
 0x182   :  { %v1048_v45 = vpop.f32.mrf.mxu2  ;;  %v1410_v61 = vpop.f32.mrf.mxu3 }
 0x183   :  { %v1049_v38 = vadd.f32 %v1048_v45, %v880_v28  ;;  %v4915_v31 = vadd.f32 %v1579_v53, %v1410_v61  ;;  %v882_v51 = vpop.f32.mrf.mxu1  ;;  %v1582_v47 = vpop.f32.mrf.mxu0 }
 0x184   :  { %v883_v42 = vadd.f32 %v882_v51, %v4771_v25 }
 0x185   :  { %5851 = vst [vmem:[#allocation59_spill] sm:$0xff] %v4915_v31  ;;  %v2666_v52 = vrot.slane %v1049_v38, 7 }
 0x186   :  { %921 = vmatmul.bf16.gmra.mxu1 %v4666_v14  ;;  %1621 = vmatmul.bf16.gmra.mxu0 %v4666_v14 }
 0x187   :  { %1090 = vmatmul.bf16.gmra.mxu2 %v4675_v22  ;;  %1452 = vmatmul.bf16.gmra.mxu3 %v4657_v5  ;;  %v4925_v18 = vsel %vm2655_vm0, %v5763_v50, %v2666_v52 }
 0x18a   :  { %v1051_v58 = vpop.f32.mrf.mxu2  ;;  %v1413_v13 = vpop.f32.mrf.mxu3 }
 0x18b   :  { %v4928_v36 = vadd.f32 %v1051_v58, %v883_v42  ;;  %v4930_v56 = vadd.f32 %v1582_v47, %v1413_v13  ;;  %v884_v30 = vpop.f32.mrf.mxu1  ;;  %v1584_v53 = vpop.f32.mrf.mxu0 }
 0x18c   :  { %v885_v28 = vadd.f32 %v884_v30, %v4783_v33 }
 0x18d   :  { %5852 = vst [vmem:[#allocation60_spill] sm:$0xff] %v4928_v36  ;;  %v5764_v50 = vrot.slane %v4928_v36, 7 }
 0x192   :  { %v1053_v45 = vpop.f32.mrf.mxu2  ;;  %v1415_v61 = vpop.f32.mrf.mxu3 }
 0x193   :  { %v1054_v5 = vadd.f32 %v1053_v45, %v885_v28  ;;  %v4933_v38 = vadd.f32 %v1584_v53, %v1415_v61  ;;  %v887_v31 = vpop.f32.mrf.mxu1  ;;  %v1587_v52 = vpop.f32.mrf.mxu0  ;;  %v4139_v28 = vld [vmem:[#allocation7] sm:$0xff]  }
 0x194   :  { %v888_v47 = vadd.f32 %v887_v31, %v4791_v7  ;;  %v4140_v7 = vunpack.c.l.bf16 %v4139_v28  ;;  %v4141_v31 = vunpack.c.h.bf16 %v4139_v28 }
 0x195   :  { %5853 = vst [vmem:[#allocation61_spill] sm:$0xff] %v4933_v38  ;;  %v2669_v25 = vrot.slane %v1054_v5, 7 }
 0x196   :  { %926 = vmatmul.bf16.gmra.mxu1 %v4675_v22  ;;  %1626 = vmatmul.bf16.gmra.mxu0 %v4675_v22 }
 0x197   :  { %1095 = vmatmul.bf16.gmra.mxu2 %v4684_v29  ;;  %1457 = vmatmul.bf16.gmra.mxu3 %v4666_v14  ;;  %v4943_v33 = vsel %vm2655_vm0, %v5764_v50, %v2669_v25 }
 0x198   :  { %5854 = vst [vmem:[#allocation62_spill] sm:$0xff] %v4943_v33  ;;  %v4041_v33 = vld [vmem:[#allocation5 + $0x78] sm:$0xff] }
 0x19a   :  { %v1056_v51 = vpop.f32.mrf.mxu2  ;;  %v1418_v42 = vpop.f32.mrf.mxu3 }
 0x19b   :  { %v4946_v58 = vadd.f32 %v1056_v51, %v888_v47  ;;  %v4948_v13 = vadd.f32 %v1587_v52, %v1418_v42  ;;  %v889_v30 = vpop.f32.mrf.mxu1  ;;  %v1589_v53 = vpop.f32.mrf.mxu0  ;;  %v269_v52 = vmul.f32 %v4141_v31, %v4613_v9  ;;  %v4109_v42 = vld [vmem:[#allocation8 + $0x198] sm:$0xff] }
 0x19c   :  { %v890_v45 = vadd.f32 %v889_v30, %v4803_v24  ;;  %v268_v24 = vmul.f32 %v4140_v7, %v4613_v9  ;;  %v4117_v30 = vld [vmem:[#allocation8 + $0x1d8] sm:$0xff]  ;;  %2088 = vmatpush.bf16.msra.mxu2 %v4109_v42 }
 0x19d   :  { %5855 = vst [vmem:[#allocation63_spill] sm:$0xff] %v4946_v58  ;;  %v5767_v47 = vrot.slane %v4946_v58, 7  ;;  %2257 = vmatpush.bf16.msra.mxu3 %v4117_v30  ;;  %v4125_v58 = vld [vmem:[#allocation8 + $0x218] sm:$0xff] }
 0x19e   :  { %5856 = vst [vmem:[#allocation64_spill] sm:$0xff] %v4948_v13  ;;  %v272_v31 = vpack.c.bf16 %v268_v24, %v268_v24  ;;  %2426 = vmatpush.bf16.msra.mxu0 %v4125_v58  ;;  %v4101_v24 = vld [vmem:[#allocation8 + $0x158] sm:$0xff] }
 0x19f   :  { %1726 = vmatpush.bf16.msra.mxu1 %v4101_v24 }
 0x1a0   :  { %v484_v13 = vunpack.c.l.b16 %v272_v31 }
 0x1a2   :  { %v1058_v61 = vpop.f32.mrf.mxu2  ;;  %v1420_v14 = vpop.f32.mrf.mxu3 }
 0x1a3   :  { %v1059_v5 = vadd.f32 %v1058_v61, %v890_v45  ;;  %v4951_v38 = vadd.f32 %v1589_v53, %v1420_v14  ;;  %v892_v25 = vpop.f32.mrf.mxu1  ;;  %v1592_v50 = vpop.f32.mrf.mxu0 }
 0x1a4   :  { %v893_v28 = vadd.f32 %v892_v25, %v4811_v1 }
 0x1a5   :  { %5857 = vst [vmem:[#allocation65_spill] sm:$0xff] %v4951_v38  ;;  %v2672_v51 = vrot.slane %v1059_v5, 7  ;;  %v273_v38 = vpack.c.bf16 %v269_v52, %v269_v52 }
 0x1a6   :  { %931 = vmatmul.bf16.gmra.mxu1 %v4684_v29  ;;  %1631 = vmatmul.bf16.gmra.mxu0 %v4684_v29 }
 0x1a7   :  { %1100 = vmatmul.bf16.gmra.mxu2 %v4041_v33  ;;  %1462 = vmatmul.bf16.gmra.mxu3 %v4675_v22  ;;  %v4962_v53 = vsel %vm2655_vm0, %v5767_v47, %v2672_v51  ;;  %v485_v36 = vunpack.c.l.b16 %v273_v38 }
 0x1aa   :  { %v1061_v45 = vpop.f32.mrf.mxu2  ;;  %v1423_v61 = vpop.f32.mrf.mxu3 }
 0x1ab   :  { %v4965_v14 = vadd.f32 %v1061_v45, %v893_v28  ;;  %v4967_v22 = vadd.f32 %v1592_v50, %v1423_v61  ;;  %v894_v5 = vpop.f32.mrf.mxu1  ;;  %v1594_v7 = vpop.f32.mrf.mxu0  ;;  %v4972_v45 = vpack.c.b16 %v485_v36, %v484_v13 }
 0x1ac   :  { %v895_v51 = vadd.f32 %v894_v5, %v4823_v10 }
 0x1ad   :  { %v5768_v50 = vrot.slane %v4965_v14, 7 }
 0x1b2   :  { %v1063_v47 = vpop.f32.mrf.mxu2  ;;  %v1425_v1 = vpop.f32.mrf.mxu3 }
 0x1b3   :  { %v1064_v25 = vadd.f32 %v1063_v47, %v895_v51  ;;  %v4970_v42 = vadd.f32 %v1594_v7, %v1425_v1  ;;  %v897_v30 = vpop.f32.mrf.mxu1  ;;  %v1597_v28 = vpop.f32.mrf.mxu0 }
 0x1b4   :  { %v898_v38 = vadd.f32 %v897_v30, %v4831_v44 }
 0x1b5   :  { %v2675_v61 = vrot.slane %v1064_v25, 7 }
 0x1b6   :  { %936 = vmatmul.bf16.gmra.mxu1 %v4041_v33  ;;  %1636 = vmatmul.bf16.gmra.mxu0 %v4041_v33 }
 0x1b7   :  { %1105 = vmatmul.bf16.gmra.mxu2 %v4972_v45  ;;  %1467 = vmatmul.bf16.gmra.mxu3 %v4684_v29  ;;  %v4980_v10 = vsel %vm2655_vm0, %v5768_v50, %v2675_v61 }
 0x1ba   :  { %v1066_v36 = vpop.f32.mrf.mxu2  ;;  %v1428_v58 = vpop.f32.mrf.mxu3 }
 0x1bb   :  { %v4983_v13 = vadd.f32 %v1066_v36, %v898_v38  ;;  %v4985_v47 = vadd.f32 %v1597_v28, %v1428_v58  ;;  %v899_v52 = vpop.f32.mrf.mxu1  ;;  %v1599_v33 = vpop.f32.mrf.mxu0 }
 0x1bc   :  { %v900_v5 = vadd.f32 %v899_v52, %v4843_v43 }
 0x1bd   :  { %v5769_v61 = vrot.slane %v4983_v13, 7 }
 0x1c2   :  { %v1068_v7 = vpop.f32.mrf.mxu2  ;;  %v1430_v29 = vpop.f32.mrf.mxu3 }
 0x1c3   :  { %v1069_v31 = vadd.f32 %v1068_v7, %v900_v5  ;;  %v4988_v51 = vadd.f32 %v1599_v33, %v1430_v29  ;;  %v902_v1 = vpop.f32.mrf.mxu1  ;;  %v1602_v25 = vpop.f32.mrf.mxu0 }
 0x1c4   :  { %v903_v30 = vadd.f32 %v902_v1, %v4693_v37 }
 0x1c5   :  { %v2678_v44 = vrot.slane %v1069_v31, 7 }
 0x1c6   :  { %941 = vmatmul.bf16.gmra.mxu1 %v4632_v46  ;;  %1641 = vmatmul.bf16.gmra.mxu0 %v4632_v46 }
 0x1c7   :  { %1110 = vmatmul.bf16.gmra.mxu2 %v4641_v54  ;;  %1472 = vmatmul.bf16.gmra.mxu3 %v4623_v32  ;;  %v4998_v43 = vsel %vm2655_vm0, %v5769_v61, %v2678_v44 }
 0x1ca   :  { %v1071_v28 = vpop.f32.mrf.mxu2  ;;  %v1433_v24 = vpop.f32.mrf.mxu3 }
 0x1cb   :  { %v5001_v38 = vadd.f32 %v1071_v28, %v903_v30  ;;  %v5003_v36 = vadd.f32 %v1602_v25, %v1433_v24  ;;  %v904_v58 = vpop.f32.mrf.mxu1  ;;  %v1604_v52 = vpop.f32.mrf.mxu0 }
 0x1cc   :  { %v905_v33 = vadd.f32 %v904_v58, %v4705_v41 }
 0x1cd   :  { %v5770_v61 = vrot.slane %v5001_v38, 7 }
 0x1d2   :  { %v1073_v5 = vpop.f32.mrf.mxu2  ;;  %v1435_v7 = vpop.f32.mrf.mxu3 }
 0x1d3   :  { %v1074_v29 = vadd.f32 %v1073_v5, %v905_v33  ;;  %v5006_v31 = vadd.f32 %v1604_v52, %v1435_v7  ;;  %v907_v50 = vpop.f32.mrf.mxu1  ;;  %v1607_v44 = vpop.f32.mrf.mxu0 }
 0x1d4   :  { %v908_v1 = vadd.f32 %v907_v50, %v4713_v48  ;;  %v4108_v50 = vld [vmem:[#allocation8 + $0x190] sm:$0xff] }
 0x1d5   :  { %5858 = vst [vmem:[#allocation66_spill] sm:$0xff] %v5006_v31  ;;  %v2681_v37 = vrot.slane %v1074_v29, 7  ;;  %2089 = vmatpush.bf16.msra.mxu2 %v4108_v50 }
 0x1d6   :  { %946 = vmatmul.bf16.gmra.mxu1 %v4641_v54  ;;  %1646 = vmatmul.bf16.gmra.mxu0 %v4641_v54 }
 0x1d7   :  { %1115 = vmatmul.bf16.gmra.mxu2 %v4650_v62  ;;  %1477 = vmatmul.bf16.gmra.mxu3 %v4632_v46  ;;  %v5016_v41 = vsel %vm2655_vm0, %v5770_v61, %v2681_v37 }
 0x1da   :  { %v1076_v25 = vpop.f32.mrf.mxu2  ;;  %v1438_v30 = vpop.f32.mrf.mxu3 }
 0x1db   :  { %v5019_v28 = vadd.f32 %v1076_v25, %v908_v1  ;;  %v5021_v24 = vadd.f32 %v1607_v44, %v1438_v30  ;;  %v909_v58 = vpop.f32.mrf.mxu1  ;;  %v1609_v52 = vpop.f32.mrf.mxu0 }
 0x1dc   :  { %v910_v33 = vadd.f32 %v909_v58, %v4725_v55  ;;  %v4116_v55 = vld [vmem:[#allocation8 + $0x1d0] sm:$0xff] }
 0x1dd   :  { %v5771_v61 = vrot.slane %v5019_v28, 7  ;;  %2258 = vmatpush.bf16.msra.mxu3 %v4116_v55 }
 0x1e2   :  { %v1078_v5 = vpop.f32.mrf.mxu2  ;;  %v1440_v7 = vpop.f32.mrf.mxu3 }
 0x1e3   :  { %v1079_v46 = vadd.f32 %v1078_v5, %v910_v33  ;;  %v5024_v29 = vadd.f32 %v1609_v52, %v1440_v7  ;;  %v912_v31 = vpop.f32.mrf.mxu1  ;;  %v1612_v37 = vpop.f32.mrf.mxu0 }
 0x1e4   :  { %v913_v1 = vadd.f32 %v912_v31, %v4733_v59 }
 0x1e5   :  { %5859 = vst [vmem:[#allocation67_spill] sm:$0xff] %v5024_v29  ;;  %v2684_v48 = vrot.slane %v1079_v46, 7 }
 0x1e6   :  { %951 = vmatmul.bf16.gmra.mxu1 %v4650_v62  ;;  %1651 = vmatmul.bf16.gmra.mxu0 %v4650_v62 }
 0x1e7   :  { %1120 = vmatmul.bf16.gmra.mxu2 %v4659_v6  ;;  %1482 = vmatmul.bf16.gmra.mxu3 %v4641_v54  ;;  %v5034_v44 = vsel %vm2655_vm0, %v5771_v61, %v2684_v48  ;;  %v4124_v54 = vld [vmem:[#allocation8 + $0x210] sm:$0xff] }
 0x1e8   :  { %2427 = vmatpush.bf16.msra.mxu0 %v4124_v54 }
 0x1ea   :  { %v1081_v25 = vpop.f32.mrf.mxu2  ;;  %v1443_v30 = vpop.f32.mrf.mxu3 }
 0x1eb   :  { %v5037_v58 = vadd.f32 %v1081_v25, %v913_v1  ;;  %v5039_v52 = vadd.f32 %v1612_v37, %v1443_v30  ;;  %v914_v33 = vpop.f32.mrf.mxu1  ;;  %v1614_v5 = vpop.f32.mrf.mxu0  ;;  %v4100_v1 = vld [vmem:[#allocation8 + $0x150] sm:$0xff] }
 0x1ec   :  { %v915_v7 = vadd.f32 %v914_v33, %v4745_v3  ;;  %1727 = vmatpush.bf16.msra.mxu1 %v4100_v1 }
 0x1ed   :  { %v5772_v50 = vrot.slane %v5037_v58, 7 }
 0x1f2   :  { %v1083_v46 = vpop.f32.mrf.mxu2  ;;  %v1445_v29 = vpop.f32.mrf.mxu3 }
 0x1f3   :  { %v1084_v48 = vadd.f32 %v1083_v46, %v915_v7  ;;  %v5042_v61 = vadd.f32 %v1614_v5, %v1445_v29  ;;  %v917_v59 = vpop.f32.mrf.mxu1  ;;  %v1617_v31 = vpop.f32.mrf.mxu0 }
 0x1f4   :  { %v918_v29 = vadd.f32 %v917_v59, %v4753_v12 }
 0x1f5   :  { %5860 = vst [vmem:[#allocation68_spill] sm:$0xff] %v5042_v61  ;;  %v2687_v55 = vrot.slane %v1084_v48, 7 }
 0x1f6   :  { %956 = vmatmul.bf16.gmra.mxu1 %v4659_v6  ;;  %1656 = vmatmul.bf16.gmra.mxu0 %v4659_v6 }
 0x1f7   :  { %1125 = vmatmul.bf16.gmra.mxu2 %v4668_v15  ;;  %1487 = vmatmul.bf16.gmra.mxu3 %v4650_v62  ;;  %v5052_v3 = vsel %vm2655_vm0, %v5772_v50, %v2687_v55 }
 0x1fa   :  { %v1086_v37 = vpop.f32.mrf.mxu2  ;;  %v1448_v25 = vpop.f32.mrf.mxu3 }
 0x1fb   :  { %v5055_v30 = vadd.f32 %v1086_v37, %v918_v29  ;;  %v5057_v33 = vadd.f32 %v1617_v31, %v1448_v25  ;;  %v919_v5 = vpop.f32.mrf.mxu1  ;;  %v1619_v54 = vpop.f32.mrf.mxu0 }
 0x1fc   :  { %v920_v7 = vadd.f32 %v919_v5, %v4765_v19 }
 0x1fd   :  { %v5773_v1 = vrot.slane %v5055_v30, 7 }
 0x202   :  { %v1088_v46 = vpop.f32.mrf.mxu2  ;;  %v1450_v62 = vpop.f32.mrf.mxu3 }
 0x203   :  { %v1089_v48 = vadd.f32 %v1088_v46, %v920_v7  ;;  %v5060_v61 = vadd.f32 %v1619_v54, %v1450_v62  ;;  %v922_v55 = vpop.f32.mrf.mxu1  ;;  %v1622_v50 = vpop.f32.mrf.mxu0 }
 0x204   :  { %v923_v59 = vadd.f32 %v922_v55, %v4773_v26 }
 0x205   :  { %5861 = vst [vmem:[#allocation69_spill] sm:$0xff] %v5060_v61  ;;  %v2690_v12 = vrot.slane %v1089_v48, 7 }
 0x206   :  { %961 = vmatmul.bf16.gmra.mxu1 %v4668_v15  ;;  %1661 = vmatmul.bf16.gmra.mxu0 %v4668_v15 }
 0x207   :  { %1130 = vmatmul.bf16.gmra.mxu2 %v4677_v23  ;;  %1492 = vmatmul.bf16.gmra.mxu3 %v4659_v6  ;;  %v5070_v19 = vsel %vm2655_vm0, %v5773_v1, %v2690_v12 }
 0x20a   :  { %v1091_v31 = vpop.f32.mrf.mxu2  ;;  %v1453_v29 = vpop.f32.mrf.mxu3 }
 0x20b   :  { %v5073_v37 = vadd.f32 %v1091_v31, %v923_v59  ;;  %v5075_v25 = vadd.f32 %v1622_v50, %v1453_v29  ;;  %v924_v5 = vpop.f32.mrf.mxu1  ;;  %v1624_v54 = vpop.f32.mrf.mxu0 }
 0x20c   :  { %v925_v7 = vadd.f32 %v924_v5, %v4785_v35 }
 0x20d   :  { %v5774_v1 = vrot.slane %v5073_v37, 7 }
 0x212   :  { %v1093_v46 = vpop.f32.mrf.mxu2  ;;  %v1455_v62 = vpop.f32.mrf.mxu3 }
 0x213   :  { %v1094_v6 = vadd.f32 %v1093_v46, %v925_v7  ;;  %v5078_v48 = vadd.f32 %v1624_v54, %v1455_v62  ;;  %v927_v61 = vpop.f32.mrf.mxu1  ;;  %v1627_v12 = vpop.f32.mrf.mxu0 }
 0x214   :  { %v928_v50 = vadd.f32 %v927_v61, %v4793_v11  ;;  %v4386_v61 = vld [vmem:[#allocation5 + $0xb8] sm:$0xff] }
 0x215   :  { %5862 = vst [vmem:[#allocation70_spill] sm:$0xff] %v5078_v48  ;;  %v2693_v26 = vrot.slane %v1094_v6, 7 }
 0x216   :  { %966 = vmatmul.bf16.gmra.mxu1 %v4677_v23  ;;  %1666 = vmatmul.bf16.gmra.mxu0 %v4677_v23 }
 0x217   :  { %1135 = vmatmul.bf16.gmra.mxu2 %v4686_v34  ;;  %1497 = vmatmul.bf16.gmra.mxu3 %v4668_v15  ;;  %v5088_v35 = vsel %vm2655_vm0, %v5774_v1, %v2693_v26 }
 0x21a   :  { %v1096_v55 = vpop.f32.mrf.mxu2  ;;  %v1458_v59 = vpop.f32.mrf.mxu3 }
 0x21b   :  { %v5091_v31 = vadd.f32 %v1096_v55, %v928_v50  ;;  %v5093_v29 = vadd.f32 %v1627_v12, %v1458_v59  ;;  %v929_v5 = vpop.f32.mrf.mxu1  ;;  %v1629_v54 = vpop.f32.mrf.mxu0  ;;  %v4107_v12 = vld [vmem:[#allocation8 + $0x188] sm:$0xff] }
 0x21c   :  { %v930_v7 = vadd.f32 %v929_v5, %v4805_v17  ;;  %v4115_v17 = vld [vmem:[#allocation8 + $0x1c8] sm:$0xff]  ;;  %2090 = vmatpush.bf16.msra.mxu2 %v4107_v12 }
 0x21d   :  { %5863 = vst [vmem:[#allocation71_spill] sm:$0xff] %v5091_v31  ;;  %v5776_v1 = vrot.slane %v5091_v31, 7  ;;  %2259 = vmatpush.bf16.msra.mxu3 %v4115_v17 }
 0x21e   :  { %5864 = vst [vmem:[#allocation72_spill] sm:$0xff] %v5093_v29 }
 0x222   :  { %v1098_v46 = vpop.f32.mrf.mxu2  ;;  %v1460_v62 = vpop.f32.mrf.mxu3 }
 0x223   :  { %v1099_v15 = vadd.f32 %v1098_v46, %v930_v7  ;;  %v5096_v6 = vadd.f32 %v1629_v54, %v1460_v62  ;;  %v932_v48 = vpop.f32.mrf.mxu1  ;;  %v1632_v26 = vpop.f32.mrf.mxu0 }
 0x224   :  { %v933_v55 = vadd.f32 %v932_v48, %v4813_v57 }
 0x225   :  { %5865 = vst [vmem:[#allocation73_spill] sm:$0xff] %v5096_v6  ;;  %v2696_v11 = vrot.slane %v1099_v15, 7 }
 0x226   :  { %971 = vmatmul.bf16.gmra.mxu1 %v4686_v34  ;;  %1671 = vmatmul.bf16.gmra.mxu0 %v4686_v34 }
 0x227   :  { %1140 = vmatmul.bf16.gmra.mxu2 %v4386_v61  ;;  %1502 = vmatmul.bf16.gmra.mxu3 %v4677_v23  ;;  %v5105_v50 = vsel %vm2655_vm0, %v5776_v1, %v2696_v11  ;;  %v4123_v23 = vld [vmem:[#allocation8 + $0x208] sm:$0xff] }
 0x228   :  { %5866 = vst [vmem:[#allocation74_spill] sm:$0xff] %v5105_v50  ;;  %2428 = vmatpush.bf16.msra.mxu0 %v4123_v23 }
 0x22a   :  { %v1101_v59 = vpop.f32.mrf.mxu2  ;;  %v1463_v5 = vpop.f32.mrf.mxu3 }
 0x22b   :  { %v5108_v54 = vadd.f32 %v1101_v59, %v933_v55  ;;  %v5110_v7 = vadd.f32 %v1632_v26, %v1463_v5  ;;  %v934_v46 = vpop.f32.mrf.mxu1  ;;  %v1634_v62 = vpop.f32.mrf.mxu0  ;;  %v4099_v55 = vld [vmem:[#allocation8 + $0x148] sm:$0xff]  ;;  %v4387_v26 = vld [vmem:[#allocation5 + $0xc0] sm:$0xff] }
 0x22c   :  { %v935_v15 = vadd.f32 %v934_v46, %v4825_v39  ;;  %1728 = vmatpush.bf16.msra.mxu1 %v4099_v55 }
 0x22d   :  { %5867 = vst [vmem:[#allocation75_spill] sm:$0xff] %v5108_v54  ;;  %v5778_v12 = vrot.slane %v5108_v54, 7 }
 0x22e   :  { %5868 = vst [vmem:[#allocation76_spill] sm:$0xff] %v5110_v7 }
 0x232   :  { %v1103_v6 = vpop.f32.mrf.mxu2  ;;  %v1465_v31 = vpop.f32.mrf.mxu3 }
 0x233   :  { %v1104_v11 = vadd.f32 %v1103_v6, %v935_v15  ;;  %v5113_v1 = vadd.f32 %v1634_v62, %v1465_v31  ;;  %v937_v57 = vpop.f32.mrf.mxu1  ;;  %v1637_v48 = vpop.f32.mrf.mxu0  ;;  %v5873_v15 = vld [vmem:[#allocation53_spill] sm:$0xff] }
 0x234   :  { %v938_v31 = vadd.f32 %v937_v57, %v4833_v21  ;;  %v4388_v57 = vld [vmem:[#allocation5 + $0xc8] sm:$0xff] }
 0x235   :  { %5869 = vst [vmem:[#allocation77_spill] sm:$0xff] %v5113_v1  ;;  %v2699_v17 = vrot.slane %v1104_v11, 7 }
 0x236   :  { %976 = vmatmul.bf16.gmra.mxu1 %v4386_v61  ;;  %1676 = vmatmul.bf16.gmra.mxu0 %v4386_v61 }
 0x237   :  { %1145 = vmatmul.bf16.gmra.mxu2 %v4387_v26  ;;  %1507 = vmatmul.bf16.gmra.mxu3 %v4686_v34  ;;  %v5120_v39 = vsel %vm2655_vm0, %v5778_v12, %v2699_v17 }
 0x238   :  { %5870 = vst [vmem:[#allocation78_spill] sm:$0xff] %v5120_v39 }
 0x23a   :  { %v1106_v6 = vpop.f32.mrf.mxu2  ;;  %v1468_v59 = vpop.f32.mrf.mxu3 }
 0x23b   :  { %v5123_v5 = vadd.f32 %v1106_v6, %v938_v31  ;;  %v5125_v46 = vadd.f32 %v1637_v48, %v1468_v59  ;;  %v939_v62 = vpop.f32.mrf.mxu1  ;;  %v1639_v23 = vpop.f32.mrf.mxu0  ;;  %v5876_v31 = vld [vmem:[#allocation23_spill] sm:$0xff] }
 0x23c   :  { %v940_v11 = vadd.f32 %v939_v62, %v5873_v15 }
 0x23d   :  { %5871 = vst [vmem:[#allocation79_spill] sm:$0xff] %v5123_v5  ;;  %v5780_v55 = vrot.slane %v5123_v5, 7 }
 0x23e   :  { %5872 = vst [vmem:[#allocation80_spill] sm:$0xff] %v5125_v46 }
 0x242   :  { %v1108_v1 = vpop.f32.mrf.mxu2  ;;  %v1470_v34 = vpop.f32.mrf.mxu3 }
 0x243   :  { %v1109_v7 = vadd.f32 %v1108_v1, %v940_v11  ;;  %v5128_v54 = vadd.f32 %v1639_v23, %v1470_v34  ;;  %v942_v17 = vpop.f32.mrf.mxu1  ;;  %v1642_v12 = vpop.f32.mrf.mxu0  ;;  %v5879_v11 = vld [vmem:[#allocation25_spill] sm:$0xff] }
 0x244   :  { %v943_v6 = vadd.f32 %v942_v17, %v5876_v31  ;;  %v4389_v31 = vld [vmem:[#allocation5 + $0xd0] sm:$0xff] }
 0x245   :  { %5874 = vst [vmem:[#allocation53_spill] sm:$0xff] %v5128_v54  ;;  %v2702_v21 = vrot.slane %v1109_v7, 7 }
 0x246   :  { %981 = vmatmul.bf16.gmra.mxu1 %v4387_v26  ;;  %1681 = vmatmul.bf16.gmra.mxu0 %v4387_v26 }
 0x247   :  { %1150 = vmatmul.bf16.gmra.mxu2 %v4388_v57  ;;  %1512 = vmatmul.bf16.gmra.mxu3 %v4386_v61  ;;  %v5134_v48 = vsel %vm2655_vm0, %v5780_v55, %v2702_v21 }
 0x248   :  { %5875 = vst [vmem:[#allocation81_spill] sm:$0xff] %v5134_v48 }
 0x24a   :  { %v1111_v1 = vpop.f32.mrf.mxu2  ;;  %v1473_v59 = vpop.f32.mrf.mxu3 }
 0x24b   :  { %v5137_v62 = vadd.f32 %v1111_v1, %v943_v6  ;;  %v5139_v23 = vadd.f32 %v1642_v12, %v1473_v59  ;;  %v944_v15 = vpop.f32.mrf.mxu1  ;;  %v1644_v7 = vpop.f32.mrf.mxu0  ;;  %v5882_v6 = vld [vmem:[#allocation27_spill] sm:$0xff] }
 0x24c   :  { %v945_v34 = vadd.f32 %v944_v15, %v5879_v11 }
 0x24d   :  { %5877 = vst [vmem:[#allocation23_spill] sm:$0xff] %v5137_v62  ;;  %v5782_v55 = vrot.slane %v5137_v62, 7 }
 0x24e   :  { %5878 = vst [vmem:[#allocation82_spill] sm:$0xff] %v5139_v23 }
 0x252   :  { %v1113_v54 = vpop.f32.mrf.mxu2  ;;  %v1475_v46 = vpop.f32.mrf.mxu3 }
 0x253   :  { %v1114_v61 = vadd.f32 %v1113_v54, %v945_v34  ;;  %v5142_v39 = vadd.f32 %v1644_v7, %v1475_v46  ;;  %v947_v5 = vpop.f32.mrf.mxu1  ;;  %v1647_v21 = vpop.f32.mrf.mxu0  ;;  %v5885_v34 = vld [vmem:[#allocation29_spill] sm:$0xff] }
 0x254   :  { %v948_v1 = vadd.f32 %v947_v5, %v5882_v6  ;;  %v4390_v6 = vld [vmem:[#allocation5 + $0xd8] sm:$0xff] }
 0x255   :  { %5880 = vst [vmem:[#allocation25_spill] sm:$0xff] %v5142_v39  ;;  %v2705_v17 = vrot.slane %v1114_v61, 7 }
 0x256   :  { %986 = vmatmul.bf16.gmra.mxu1 %v4388_v57  ;;  %1686 = vmatmul.bf16.gmra.mxu0 %v4388_v57 }
 0x257   :  { %1155 = vmatmul.bf16.gmra.mxu2 %v4389_v31  ;;  %1517 = vmatmul.bf16.gmra.mxu3 %v4387_v26  ;;  %v5148_v12 = vsel %vm2655_vm0, %v5782_v55, %v2705_v17 }
 0x258   :  { %5881 = vst [vmem:[#allocation83_spill] sm:$0xff] %v5148_v12 }
 0x25a   :  { %v1116_v54 = vpop.f32.mrf.mxu2  ;;  %v1478_v46 = vpop.f32.mrf.mxu3 }
 0x25b   :  { %v5151_v59 = vadd.f32 %v1116_v54, %v948_v1  ;;  %v5153_v15 = vadd.f32 %v1647_v21, %v1478_v46  ;;  %v949_v7 = vpop.f32.mrf.mxu1  ;;  %v1649_v11 = vpop.f32.mrf.mxu0  ;;  %v4106_v21 = vld [vmem:[#allocation8 + $0x180] sm:$0xff] }
 0x25c   :  { %v950_v61 = vadd.f32 %v949_v7, %v5885_v34  ;;  %v4114_v1 = vld [vmem:[#allocation8 + $0x1c0] sm:$0xff]  ;;  %2091 = vmatpush.bf16.msra.mxu2 %v4106_v21 }
 0x25d   :  { %5883 = vst [vmem:[#allocation27_spill] sm:$0xff] %v5151_v59  ;;  %v5784_v55 = vrot.slane %v5151_v59, 7  ;;  %2260 = vmatpush.bf16.msra.mxu3 %v4114_v1 }
 0x25e   :  { %5884 = vst [vmem:[#allocation84_spill] sm:$0xff] %v5153_v15 }
 0x262   :  { %v1118_v39 = vpop.f32.mrf.mxu2  ;;  %v1480_v23 = vpop.f32.mrf.mxu3 }
 0x263   :  { %v1119_v26 = vadd.f32 %v1118_v39, %v950_v61  ;;  %v5156_v48 = vadd.f32 %v1649_v11, %v1480_v23  ;;  %v952_v62 = vpop.f32.mrf.mxu1  ;;  %v1652_v17 = vpop.f32.mrf.mxu0  ;;  %v5888_v39 = vld [vmem:[#allocation31_spill] sm:$0xff] }
 0x264   :  { %v953_v23 = vadd.f32 %v952_v62, %v5888_v39 }
 0x265   :  { %5886 = vst [vmem:[#allocation29_spill] sm:$0xff] %v5156_v48  ;;  %v2708_v5 = vrot.slane %v1119_v26, 7  ;;  %v5891_v48 = vld [vmem:[#allocation33_spill] sm:$0xff] }
 0x266   :  { %991 = vmatmul.bf16.gmra.mxu1 %v4389_v31  ;;  %1691 = vmatmul.bf16.gmra.mxu0 %v4389_v31 }
 0x267   :  { %1160 = vmatmul.bf16.gmra.mxu2 %v4390_v6  ;;  %1522 = vmatmul.bf16.gmra.mxu3 %v4388_v57  ;;  %v5162_v54 = vsel %vm2655_vm0, %v5784_v55, %v2708_v5  ;;  %v4122_v57 = vld [vmem:[#allocation8 + $0x200] sm:$0xff] }
 0x268   :  { %5887 = vst [vmem:[#allocation85_spill] sm:$0xff] %v5162_v54  ;;  %2429 = vmatpush.bf16.msra.mxu0 %v4122_v57 }
 0x26a   :  { %v1121_v46 = vpop.f32.mrf.mxu2  ;;  %v1483_v7 = vpop.f32.mrf.mxu3 }
 0x26b   :  { %v5165_v11 = vadd.f32 %v1121_v46, %v953_v23  ;;  %v5167_v34 = vadd.f32 %v1652_v17, %v1483_v7  ;;  %v954_v61 = vpop.f32.mrf.mxu1  ;;  %v1654_v26 = vpop.f32.mrf.mxu0  ;;  %v4098_v23 = vld [vmem:[#allocation8 + $0x140] sm:$0xff]  ;;  %v4391_v17 = vld [vmem:[#allocation5 + $0xe0] sm:$0xff] }
 0x26c   :  { %v955_v15 = vadd.f32 %v954_v61, %v5891_v48  ;;  %1729 = vmatpush.bf16.msra.mxu1 %v4098_v23 }
 0x26d   :  { %5889 = vst [vmem:[#allocation31_spill] sm:$0xff] %v5165_v11  ;;  %v5786_v1 = vrot.slane %v5165_v11, 7 }
 0x26e   :  { %5890 = vst [vmem:[#allocation86_spill] sm:$0xff] %v5167_v34 }
 0x272   :  { %v1123_v59 = vpop.f32.mrf.mxu2  ;;  %v1485_v12 = vpop.f32.mrf.mxu3 }
 0x273   :  { %v1124_v5 = vadd.f32 %v1123_v59, %v955_v15  ;;  %v5170_v55 = vadd.f32 %v1654_v26, %v1485_v12  ;;  %v957_v62 = vpop.f32.mrf.mxu1  ;;  %v1657_v21 = vpop.f32.mrf.mxu0  ;;  %v5894_v59 = vld [vmem:[#allocation35_spill] sm:$0xff] }
 0x274   :  { %v958_v12 = vadd.f32 %v957_v62, %v5894_v59  ;;  %v4392_v59 = vld [vmem:[#allocation5 + $0xe8] sm:$0xff] }
 0x275   :  { %5892 = vst [vmem:[#allocation33_spill] sm:$0xff] %v5170_v55  ;;  %v2711_v39 = vrot.slane %v1124_v5, 7  ;;  %v5897_v5 = vld [vmem:[#allocation37_spill] sm:$0xff] }
 0x276   :  { %996 = vmatmul.bf16.gmra.mxu1 %v4390_v6  ;;  %1696 = vmatmul.bf16.gmra.mxu0 %v4390_v6 }
 0x277   :  { %1165 = vmatmul.bf16.gmra.mxu2 %v4391_v17  ;;  %1527 = vmatmul.bf16.gmra.mxu3 %v4389_v31  ;;  %v5176_v48 = vsel %vm2655_vm0, %v5786_v1, %v2711_v39 }
 0x278   :  { %5893 = vst [vmem:[#allocation87_spill] sm:$0xff] %v5176_v48 }
 0x27a   :  { %v1126_v15 = vpop.f32.mrf.mxu2  ;;  %v1488_v46 = vpop.f32.mrf.mxu3 }
 0x27b   :  { %v5179_v7 = vadd.f32 %v1126_v15, %v958_v12  ;;  %v5181_v61 = vadd.f32 %v1657_v21, %v1488_v46  ;;  %v959_v26 = vpop.f32.mrf.mxu1  ;;  %v1659_v57 = vpop.f32.mrf.mxu0  ;;  %v5900_v12 = vld [vmem:[#allocation39_spill] sm:$0xff] }
 0x27c   :  { %v960_v55 = vadd.f32 %v959_v26, %v5897_v5  ;;  %v5903_v5 = vld [vmem:[#allocation41_spill] sm:$0xff] }
 0x27d   :  { %5895 = vst [vmem:[#allocation35_spill] sm:$0xff] %v5179_v7  ;;  %v5788_v23 = vrot.slane %v5179_v7, 7 }
 0x27e   :  { %5896 = vst [vmem:[#allocation88_spill] sm:$0xff] %v5181_v61 }
 0x282   :  { %v1128_v34 = vpop.f32.mrf.mxu2  ;;  %v1490_v31 = vpop.f32.mrf.mxu3 }
 0x283   :  { %v1129_v54 = vadd.f32 %v1128_v34, %v960_v55  ;;  %v5184_v11 = vadd.f32 %v1659_v57, %v1490_v31  ;;  %v962_v39 = vpop.f32.mrf.mxu1  ;;  %v1662_v1 = vpop.f32.mrf.mxu0 }
 0x284   :  { %v963_v15 = vadd.f32 %v962_v39, %v5900_v12  ;;  %v4393_v12 = vld [vmem:[#allocation5 + $0xf0] sm:$0xff] }
 0x285   :  { %5898 = vst [vmem:[#allocation37_spill] sm:$0xff] %v5184_v11  ;;  %v2714_v62 = vrot.slane %v1129_v54, 7 }
 0x286   :  { %1001 = vmatmul.bf16.gmra.mxu1 %v4391_v17  ;;  %1701 = vmatmul.bf16.gmra.mxu0 %v4391_v17 }
 0x287   :  { %1170 = vmatmul.bf16.gmra.mxu2 %v4392_v59  ;;  %1532 = vmatmul.bf16.gmra.mxu3 %v4390_v6  ;;  %v5190_v21 = vsel %vm2655_vm0, %v5788_v23, %v2714_v62 }
 0x288   :  { %5899 = vst [vmem:[#allocation89_spill] sm:$0xff] %v5190_v21 }
 0x28a   :  { %v1131_v55 = vpop.f32.mrf.mxu2  ;;  %v1493_v34 = vpop.f32.mrf.mxu3 }
 0x28b   :  { %v5193_v46 = vadd.f32 %v1131_v55, %v963_v15  ;;  %v5195_v26 = vadd.f32 %v1662_v1, %v1493_v34  ;;  %v964_v57 = vpop.f32.mrf.mxu1  ;;  %v1664_v54 = vpop.f32.mrf.mxu0  ;;  %v5906_v15 = vld [vmem:[#allocation43_spill] sm:$0xff] }
 0x28c   :  { %v965_v31 = vadd.f32 %v964_v57, %v5903_v5 }
 0x28d   :  { %5901 = vst [vmem:[#allocation39_spill] sm:$0xff] %v5193_v46  ;;  %v5790_v23 = vrot.slane %v5193_v46, 7 }
 0x28e   :  { %5902 = vst [vmem:[#allocation90_spill] sm:$0xff] %v5195_v26 }
 0x292   :  { %v1133_v11 = vpop.f32.mrf.mxu2  ;;  %v1495_v61 = vpop.f32.mrf.mxu3 }
 0x293   :  { %v1134_v6 = vadd.f32 %v1133_v11, %v965_v31  ;;  %v5198_v48 = vadd.f32 %v1664_v54, %v1495_v61  ;;  %v967_v7 = vpop.f32.mrf.mxu1  ;;  %v1667_v62 = vpop.f32.mrf.mxu0  ;;  %v4307_v31 = vld [vmem:[#allocation7 + $0x8] sm:$0xff]  }
 0x294   :  { %v968_v55 = vadd.f32 %v967_v7, %v5906_v15  ;;  %v4144_v7 = vunpack.c.l.bf16 %v4307_v31  ;;  %v4145_v15 = vunpack.c.h.bf16 %v4307_v31 }
 0x295   :  { %5904 = vst [vmem:[#allocation41_spill] sm:$0xff] %v5198_v48  ;;  %v2717_v39 = vrot.slane %v1134_v6, 7  ;;  %v5909_v6 = vld [vmem:[#allocation45_spill] sm:$0xff] }
 0x296   :  { %1006 = vmatmul.bf16.gmra.mxu1 %v4392_v59  ;;  %1706 = vmatmul.bf16.gmra.mxu0 %v4392_v59 }
 0x297   :  { %1175 = vmatmul.bf16.gmra.mxu2 %v4393_v12  ;;  %1537 = vmatmul.bf16.gmra.mxu3 %v4391_v17  ;;  %v5204_v1 = vsel %vm2655_vm0, %v5790_v23, %v2717_v39 }
 0x298   :  { %5905 = vst [vmem:[#allocation91_spill] sm:$0xff] %v5204_v1  ;;  %v4057_v1 = vld [vmem:[#allocation5 + $0xf8] sm:$0xff] }
 0x29a   :  { %v1136_v11 = vpop.f32.mrf.mxu2  ;;  %v1498_v61 = vpop.f32.mrf.mxu3 }
 0x29b   :  { %v5207_v34 = vadd.f32 %v1136_v11, %v968_v55  ;;  %v5209_v57 = vadd.f32 %v1667_v62, %v1498_v61  ;;  %v969_v54 = vpop.f32.mrf.mxu1  ;;  %v1669_v5 = vpop.f32.mrf.mxu0  ;;  %v270_v62 = vmul.f32 %v4144_v7, %v4613_v9  ;;  %v271_v61 = vmul.f32 %v4145_v15, %v4613_v9  ;;  %v5913_v9 = vld [vmem:[#allocation49_spill] sm:$0xff] }
 0x29c   :  { %v970_v48 = vadd.f32 %v969_v54, %v5909_v6 }
 0x29d   :  { %5907 = vst [vmem:[#allocation43_spill] sm:$0xff] %v5207_v34  ;;  %v5792_v55 = vrot.slane %v5207_v34, 7 }
 0x29e   :  { %5908 = vst [vmem:[#allocation92_spill] sm:$0xff] %v5209_v57  ;;  %v275_v57 = vpack.c.bf16 %v271_v61, %v271_v61 }
 0x2a0   :  { %v487_v50 = vunpack.c.l.b16 %v275_v57 }
 0x2a2   :  { %v1138_v26 = vpop.f32.mrf.mxu2  ;;  %v1500_v17 = vpop.f32.mrf.mxu3 }
 0x2a3   :  { %v1139_v21 = vadd.f32 %v1138_v26, %v970_v48  ;;  %v5212_v46 = vadd.f32 %v1669_v5, %v1500_v17  ;;  %v972_v39 = vpop.f32.mrf.mxu1  ;;  %v1672_v23 = vpop.f32.mrf.mxu0  ;;  %v5912_v26 = vld [vmem:[#allocation47_spill] sm:$0xff] }
 0x2a4   :  { %v973_v54 = vadd.f32 %v972_v39, %v5912_v26 }
 0x2a5   :  { %5910 = vst [vmem:[#allocation45_spill] sm:$0xff] %v5212_v46  ;;  %v2720_v11 = vrot.slane %v1139_v21, 7 }
 0x2a6   :  { %1011 = vmatmul.bf16.gmra.mxu1 %v4393_v12  ;;  %1711 = vmatmul.bf16.gmra.mxu0 %v4393_v12 }
 0x2a7   :  { %1180 = vmatmul.bf16.gmra.mxu2 %v4057_v1  ;;  %1542 = vmatmul.bf16.gmra.mxu3 %v4392_v59  ;;  %v5220_v48 = vsel %vm2655_vm0, %v5792_v55, %v2720_v11  ;;  %v274_v59 = vpack.c.bf16 %v270_v62, %v270_v62 }
 0x2a8   :  { %5911 = vst [vmem:[#allocation93_spill] sm:$0xff] %v5220_v48 }
 0x2a9   :  { %v486_v7 = vunpack.c.l.b16 %v274_v59 }
 0x2aa   :  { %v1141_v5 = vpop.f32.mrf.mxu2  ;;  %v1503_v31 = vpop.f32.mrf.mxu3 }
 0x2ab   :  { %v5223_v6 = vadd.f32 %v1141_v5, %v973_v54  ;;  %v5225_v21 = vadd.f32 %v1672_v23, %v1503_v31  ;;  %v974_v17 = vpop.f32.mrf.mxu1  ;;  %v1674_v46 = vpop.f32.mrf.mxu0  ;;  %v5230_v48 = vpack.c.b16 %v487_v50, %v486_v7 }
 0x2ac   :  { %v975_v15 = vadd.f32 %v974_v17, %v5913_v9  ;;  %v5920_v17 = vld [vmem:[#allocation54_spill] sm:$0xff] }
 0x2ad   :  { %5915 = vst [vmem:[#allocation49_spill] sm:$0xff] %v5230_v48  ;;  %v5793_v23 = vrot.slane %v5223_v6, 7 }
 0x2b2   :  { %v1143_v34 = vpop.f32.mrf.mxu2  ;;  %v1505_v29 = vpop.f32.mrf.mxu3 }
 0x2b3   :  { %v1144_v11 = vadd.f32 %v1143_v34, %v975_v15  ;;  %v5228_v55 = vadd.f32 %v1674_v46, %v1505_v29  ;;  %v977_v39 = vpop.f32.mrf.mxu1  ;;  %v1677_v26 = vpop.f32.mrf.mxu0  ;;  %v5917_v34 = vld [vmem:[#allocation51_spill] sm:$0xff] }
 0x2b4   :  { %v978_v29 = vadd.f32 %v977_v39, %v5917_v34  ;;  %v4394_v34 = vld [vmem:[#allocation5 + $0x8] sm:$0xff] }
 0x2b5   :  { %5914 = vst [vmem:[#allocation47_spill] sm:$0xff] %v5228_v55  ;;  %v2723_v54 = vrot.slane %v1144_v11, 7 }
 0x2b6   :  { %1016 = vmatmul.bf16.gmra.mxu1 %v4057_v1  ;;  %1716 = vmatmul.bf16.gmra.mxu0 %v4057_v1 }
 0x2b7   :  { %1185 = vmatmul.bf16.gmra.mxu2 %v5230_v48  ;;  %1547 = vmatmul.bf16.gmra.mxu3 %v4393_v12  ;;  %v5237_v57 = vsel %vm2655_vm0, %v5793_v23, %v2723_v54  ;;  %v5927_v23 = vld [vmem:[#allocation26_spill] sm:$0xff] }
 0x2b8   :  { %5916 = vst [vmem:[#allocation94_spill] sm:$0xff] %v5237_v57 }
 0x2ba   :  { %v1146_v46 = vpop.f32.mrf.mxu2  ;;  %v1508_v62 = vpop.f32.mrf.mxu3 }
 0x2bb   :  { %v5240_v61 = vadd.f32 %v1146_v46, %v978_v29  ;;  %v5242_v50 = vadd.f32 %v1677_v26, %v1508_v62  ;;  %v979_v5 = vpop.f32.mrf.mxu1  ;;  %v1679_v31 = vpop.f32.mrf.mxu0  ;;  %v5922_v29 = vld [vmem:[#allocation22_spill] sm:$0xff]  ;;  %v4395_v26 = vld [vmem:[#allocation5] sm:$0xff] }
 0x2bc   :  { %v980_v1 = vadd.f32 %v979_v5, %v5920_v17  ;;  %v5924_v62 = vld [vmem:[#allocation24_spill] sm:$0xff] }
 0x2bd   :  { %5918 = vst [vmem:[#allocation51_spill] sm:$0xff] %v5240_v61  ;;  %v5797_v54 = vrot.slane %v5240_v61, 7 }
 0x2be   :  { %5919 = vst [vmem:[#allocation95_spill] sm:$0xff] %v5242_v50 }
 0x2c2   :  { %v1148_v59 = vpop.f32.mrf.mxu2  ;;  %v1510_v7 = vpop.f32.mrf.mxu3 }
 0x2c3   :  { %v1149_v12 = vadd.f32 %v1148_v59, %v980_v1  ;;  %v5245_v9 = vadd.f32 %v1679_v31, %v1510_v7  ;;  %v982_v15 = vpop.f32.mrf.mxu1  ;;  %v1682_v11 = vpop.f32.mrf.mxu0 }
 0x2c4   :  { %v983_v5 = vadd.f32 %v982_v15, %v5924_v62  ;;  %v4396_v62 = vld [vmem:[#allocation5 + $0x10] sm:$0xff] }
 0x2c5   :  { %5921 = vst [vmem:[#allocation54_spill] sm:$0xff] %v5245_v9  ;;  %v2726_v39 = vrot.slane %v1149_v12, 7 }
 0x2c6   :  { %1730 = vmatmul.bf16.vlgmr.msra.gmra.mxu1 %v4394_v34  ;;  %2430 = vmatmul.bf16.vlgmr.msra.gmra.mxu0 %v4394_v34 }
 0x2c7   :  { %2092 = vmatmul.bf16.vlgmr.msra.gmra.mxu2 %v5922_v29  ;;  %2261 = vmatmul.bf16.vlgmr.msra.gmra.mxu3 %v4395_v26  ;;  %v5252_v46 = vsel %vm2655_vm0, %v5797_v54, %v2726_v39 }
 0x2c8   :  { %5923 = vst [vmem:[#allocation22_spill] sm:$0xff] %v5252_v46 }
 0x2ca   :  { %v1151_v31 = vpop.f32.mrf.mxu2  ;;  %v1513_v17 = vpop.f32.mrf.mxu3 }
 0x2cb   :  { %v5255_v1 = vadd.f32 %v1151_v31, %v983_v5  ;;  %v5257_v59 = vadd.f32 %v1682_v11, %v1513_v17  ;;  %v984_v7 = vpop.f32.mrf.mxu1  ;;  %v1684_v12 = vpop.f32.mrf.mxu0 }
 0x2cc   :  { %v985_v9 = vadd.f32 %v984_v7, %v5927_v23  ;;  %v5930_v23 = vld [vmem:[#allocation28_spill] sm:$0xff] }
 0x2cd   :  { %5925 = vst [vmem:[#allocation24_spill] sm:$0xff] %v5255_v1  ;;  %v5799_v54 = vrot.slane %v5255_v1, 7 }
 0x2ce   :  { %5926 = vst [vmem:[#allocation96_spill] sm:$0xff] %v5257_v59 }
 0x2d2   :  { %v1153_v29 = vpop.f32.mrf.mxu2  ;;  %v1515_v48 = vpop.f32.mrf.mxu3 }
 0x2d3   :  { %v1154_v50 = vadd.f32 %v1153_v29, %v985_v9  ;;  %v5260_v57 = vadd.f32 %v1684_v12, %v1515_v48  ;;  %v987_v61 = vpop.f32.mrf.mxu1  ;;  %v1687_v39 = vpop.f32.mrf.mxu0  ;;  %v5933_v12 = vld [vmem:[#allocation30_spill] sm:$0xff] }
 0x2d4   :  { %v988_v5 = vadd.f32 %v987_v61, %v5930_v23  ;;  %v4397_v23 = vld [vmem:[#allocation5 + $0x18] sm:$0xff] }
 0x2d5   :  { %5928 = vst [vmem:[#allocation26_spill] sm:$0xff] %v5260_v57  ;;  %v2729_v15 = vrot.slane %v1154_v50, 7 }
 0x2d6   :  { %1735 = vmatmul.bf16.gmra.mxu1 %v4396_v62  ;;  %2435 = vmatmul.bf16.gmra.mxu0 %v4396_v62 }
 0x2d7   :  { %2097 = vmatmul.bf16.gmra.mxu2 %v4395_v26  ;;  %2266 = vmatmul.bf16.gmra.mxu3 %v4394_v34  ;;  %v5266_v11 = vsel %vm2655_vm0, %v5799_v54, %v2729_v15 }
 0x2d8   :  { %5929 = vst [vmem:[#allocation97_spill] sm:$0xff] %v5266_v11 }
 0x2da   :  { %v1156_v9 = vpop.f32.mrf.mxu2  ;;  %v1518_v48 = vpop.f32.mrf.mxu3 }
 0x2db   :  { %v5269_v31 = vadd.f32 %v1156_v9, %v988_v5  ;;  %v5271_v17 = vadd.f32 %v1687_v39, %v1518_v48  ;;  %v989_v7 = vpop.f32.mrf.mxu1  ;;  %v1689_v50 = vpop.f32.mrf.mxu0  ;;  %v5936_v5 = vld [vmem:[#allocation32_spill] sm:$0xff] }
 0x2dc   :  { %v990_v29 = vadd.f32 %v989_v7, %v5933_v12 }
 0x2dd   :  { %5931 = vst [vmem:[#allocation28_spill] sm:$0xff] %v5269_v31  ;;  %v5801_v54 = vrot.slane %v5269_v31, 7 }
 0x2de   :  { %5932 = vst [vmem:[#allocation98_spill] sm:$0xff] %v5271_v17 }
 0x2e2   :  { %v1158_v57 = vpop.f32.mrf.mxu2  ;;  %v1520_v26 = vpop.f32.mrf.mxu3 }
 0x2e3   :  { %v1159_v59 = vadd.f32 %v1158_v57, %v990_v29  ;;  %v5274_v46 = vadd.f32 %v1689_v50, %v1520_v26  ;;  %v992_v1 = vpop.f32.mrf.mxu1  ;;  %v1692_v15 = vpop.f32.mrf.mxu0  ;;  %v5939_v29 = vld [vmem:[#allocation34_spill] sm:$0xff] }
 0x2e4   :  { %v993_v9 = vadd.f32 %v992_v1, %v5936_v5  ;;  %v4398_v5 = vld [vmem:[#allocation5 + $0x20] sm:$0xff] }
 0x2e5   :  { %5934 = vst [vmem:[#allocation30_spill] sm:$0xff] %v5274_v46  ;;  %v2732_v61 = vrot.slane %v1159_v59, 7 }
 0x2e6   :  { %1740 = vmatmul.bf16.gmra.mxu1 %v4397_v23  ;;  %2440 = vmatmul.bf16.gmra.mxu0 %v4397_v23 }
 0x2e7   :  { %2102 = vmatmul.bf16.gmra.mxu2 %v4394_v34  ;;  %2271 = vmatmul.bf16.gmra.mxu3 %v4396_v62  ;;  %v5280_v39 = vsel %vm2655_vm0, %v5801_v54, %v2732_v61 }
 0x2e8   :  { %5935 = vst [vmem:[#allocation99_spill] sm:$0xff] %v5280_v39 }
 0x2ea   :  { %v1161_v57 = vpop.f32.mrf.mxu2  ;;  %v1523_v48 = vpop.f32.mrf.mxu3 }
 0x2eb   :  { %v5283_v7 = vadd.f32 %v1161_v57, %v993_v9  ;;  %v5285_v50 = vadd.f32 %v1692_v15, %v1523_v48  ;;  %v994_v12 = vpop.f32.mrf.mxu1  ;;  %v1694_v59 = vpop.f32.mrf.mxu0  ;;  %v5942_v9 = vld [vmem:[#allocation36_spill] sm:$0xff] }
 0x2ec   :  { %v995_v26 = vadd.f32 %v994_v12, %v5939_v29 }
 0x2ed   :  { %5937 = vst [vmem:[#allocation32_spill] sm:$0xff] %v5283_v7  ;;  %v5803_v54 = vrot.slane %v5283_v7, 7 }
 0x2ee   :  { %5938 = vst [vmem:[#allocation100_spill] sm:$0xff] %v5285_v50 }
 0x2f2   :  { %v1163_v46 = vpop.f32.mrf.mxu2  ;;  %v1525_v34 = vpop.f32.mrf.mxu3 }
 0x2f3   :  { %v1164_v17 = vadd.f32 %v1163_v46, %v995_v26  ;;  %v5288_v11 = vadd.f32 %v1694_v59, %v1525_v34  ;;  %v997_v31 = vpop.f32.mrf.mxu1  ;;  %v1697_v61 = vpop.f32.mrf.mxu0  ;;  %v5945_v26 = vld [vmem:[#allocation38_spill] sm:$0xff] }
 0x2f4   :  { %v998_v57 = vadd.f32 %v997_v31, %v5942_v9  ;;  %v4399_v9 = vld [vmem:[#allocation5 + $0x28] sm:$0xff] }
 0x2f5   :  { %5940 = vst [vmem:[#allocation34_spill] sm:$0xff] %v5288_v11  ;;  %v2735_v1 = vrot.slane %v1164_v17, 7 }
 0x2f6   :  { %1745 = vmatmul.bf16.gmra.mxu1 %v4398_v5  ;;  %2445 = vmatmul.bf16.gmra.mxu0 %v4398_v5 }
 0x2f7   :  { %2107 = vmatmul.bf16.gmra.mxu2 %v4396_v62  ;;  %2276 = vmatmul.bf16.gmra.mxu3 %v4397_v23  ;;  %v5294_v15 = vsel %vm2655_vm0, %v5803_v54, %v2735_v1 }
 0x2f8   :  { %5941 = vst [vmem:[#allocation101_spill] sm:$0xff] %v5294_v15 }
 0x2fa   :  { %v1166_v46 = vpop.f32.mrf.mxu2  ;;  %v1528_v48 = vpop.f32.mrf.mxu3 }
 0x2fb   :  { %v5297_v12 = vadd.f32 %v1166_v46, %v998_v57  ;;  %v5299_v59 = vadd.f32 %v1697_v61, %v1528_v48  ;;  %v999_v29 = vpop.f32.mrf.mxu1  ;;  %v1699_v17 = vpop.f32.mrf.mxu0  ;;  %v5948_v57 = vld [vmem:[#allocation40_spill] sm:$0xff] }
 0x2fc   :  { %v1000_v34 = vadd.f32 %v999_v29, %v5945_v26 }
 0x2fd   :  { %5943 = vst [vmem:[#allocation36_spill] sm:$0xff] %v5297_v12  ;;  %v5805_v54 = vrot.slane %v5297_v12, 7 }
 0x2fe   :  { %5944 = vst [vmem:[#allocation102_spill] sm:$0xff] %v5299_v59 }
 0x302   :  { %v1168_v11 = vpop.f32.mrf.mxu2  ;;  %v1530_v62 = vpop.f32.mrf.mxu3 }
 0x303   :  { %v1169_v50 = vadd.f32 %v1168_v11, %v1000_v34  ;;  %v5302_v39 = vadd.f32 %v1699_v17, %v1530_v62  ;;  %v1002_v7 = vpop.f32.mrf.mxu1  ;;  %v1702_v1 = vpop.f32.mrf.mxu0  ;;  %v5951_v34 = vld [vmem:[#allocation42_spill] sm:$0xff] }
 0x304   :  { %v1003_v46 = vadd.f32 %v1002_v7, %v5948_v57  ;;  %v4400_v57 = vld [vmem:[#allocation5 + $0x30] sm:$0xff] }
 0x305   :  { %5946 = vst [vmem:[#allocation38_spill] sm:$0xff] %v5302_v39  ;;  %v2738_v31 = vrot.slane %v1169_v50, 7 }
 0x306   :  { %1750 = vmatmul.bf16.gmra.mxu1 %v4399_v9  ;;  %2450 = vmatmul.bf16.gmra.mxu0 %v4399_v9 }
 0x307   :  { %2112 = vmatmul.bf16.gmra.mxu2 %v4397_v23  ;;  %2281 = vmatmul.bf16.gmra.mxu3 %v4398_v5  ;;  %v5308_v61 = vsel %vm2655_vm0, %v5805_v54, %v2738_v31 }
 0x308   :  { %5947 = vst [vmem:[#allocation103_spill] sm:$0xff] %v5308_v61 }
 0x30a   :  { %v1171_v11 = vpop.f32.mrf.mxu2  ;;  %v1533_v48 = vpop.f32.mrf.mxu3 }
 0x30b   :  { %v5311_v29 = vadd.f32 %v1171_v11, %v1003_v46  ;;  %v5313_v17 = vadd.f32 %v1702_v1, %v1533_v48  ;;  %v1004_v26 = vpop.f32.mrf.mxu1  ;;  %v1704_v50 = vpop.f32.mrf.mxu0  ;;  %v5954_v46 = vld [vmem:[#allocation44_spill] sm:$0xff] }
 0x30c   :  { %v1005_v62 = vadd.f32 %v1004_v26, %v5951_v34 }
 0x30d   :  { %5949 = vst [vmem:[#allocation40_spill] sm:$0xff] %v5311_v29  ;;  %v5807_v54 = vrot.slane %v5311_v29, 7 }
 0x30e   :  { %5950 = vst [vmem:[#allocation104_spill] sm:$0xff] %v5313_v17 }
 0x312   :  { %v1173_v39 = vpop.f32.mrf.mxu2  ;;  %v1535_v23 = vpop.f32.mrf.mxu3 }
 0x313   :  { %v1174_v59 = vadd.f32 %v1173_v39, %v1005_v62  ;;  %v5316_v15 = vadd.f32 %v1704_v50, %v1535_v23  ;;  %v1007_v12 = vpop.f32.mrf.mxu1  ;;  %v1707_v31 = vpop.f32.mrf.mxu0  ;;  %v5957_v62 = vld [vmem:[#allocation46_spill] sm:$0xff] }
 0x314   :  { %v1008_v11 = vadd.f32 %v1007_v12, %v5954_v46  ;;  %v4401_v46 = vld [vmem:[#allocation5 + $0x38] sm:$0xff] }
 0x315   :  { %5952 = vst [vmem:[#allocation42_spill] sm:$0xff] %v5316_v15  ;;  %v2741_v7 = vrot.slane %v1174_v59, 7 }
 0x316   :  { %1755 = vmatmul.bf16.gmra.mxu1 %v4400_v57  ;;  %2455 = vmatmul.bf16.gmra.mxu0 %v4400_v57 }
 0x317   :  { %2117 = vmatmul.bf16.gmra.mxu2 %v4398_v5  ;;  %2286 = vmatmul.bf16.gmra.mxu3 %v4399_v9  ;;  %v5322_v1 = vsel %vm2655_vm0, %v5807_v54, %v2741_v7 }
 0x318   :  { %5953 = vst [vmem:[#allocation105_spill] sm:$0xff] %v5322_v1 }
 0x31a   :  { %v1176_v39 = vpop.f32.mrf.mxu2  ;;  %v1538_v48 = vpop.f32.mrf.mxu3 }
 0x31b   :  { %v5325_v26 = vadd.f32 %v1176_v39, %v1008_v11  ;;  %v5327_v50 = vadd.f32 %v1707_v31, %v1538_v48  ;;  %v1009_v34 = vpop.f32.mrf.mxu1  ;;  %v1709_v59 = vpop.f32.mrf.mxu0  ;;  %v5960_v11 = vld [vmem:[#allocation48_spill] sm:$0xff] }
 0x31c   :  { %v1010_v23 = vadd.f32 %v1009_v34, %v5957_v62 }
 0x31d   :  { %5955 = vst [vmem:[#allocation44_spill] sm:$0xff] %v5325_v26  ;;  %v5809_v54 = vrot.slane %v5325_v26, 7 }
 0x31e   :  { %5956 = vst [vmem:[#allocation106_spill] sm:$0xff] %v5327_v50 }
 0x322   :  { %v1178_v15 = vpop.f32.mrf.mxu2  ;;  %v1540_v5 = vpop.f32.mrf.mxu3 }
 0x323   :  { %v1179_v17 = vadd.f32 %v1178_v15, %v1010_v23  ;;  %v5330_v61 = vadd.f32 %v1709_v59, %v1540_v5  ;;  %v1012_v29 = vpop.f32.mrf.mxu1  ;;  %v1712_v7 = vpop.f32.mrf.mxu0  ;;  %v5963_v23 = vld [vmem:[#allocation50_spill] sm:$0xff] }
 0x324   :  { %v1013_v39 = vadd.f32 %v1012_v29, %v5960_v11  ;;  %v4402_v11 = vld [vmem:[#allocation5 + $0x40] sm:$0xff] }
 0x325   :  { %5958 = vst [vmem:[#allocation46_spill] sm:$0xff] %v5330_v61  ;;  %v2744_v12 = vrot.slane %v1179_v17, 7 }
 0x326   :  { %1760 = vmatmul.bf16.gmra.mxu1 %v4401_v46  ;;  %2460 = vmatmul.bf16.gmra.mxu0 %v4401_v46 }
 0x327   :  { %2122 = vmatmul.bf16.gmra.mxu2 %v4399_v9  ;;  %2291 = vmatmul.bf16.gmra.mxu3 %v4400_v57  ;;  %v5336_v31 = vsel %vm2655_vm0, %v5809_v54, %v2744_v12 }
 0x328   :  { %5959 = vst [vmem:[#allocation107_spill] sm:$0xff] %v5336_v31 }
 0x32a   :  { %v1181_v15 = vpop.f32.mrf.mxu2  ;;  %v1543_v48 = vpop.f32.mrf.mxu3 }
 0x32b   :  { %v5339_v34 = vadd.f32 %v1181_v15, %v1013_v39  ;;  %v5341_v59 = vadd.f32 %v1712_v7, %v1543_v48  ;;  %v1014_v62 = vpop.f32.mrf.mxu1  ;;  %v1714_v17 = vpop.f32.mrf.mxu0  ;;  %v5966_v39 = vld [vmem:[#allocation52_spill] sm:$0xff] }
 0x32c   :  { %v1015_v5 = vadd.f32 %v1014_v62, %v5963_v23 }
 0x32d   :  { %5961 = vst [vmem:[#allocation48_spill] sm:$0xff] %v5339_v34  ;;  %v5811_v54 = vrot.slane %v5339_v34, 7 }
 0x32e   :  { %5962 = vst [vmem:[#allocation108_spill] sm:$0xff] %v5341_v59 }
 0x332   :  { %v1183_v61 = vpop.f32.mrf.mxu2  ;;  %v1545_v9 = vpop.f32.mrf.mxu3 }
 0x333   :  { %v1184_v50 = vadd.f32 %v1183_v61, %v1015_v5  ;;  %v5344_v1 = vadd.f32 %v1714_v17, %v1545_v9  ;;  %v1017_v26 = vpop.f32.mrf.mxu1  ;;  %v1717_v12 = vpop.f32.mrf.mxu0  ;;  %v5969_v5 = vld [vmem:[#allocation55_spill] sm:$0xff] }
 0x334   :  { %v1018_v15 = vadd.f32 %v1017_v26, %v5966_v39  ;;  %v5971_v26 = vrot.slane %v4856_v27, 7 }
 0x335   :  { %5964 = vst [vmem:[#allocation50_spill] sm:$0xff] %v5344_v1  ;;  %v2747_v29 = vrot.slane %v1184_v50, 7 }
 0x336   :  { %1765 = vmatmul.bf16.gmra.mxu1 %v4402_v11  ;;  %2465 = vmatmul.bf16.gmra.mxu0 %v4402_v11  ;;  %v2816_v39 = vsel %vm2655_vm0, 0.0, %v5971_v26 }
 0x337   :  { %2127 = vmatmul.bf16.gmra.mxu2 %v4400_v57  ;;  %2296 = vmatmul.bf16.gmra.mxu3 %v4401_v46  ;;  %v5350_v7 = vsel %vm2655_vm0, %v5811_v54, %v2747_v29 }
 0x338   :  { %5965 = vst [vmem:[#allocation109_spill] sm:$0xff] %v5350_v7  ;;  %v5376_v7 = vld [vmem:[#allocation5 + $0x50] sm:$0xff] }
 0x33a   :  { %v1186_v61 = vpop.f32.mrf.mxu2  ;;  %v1548_v48 = vpop.f32.mrf.mxu3 }
 0x33b   :  { %v5353_v62 = vadd.f32 %v1186_v61, %v1018_v15  ;;  %v5355_v17 = vadd.f32 %v1717_v12, %v1548_v48  ;;  %v1019_v23 = vpop.f32.mrf.mxu1  ;;  %v1719_v50 = vpop.f32.mrf.mxu0  ;;  %v4403_v48 = vld [vmem:[#allocation5 + $0x48] sm:$0xff] }
 0x33c   :  { %v1020_v9 = vadd.f32 %v1019_v23, %v5969_v5 }
 0x33d   :  { %5967 = vst [vmem:[#allocation52_spill] sm:$0xff] %v5353_v62  ;;  %v5813_v12 = vrot.slane %v5353_v62, 7 }
 0x33e   :  { %5968 = vst [vmem:[#allocation110_spill] sm:$0xff] %v5355_v17 }
 0x342   :  { %v1188_v1 = vpop.f32.mrf.mxu2  ;;  %v1550_v57 = vpop.f32.mrf.mxu3 }
 0x343   :  { %v1189_v59 = vadd.f32 %v1188_v1, %v1020_v9  ;;  %v5358_v31 = vadd.f32 %v1719_v50, %v1550_v57  ;;  %v1731_v34 = vpop.f32.mrf.mxu1  ;;  %v2431_v29 = vpop.f32.mrf.mxu0  ;;  %v5973_v50 = vld [vmem:[#allocation56_spill] sm:$0xff] }
 0x344   :  { %v1732_v54 = vadd.f32 %v1731_v34, %v4858_v16 }
 0x345   :  { %5970 = vst [vmem:[#allocation55_spill] sm:$0xff] %v5358_v31  ;;  %v2750_v15 = vrot.slane %v1189_v59, 7 }
 0x346   :  { %v2848_v61 = vadd.f32 %v2816_v39, %v1732_v54  ;;  %1770 = vmatmul.bf16.gmra.mxu1 %v4403_v48  ;;  %2470 = vmatmul.bf16.gmra.mxu0 %v4403_v48 }
 0x347   :  { %2132 = vmatmul.bf16.gmra.mxu2 %v4401_v46  ;;  %2301 = vmatmul.bf16.gmra.mxu3 %v4402_v11  ;;  %v5368_v1 = vsel %vm2655_vm0, %v5813_v12, %v2750_v15  ;;  %v5974_v15 = vrot.slane %v4874_v8, 7 }
 0x348   :  { %5972 = vst [vmem:[#allocation111_spill] sm:$0xff] %v5368_v1 }
 0x349   :  { %v2817_v12 = vsel %vm2655_vm0, 0.0, %v5974_v15 }
 0x34a   :  { %v2093_v23 = vpop.f32.mrf.mxu2  ;;  %v2262_v16 = vpop.f32.mrf.mxu3 }
 0x34b   :  { %v1733_v34 = vpop.f32.mrf.mxu1  ;;  %v2433_v27 = vpop.f32.mrf.mxu0  ;;  %v2263_v59 = vadd.f32 %v2262_v16, %v2093_v23 }
 0x34c   :  { %v1734_v5 = vadd.f32 %v1733_v34, %v5973_v50 }
 0x34d   :  { %v2432_v26 = vadd.f32 %v2431_v29, %v2263_v59 }
 0x34e   :  { %v2849_v9 = vadd.f32 %v4871_v40, %v1734_v5 }
 0x34f   :  { %v2977_v40 = vrot.slane %v2432_v26, 1 }
 0x352   :  { %v2095_v54 = vpop.f32.mrf.mxu2  ;;  %v2264_v57 = vpop.f32.mrf.mxu3 }
 0x353   :  { %v2265_v39 = vadd.f32 %v2264_v57, %v2095_v54  ;;  %v1736_v46 = vpop.f32.mrf.mxu1  ;;  %v2436_v31 = vpop.f32.mrf.mxu0  ;;  %v5975_v57 = vld [vmem:[#allocation57_spill] sm:$0xff] }
 0x354   :  { %v1737_v62 = vadd.f32 %v1736_v46, %v4876_v49 }
 0x355   :  { %v2434_v1 = vadd.f32 %v2433_v27, %v2265_v39 }
 0x356   :  { %v2850_v17 = vadd.f32 %v2817_v12, %v1737_v62  ;;  %1775 = vmatmul.bf16.gmra.mxu1 %v5376_v7  ;;  %2475 = vmatmul.bf16.gmra.mxu0 %v5376_v7 }
 0x357   :  { %v2978_v29 = vrot.slane %v2434_v1, 1  ;;  %2137 = vmatmul.bf16.gmra.mxu2 %v4402_v11  ;;  %2306 = vmatmul.bf16.gmra.mxu3 %v4403_v48 }
 0x359   :  { %v2979_v23 = vsel %vm2976_vm1, %v2977_v40, %v2978_v29  ;;  %v3137_v49 = vsel %vm2976_vm1, %v2978_v29, 0.0 }
 0x35a   :  { %v3169_v8 = vadd.f32 %v2979_v23, %v2848_v61  ;;  %v3170_v16 = vadd.f32 %v3137_v49, %v2849_v9  ;;  %v2098_v34 = vpop.f32.mrf.mxu2  ;;  %v2267_v27 = vpop.f32.mrf.mxu3  ;;  %v5976_v49 = vrot.slane %v4892_v20, 7 }
 0x35b   :  { %v1738_v50 = vpop.f32.mrf.mxu1  ;;  %v2438_v62 = vpop.f32.mrf.mxu0  ;;  %v2268_v11 = vadd.f32 %v2267_v27, %v2098_v34 }
 0x35c   :  { %v3233_v12 = vadd.f32 %v3170_v16, %v3169_v8  ;;  %v3302_v5 = vmul.f32 %v3169_v8, %v3169_v8  ;;  %v3303_v59 = vmul.f32 %v3170_v16, %v3170_v16  ;;  %v4149_v54 = vpack.c.bf16 %v3170_v16, %v3169_v8 }
 0x35d   :  { %v1739_v39 = vadd.f32 %v1738_v50, %v5975_v57  ;;  %v2437_v40 = vadd.f32 %v2436_v31, %v2268_v11  ;;  %v2818_v55 = vsel %vm2655_vm0, 0.0, %v5976_v49  ;;  %v5388_v50 = vld [vmem:[#allocation5 + $0x58] sm:$0xff] }
 0x35e   :  { %v3366_v26 = vadd.f32 %v3303_v59, %v3302_v5  ;;  %4150 = vst [vmem:[#allocation10] sm:$0xff] %v4149_v54   ;;  %v5977_v11 = vld [vmem:[#allocation58_spill] sm:$0xff] }
 0x35f   :  { %v2851_v1 = vadd.f32 %v4889_v4, %v1739_v39  ;;  %v2980_v4 = vrot.slane %v2437_v40, 1 }
 0x362   :  { %v2100_v46 = vpop.f32.mrf.mxu2  ;;  %v2269_v15 = vpop.f32.mrf.mxu3 }
 0x363   :  { %v2270_v61 = vadd.f32 %v2269_v15, %v2100_v46  ;;  %v1741_v9 = vpop.f32.mrf.mxu1  ;;  %v2441_v29 = vpop.f32.mrf.mxu0 }
 0x364   :  { %v1742_v23 = vadd.f32 %v1741_v9, %v4894_v60 }
 0x365   :  { %v2439_v8 = vadd.f32 %v2438_v62, %v2270_v61 }
 0x366   :  { %v2852_v16 = vadd.f32 %v2818_v55, %v1742_v23  ;;  %1780 = vmatmul.bf16.gmra.mxu1 %v5388_v50  ;;  %2480 = vmatmul.bf16.gmra.mxu0 %v5388_v50 }
 0x367   :  { %v2981_v34 = vrot.slane %v2439_v8, 1  ;;  %2142 = vmatmul.bf16.gmra.mxu2 %v4403_v48  ;;  %2311 = vmatmul.bf16.gmra.mxu3 %v5376_v7 }
 0x369   :  { %v2982_v31 = vsel %vm2976_vm1, %v2980_v4, %v2981_v34  ;;  %v3138_v60 = vsel %vm2976_vm1, %v2981_v34, 0.0 }
 0x36a   :  { %v3171_v20 = vadd.f32 %v2982_v31, %v2850_v17  ;;  %v3172_v27 = vadd.f32 %v3138_v60, %v2851_v1  ;;  %v2103_v5 = vpop.f32.mrf.mxu2  ;;  %v2272_v62 = vpop.f32.mrf.mxu3  ;;  %v5978_v31 = vrot.slane %v4910_v0, 7 }
 0x36b   :  { %v1743_v55 = vpop.f32.mrf.mxu1  ;;  %v2443_v59 = vpop.f32.mrf.mxu0  ;;  %v2273_v61 = vadd.f32 %v2272_v62, %v2103_v5 }
 0x36c   :  { %v3234_v54 = vadd.f32 %v3233_v12, %v3171_v20  ;;  %v3304_v57 = vmul.f32 %v3171_v20, %v3171_v20  ;;  %v4154_v39 = vpack.c.bf16 %v3172_v27, %v3171_v20  ;;  %v1744_v46 = vadd.f32 %v1743_v55, %v5977_v11 }
 0x36d   :  { %v3305_v40 = vmul.f32 %v3172_v27, %v3172_v27  ;;  %v2442_v1 = vadd.f32 %v2441_v29, %v2273_v61  ;;  %v2819_v60 = vsel %vm2655_vm0, 0.0, %v5978_v31 }
 0x36e   :  { %v3235_v15 = vadd.f32 %v3234_v54, %v3172_v27  ;;  %v3367_v48 = vadd.f32 %v3366_v26, %v3304_v57  ;;  %4308 = vst [vmem:[#allocation10 + $0x8] sm:$0xff] %v4154_v39   ;;  %v2853_v9 = vadd.f32 %v4907_v2, %v1744_v46  ;;  %v5401_v26 = vld [vmem:[#allocation5 + $0x60] sm:$0xff] }
 0x36f   :  { %v2983_v2 = vrot.slane %v2442_v1, 1 }
 0x370   :  { %v3368_v23 = vadd.f32 %v3367_v48, %v3305_v40  ;;  %v5979_v40 = vld [vmem:[#allocation59_spill] sm:$0xff] }
 0x372   :  { %v2105_v49 = vpop.f32.mrf.mxu2  ;;  %v2274_v17 = vpop.f32.mrf.mxu3 }
 0x373   :  { %v2275_v8 = vadd.f32 %v2274_v17, %v2105_v49  ;;  %v1746_v4 = vpop.f32.mrf.mxu1  ;;  %v2446_v34 = vpop.f32.mrf.mxu0 }
 0x374   :  { %v1747_v12 = vadd.f32 %v1746_v4, %v4912_v63 }
 0x375   :  { %v2444_v20 = vadd.f32 %v2443_v59, %v2275_v8 }
 0x376   :  { %v2854_v27 = vadd.f32 %v2819_v60, %v1747_v12  ;;  %1785 = vmatmul.bf16.gmra.mxu1 %v5401_v26  ;;  %2485 = vmatmul.bf16.gmra.mxu0 %v5401_v26 }
 0x377   :  { %v2984_v5 = vrot.slane %v2444_v20, 1  ;;  %2147 = vmatmul.bf16.gmra.mxu2 %v5376_v7  ;;  %2316 = vmatmul.bf16.gmra.mxu3 %v5388_v50  ;;  %v5980_v20 = vld [vmem:[#allocation60_spill] sm:$0xff] }
 0x379   :  { %v2985_v63 = vsel %vm2976_vm1, %v2983_v2, %v2984_v5  ;;  %v3139_v0 = vsel %vm2976_vm1, %v2984_v5, 0.0  ;;  %v5981_v2 = vrot.slane %v5980_v20, 7 }
 0x37a   :  { %v3173_v29 = vadd.f32 %v2985_v63, %v2852_v16  ;;  %v3174_v62 = vadd.f32 %v3139_v0, %v2853_v9  ;;  %v2108_v55 = vpop.f32.mrf.mxu2  ;;  %v2277_v59 = vpop.f32.mrf.mxu3 }
 0x37b   :  { %v1748_v54 = vpop.f32.mrf.mxu1  ;;  %v2448_v57 = vpop.f32.mrf.mxu0  ;;  %v2278_v17 = vadd.f32 %v2277_v59, %v2108_v55  ;;  %v2820_v5 = vsel %vm2655_vm0, 0.0, %v5981_v2 }
 0x37c   :  { %v3236_v39 = vadd.f32 %v3235_v15, %v3173_v29  ;;  %v3306_v11 = vmul.f32 %v3173_v29, %v3173_v29  ;;  %v4159_v46 = vpack.c.bf16 %v3174_v62, %v3173_v29  ;;  %v1749_v48 = vadd.f32 %v1748_v54, %v5979_v40 }
 0x37d   :  { %v3307_v49 = vmul.f32 %v3174_v62, %v3174_v62  ;;  %v2447_v9 = vadd.f32 %v2446_v34, %v2278_v17 }
 0x37e   :  { %v3237_v61 = vadd.f32 %v3236_v39, %v3174_v62  ;;  %v3369_v7 = vadd.f32 %v3368_v23, %v3306_v11  ;;  %4309 = vst [vmem:[#allocation10 + $0x10] sm:$0xff] %v4159_v46   ;;  %v2855_v1 = vadd.f32 %v4925_v18, %v1749_v48  ;;  %v5415_v23 = vld [vmem:[#allocation5 + $0x68] sm:$0xff] }
 0x37f   :  { %v2986_v18 = vrot.slane %v2447_v9, 1  ;;  %v5982_v48 = vld [vmem:[#allocation61_spill] sm:$0xff] }
 0x380   :  { %v3370_v8 = vadd.f32 %v3369_v7, %v3307_v49 }
 0x382   :  { %v2110_v4 = vpop.f32.mrf.mxu2  ;;  %v2279_v16 = vpop.f32.mrf.mxu3 }
 0x383   :  { %v2280_v12 = vadd.f32 %v2279_v16, %v2110_v4  ;;  %v1751_v31 = vpop.f32.mrf.mxu1  ;;  %v2451_v60 = vpop.f32.mrf.mxu0  ;;  %v5983_v16 = vld [vmem:[#allocation62_spill] sm:$0xff] }
 0x384   :  { %v1752_v15 = vadd.f32 %v1751_v31, %v4930_v56 }
 0x385   :  { %v2449_v63 = vadd.f32 %v2448_v57, %v2280_v12 }
 0x386   :  { %v2856_v0 = vadd.f32 %v2820_v5, %v1752_v15  ;;  %1790 = vmatmul.bf16.gmra.mxu1 %v5415_v23  ;;  %2490 = vmatmul.bf16.gmra.mxu0 %v5415_v23  ;;  %v5984_v5 = vld [vmem:[#allocation64_spill] sm:$0xff] }
 0x387   :  { %v2987_v29 = vrot.slane %v2449_v63, 1  ;;  %2152 = vmatmul.bf16.gmra.mxu2 %v5388_v50  ;;  %2321 = vmatmul.bf16.gmra.mxu3 %v5401_v26  ;;  %v5985_v63 = vld [vmem:[#allocation63_spill] sm:$0xff] }
 0x389   :  { %v2988_v56 = vsel %vm2976_vm1, %v2986_v18, %v2987_v29  ;;  %v3140_v34 = vsel %vm2976_vm1, %v2987_v29, 0.0  ;;  %v5986_v18 = vrot.slane %v5985_v63, 7 }
 0x38a   :  { %v3175_v62 = vadd.f32 %v2988_v56, %v2854_v27  ;;  %v3176_v55 = vadd.f32 %v3140_v34, %v2855_v1  ;;  %v2113_v59 = vpop.f32.mrf.mxu2  ;;  %v2282_v54 = vpop.f32.mrf.mxu3 }
 0x38b   :  { %v1753_v57 = vpop.f32.mrf.mxu1  ;;  %v2453_v39 = vpop.f32.mrf.mxu0  ;;  %v2283_v4 = vadd.f32 %v2282_v54, %v2113_v59  ;;  %v2821_v29 = vsel %vm2655_vm0, 0.0, %v5986_v18  ;;  %v5988_v18 = vrot.slane %v4965_v14, 7 }
 0x38c   :  { %v3238_v11 = vadd.f32 %v3237_v61, %v3175_v62  ;;  %v3308_v46 = vmul.f32 %v3175_v62, %v3175_v62  ;;  %v4164_v40 = vpack.c.bf16 %v3176_v55, %v3175_v62  ;;  %v1754_v49 = vadd.f32 %v1753_v57, %v5982_v48 }
 0x38d   :  { %v3309_v17 = vmul.f32 %v3176_v55, %v3176_v55  ;;  %v2452_v1 = vadd.f32 %v2451_v60, %v2283_v4 }
 0x38e   :  { %v3239_v7 = vadd.f32 %v3238_v11, %v3176_v55  ;;  %v3371_v50 = vadd.f32 %v3370_v8, %v3308_v46  ;;  %4310 = vst [vmem:[#allocation10 + $0x18] sm:$0xff] %v4164_v40   ;;  %v2857_v9 = vadd.f32 %v5983_v16, %v1754_v49  ;;  %v5429_v8 = vld [vmem:[#allocation5 + $0x70] sm:$0xff] }
 0x38f   :  { %v2989_v62 = vrot.slane %v2452_v1, 1 }
 0x390   :  { %v3372_v12 = vadd.f32 %v3371_v50, %v3309_v17  ;;  %v5987_v50 = vld [vmem:[#allocation65_spill] sm:$0xff] }
 0x392   :  { %v2115_v31 = vpop.f32.mrf.mxu2  ;;  %v2284_v27 = vpop.f32.mrf.mxu3 }
 0x393   :  { %v2285_v15 = vadd.f32 %v2284_v27, %v2115_v31  ;;  %v1756_v20 = vpop.f32.mrf.mxu1  ;;  %v2456_v2 = vpop.f32.mrf.mxu0 }
 0x394   :  { %v1757_v61 = vadd.f32 %v1756_v20, %v5984_v5 }
 0x395   :  { %v2454_v56 = vadd.f32 %v2453_v39, %v2285_v15 }
 0x396   :  { %v2858_v34 = vadd.f32 %v2821_v29, %v1757_v61  ;;  %1795 = vmatmul.bf16.gmra.mxu1 %v5429_v8  ;;  %2495 = vmatmul.bf16.gmra.mxu0 %v5429_v8  ;;  %v2822_v29 = vsel %vm2655_vm0, 0.0, %v5988_v18 }
 0x397   :  { %v2990_v55 = vrot.slane %v2454_v56, 1  ;;  %2157 = vmatmul.bf16.gmra.mxu2 %v5401_v26  ;;  %2326 = vmatmul.bf16.gmra.mxu3 %v5415_v23 }
 0x399   :  { %v2991_v60 = vsel %vm2976_vm1, %v2989_v62, %v2990_v55  ;;  %v3141_v59 = vsel %vm2976_vm1, %v2990_v55, 0.0 }
 0x39a   :  { %v3177_v54 = vadd.f32 %v2991_v60, %v2856_v0  ;;  %v3178_v57 = vadd.f32 %v3141_v59, %v2857_v9  ;;  %v2118_v39 = vpop.f32.mrf.mxu2  ;;  %v2287_v11 = vpop.f32.mrf.mxu3 }
 0x39b   :  { %v1758_v46 = vpop.f32.mrf.mxu1  ;;  %v2458_v40 = vpop.f32.mrf.mxu0  ;;  %v2288_v27 = vadd.f32 %v2287_v11, %v2118_v39 }
 0x39c   :  { %v3240_v48 = vadd.f32 %v3239_v7, %v3177_v54  ;;  %v3310_v49 = vmul.f32 %v3177_v54, %v3177_v54  ;;  %v4169_v17 = vpack.c.bf16 %v3178_v57, %v3177_v54  ;;  %v1759_v4 = vadd.f32 %v1758_v46, %v5987_v50 }
 0x39d   :  { %v3311_v31 = vmul.f32 %v3178_v57, %v3178_v57  ;;  %v2457_v9 = vadd.f32 %v2456_v2, %v2288_v27 }
 0x39e   :  { %v3241_v16 = vadd.f32 %v3240_v48, %v3178_v57  ;;  %v3373_v26 = vadd.f32 %v3372_v12, %v3310_v49  ;;  %4311 = vst [vmem:[#allocation10 + $0x20] sm:$0xff] %v4169_v17   ;;  %v2859_v1 = vadd.f32 %v4962_v53, %v1759_v4  ;;  %v4409_v12 = vld [vmem:[#allocation5 + $0x78] sm:$0xff] }
 0x39f   :  { %v2992_v55 = vrot.slane %v2457_v9, 1  ;;  %v5989_v9 = vrot.slane %v4983_v13, 7 }
 0x3a0   :  { %v3374_v15 = vadd.f32 %v3373_v26, %v3311_v31 }
 0x3a2   :  { %v2120_v20 = vpop.f32.mrf.mxu2  ;;  %v2289_v0 = vpop.f32.mrf.mxu3 }
 0x3a3   :  { %v2290_v5 = vadd.f32 %v2289_v0, %v2120_v20  ;;  %v1761_v61 = vpop.f32.mrf.mxu1  ;;  %v2461_v63 = vpop.f32.mrf.mxu0 }
 0x3a4   :  { %v1762_v7 = vadd.f32 %v1761_v61, %v4967_v22 }
 0x3a5   :  { %v2459_v56 = vadd.f32 %v2458_v40, %v2290_v5 }
 0x3a6   :  { %v2860_v62 = vadd.f32 %v2822_v29, %v1762_v7  ;;  %1800 = vmatmul.bf16.gmra.mxu1 %v4409_v12  ;;  %2500 = vmatmul.bf16.gmra.mxu0 %v4409_v12 }
 0x3a7   :  { %v2993_v53 = vrot.slane %v2459_v56, 1  ;;  %2162 = vmatmul.bf16.gmra.mxu2 %v5415_v23  ;;  %2331 = vmatmul.bf16.gmra.mxu3 %v5429_v8 }
 0x3a9   :  { %v2994_v2 = vsel %vm2976_vm1, %v2992_v55, %v2993_v53  ;;  %v3142_v60 = vsel %vm2976_vm1, %v2993_v53, 0.0 }
 0x3aa   :  { %v3179_v22 = vadd.f32 %v2994_v2, %v2858_v34  ;;  %v3180_v59 = vadd.f32 %v3142_v60, %v2859_v1  ;;  %v2123_v14 = vpop.f32.mrf.mxu2  ;;  %v2292_v54 = vpop.f32.mrf.mxu3 }
 0x3ab   :  { %v1763_v57 = vpop.f32.mrf.mxu1  ;;  %v2463_v39 = vpop.f32.mrf.mxu0  ;;  %v2293_v50 = vadd.f32 %v2292_v54, %v2123_v14 }
 0x3ac   :  { %v3242_v11 = vadd.f32 %v3241_v16, %v3179_v22  ;;  %v3312_v46 = vmul.f32 %v3179_v22, %v3179_v22  ;;  %v4174_v40 = vpack.c.bf16 %v3180_v59, %v3179_v22  ;;  %v1764_v48 = vadd.f32 %v1763_v57, %v4970_v42 }
 0x3ad   :  { %v3313_v17 = vmul.f32 %v3180_v59, %v3180_v59  ;;  %v2462_v27 = vadd.f32 %v2461_v63, %v2293_v50  ;;  %v2823_v42 = vsel %vm2655_vm0, 0.0, %v5989_v9  ;;  %v5464_v50 = vld [vmem:[#allocation5 + $0x88] sm:$0xff] }
 0x3ae   :  { %v3243_v49 = vadd.f32 %v3242_v11, %v3180_v59  ;;  %v3375_v23 = vadd.f32 %v3374_v15, %v3312_v46  ;;  %4312 = vst [vmem:[#allocation10 + $0x28] sm:$0xff] %v4174_v40   ;;  %v2861_v4 = vadd.f32 %v4980_v10, %v1764_v48 }
 0x3af   :  { %v2995_v10 = vrot.slane %v2462_v27, 1 }
 0x3b0   :  { %v3376_v31 = vadd.f32 %v3375_v23, %v3313_v17 }
 0x3b2   :  { %v2125_v26 = vpop.f32.mrf.mxu2  ;;  %v2294_v34 = vpop.f32.mrf.mxu3 }
 0x3b3   :  { %v2295_v1 = vadd.f32 %v2294_v34, %v2125_v26  ;;  %v1766_v20 = vpop.f32.mrf.mxu1  ;;  %v2466_v0 = vpop.f32.mrf.mxu0 }
 0x3b4   :  { %v1767_v16 = vadd.f32 %v1766_v20, %v4985_v47 }
 0x3b5   :  { %v2464_v5 = vadd.f32 %v2463_v39, %v2295_v1 }
 0x3b6   :  { %v2862_v61 = vadd.f32 %v2823_v42, %v1767_v16  ;;  %1805 = vmatmul.bf16.gmra.mxu1 %v4972_v45  ;;  %2505 = vmatmul.bf16.gmra.mxu0 %v4972_v45 }
 0x3b7   :  { %v2996_v15 = vrot.slane %v2464_v5, 1  ;;  %2167 = vmatmul.bf16.gmra.mxu2 %v5429_v8  ;;  %2336 = vmatmul.bf16.gmra.mxu3 %v4409_v12  ;;  %v5991_v5 = vld [vmem:[#allocation66_spill] sm:$0xff] }
 0x3b9   :  { %v2997_v63 = vsel %vm2976_vm1, %v2995_v10, %v2996_v15  ;;  %v3143_v7 = vsel %vm2976_vm1, %v2996_v15, 0.0 }
 0x3ba   :  { %v3181_v47 = vadd.f32 %v2997_v63, %v2860_v62  ;;  %v3182_v18 = vadd.f32 %v3143_v7, %v2861_v4  ;;  %v2128_v13 = vpop.f32.mrf.mxu2  ;;  %v2297_v29 = vpop.f32.mrf.mxu3 }
 0x3bb   :  { %v1768_v56 = vpop.f32.mrf.mxu1  ;;  %v2468_v55 = vpop.f32.mrf.mxu0  ;;  %v2298_v8 = vadd.f32 %v2297_v29, %v2128_v13 }
 0x3bc   :  { %v3244_v53 = vadd.f32 %v3243_v49, %v3181_v47  ;;  %v3314_v2 = vmul.f32 %v3181_v47, %v3181_v47  ;;  %v4179_v60 = vpack.c.bf16 %v3182_v18, %v3181_v47  ;;  %v1769_v45 = vadd.f32 %v1768_v56, %v4988_v51 }
 0x3bd   :  { %v3315_v59 = vmul.f32 %v3182_v18, %v3182_v18  ;;  %v2467_v39 = vadd.f32 %v2466_v0, %v2298_v8  ;;  %v5990_v49 = vrot.slane %v5001_v38, 7 }
 0x3be   :  { %v3245_v22 = vadd.f32 %v3244_v53, %v3182_v18  ;;  %v3377_v14 = vadd.f32 %v3376_v31, %v3314_v2  ;;  %4313 = vst [vmem:[#allocation10 + $0x30] sm:$0xff] %v4179_v60   ;;  %v2863_v12 = vadd.f32 %v4998_v43, %v1769_v45  ;;  %v4411_v31 = vld [vmem:[#allocation5 + $0x80] sm:$0xff]  ;;  %v5992_v60 = vrot.slane %v5019_v28, 7 }
 0x3bf   :  { %v2824_v51 = vsel %vm2655_vm0, 0.0, %v5990_v49  ;;  %v2998_v43 = vrot.slane %v2467_v39, 1  ;;  %v5993_v49 = vld [vmem:[#allocation67_spill] sm:$0xff] }
 0x3c0   :  { %v3378_v54 = vadd.f32 %v3377_v14, %v3315_v59  ;;  %v2825_v45 = vsel %vm2655_vm0, 0.0, %v5992_v60  ;;  %v5477_v14 = vld [vmem:[#allocation5 + $0x90] sm:$0xff] }
 0x3c2   :  { %v2130_v57 = vpop.f32.mrf.mxu2  ;;  %v2299_v62 = vpop.f32.mrf.mxu3 }
 0x3c3   :  { %v2300_v11 = vadd.f32 %v2299_v62, %v2130_v57  ;;  %v1771_v46 = vpop.f32.mrf.mxu1  ;;  %v2471_v40 = vpop.f32.mrf.mxu0 }
 0x3c4   :  { %v1772_v48 = vadd.f32 %v1771_v46, %v5003_v36 }
 0x3c5   :  { %v2469_v17 = vadd.f32 %v2468_v55, %v2300_v11 }
 0x3c6   :  { %v2864_v23 = vadd.f32 %v2824_v51, %v1772_v48  ;;  %1810 = vmatmul.bf16.gmra.mxu1 %v5464_v50  ;;  %2510 = vmatmul.bf16.gmra.mxu0 %v5464_v50 }
 0x3c7   :  { %v2999_v4 = vrot.slane %v2469_v17, 1  ;;  %2172 = vmatmul.bf16.gmra.mxu2 %v4623_v32  ;;  %2341 = vmatmul.bf16.gmra.mxu3 %v4411_v31 }
 0x3c9   :  { %v3000_v36 = vsel %vm2976_vm1, %v2998_v43, %v2999_v4  ;;  %v3144_v38 = vsel %vm2976_vm1, %v2999_v4, 0.0 }
 0x3ca   :  { %v3183_v26 = vadd.f32 %v3000_v36, %v2862_v61  ;;  %v3184_v34 = vadd.f32 %v3144_v38, %v2863_v12  ;;  %v2133_v27 = vpop.f32.mrf.mxu2  ;;  %v2302_v1 = vpop.f32.mrf.mxu3 }
 0x3cb   :  { %v1773_v20 = vpop.f32.mrf.mxu1  ;;  %v2473_v0 = vpop.f32.mrf.mxu0  ;;  %v2303_v7 = vadd.f32 %v2302_v1, %v2133_v27 }
 0x3cc   :  { %v3246_v16 = vadd.f32 %v3245_v22, %v3183_v26  ;;  %v3316_v9 = vmul.f32 %v3183_v26, %v3183_v26  ;;  %v4184_v42 = vpack.c.bf16 %v3184_v34, %v3183_v26  ;;  %v1774_v10 = vadd.f32 %v1773_v20, %v5991_v5 }
 0x3cd   :  { %v3317_v63 = vmul.f32 %v3184_v34, %v3184_v34  ;;  %v2472_v29 = vadd.f32 %v2471_v40, %v2303_v7 }
 0x3ce   :  { %v3247_v15 = vadd.f32 %v3246_v16, %v3184_v34  ;;  %v3379_v32 = vadd.f32 %v3378_v54, %v3316_v9  ;;  %4314 = vst [vmem:[#allocation10 + $0x38] sm:$0xff] %v4184_v42   ;;  %v2865_v47 = vadd.f32 %v5016_v41, %v1774_v10  ;;  %v5994_v16 = vrot.slane %v5037_v58, 7  ;;  %v5490_v10 = vld [vmem:[#allocation5 + $0x98] sm:$0xff] }
 0x3cf   :  { %v3001_v41 = vrot.slane %v2472_v29, 1 }
 0x3d0   :  { %v3380_v18 = vadd.f32 %v3379_v32, %v3317_v63  ;;  %v2826_v9 = vsel %vm2655_vm0, 0.0, %v5994_v16 }
 0x3d2   :  { %v2135_v13 = vpop.f32.mrf.mxu2  ;;  %v2304_v61 = vpop.f32.mrf.mxu3 }
 0x3d3   :  { %v2305_v56 = vadd.f32 %v2304_v61, %v2135_v13  ;;  %v1776_v55 = vpop.f32.mrf.mxu1  ;;  %v2476_v53 = vpop.f32.mrf.mxu0 }
 0x3d4   :  { %v1777_v2 = vadd.f32 %v1776_v55, %v5021_v24  ;;  %v5995_v55 = vld [vmem:[#allocation68_spill] sm:$0xff] }
 0x3d5   :  { %v2474_v22 = vadd.f32 %v2473_v0, %v2305_v56 }
 0x3d6   :  { %v2866_v59 = vadd.f32 %v2825_v45, %v1777_v2  ;;  %1815 = vmatmul.bf16.gmra.mxu1 %v5477_v14  ;;  %2515 = vmatmul.bf16.gmra.mxu0 %v5477_v14 }
 0x3d7   :  { %v3002_v8 = vrot.slane %v2474_v22, 1  ;;  %2177 = vmatmul.bf16.gmra.mxu2 %v4411_v31  ;;  %2346 = vmatmul.bf16.gmra.mxu3 %v5464_v50 }
 0x3d9   :  { %v3003_v12 = vsel %vm2976_vm1, %v3001_v41, %v3002_v8  ;;  %v3145_v24 = vsel %vm2976_vm1, %v3002_v8, 0.0 }
 0x3da   :  { %v3185_v28 = vadd.f32 %v3003_v12, %v2864_v23  ;;  %v3186_v54 = vadd.f32 %v3145_v24, %v2865_v47  ;;  %v2138_v57 = vpop.f32.mrf.mxu2  ;;  %v2307_v62 = vpop.f32.mrf.mxu3 }
 0x3db   :  { %v1778_v39 = vpop.f32.mrf.mxu1  ;;  %v2478_v11 = vpop.f32.mrf.mxu0  ;;  %v2308_v31 = vadd.f32 %v2307_v62, %v2138_v57  ;;  %v5996_v62 = vrot.slane %v5055_v30, 7 }
 0x3dc   :  { %v3248_v46 = vadd.f32 %v3247_v15, %v3185_v28  ;;  %v3318_v40 = vmul.f32 %v3185_v28, %v3185_v28  ;;  %v4189_v48 = vpack.c.bf16 %v3186_v54, %v3185_v28  ;;  %v1779_v51 = vadd.f32 %v1778_v39, %v5993_v49 }
 0x3dd   :  { %v3319_v43 = vmul.f32 %v3186_v54, %v3186_v54  ;;  %v2477_v34 = vadd.f32 %v2476_v53, %v2308_v31  ;;  %v2827_v39 = vsel %vm2655_vm0, 0.0, %v5996_v62 }
 0x3de   :  { %v3249_v17 = vadd.f32 %v3248_v46, %v3186_v54  ;;  %v3381_v4 = vadd.f32 %v3380_v18, %v3318_v40  ;;  %4315 = vst [vmem:[#allocation10 + $0x40] sm:$0xff] %v4189_v48   ;;  %v2867_v36 = vadd.f32 %v5034_v44, %v1779_v51  ;;  %v5504_v40 = vld [vmem:[#allocation5 + $0xa0] sm:$0xff] }
 0x3df   :  { %v3004_v44 = vrot.slane %v2477_v34, 1 }
 0x3e0   :  { %v3382_v38 = vadd.f32 %v3381_v4, %v3319_v43 }
 0x3e2   :  { %v2140_v26 = vpop.f32.mrf.mxu2  ;;  %v2309_v23 = vpop.f32.mrf.mxu3 }
 0x3e3   :  { %v2310_v27 = vadd.f32 %v2309_v23, %v2140_v26  ;;  %v1781_v1 = vpop.f32.mrf.mxu1  ;;  %v2481_v20 = vpop.f32.mrf.mxu0  ;;  %v5997_v23 = vld [vmem:[#allocation69_spill] sm:$0xff] }
 0x3e4   :  { %v1782_v0 = vadd.f32 %v1781_v1, %v5039_v52 }
 0x3e5   :  { %v2479_v42 = vadd.f32 %v2478_v11, %v2310_v27 }
 0x3e6   :  { %v2868_v5 = vadd.f32 %v2826_v9, %v1782_v0  ;;  %1820 = vmatmul.bf16.gmra.mxu1 %v5490_v10  ;;  %2520 = vmatmul.bf16.gmra.mxu0 %v5490_v10 }
 0x3e7   :  { %v3005_v15 = vrot.slane %v2479_v42, 1  ;;  %2182 = vmatmul.bf16.gmra.mxu2 %v5464_v50  ;;  %2351 = vmatmul.bf16.gmra.mxu3 %v5477_v14 }
 0x3e9   :  { %v3006_v52 = vsel %vm2976_vm1, %v3004_v44, %v3005_v15  ;;  %v3146_v58 = vsel %vm2976_vm1, %v3005_v15, 0.0 }
 0x3ea   :  { %v3187_v63 = vadd.f32 %v3006_v52, %v2866_v59  ;;  %v3188_v32 = vadd.f32 %v3146_v58, %v2867_v36  ;;  %v2143_v7 = vpop.f32.mrf.mxu2  ;;  %v2312_v47 = vpop.f32.mrf.mxu3 }
 0x3eb   :  { %v1783_v18 = vpop.f32.mrf.mxu1  ;;  %v2483_v13 = vpop.f32.mrf.mxu0  ;;  %v2313_v45 = vadd.f32 %v2312_v47, %v2143_v7 }
 0x3ec   :  { %v3250_v61 = vadd.f32 %v3249_v17, %v3187_v63  ;;  %v3320_v29 = vmul.f32 %v3187_v63, %v3187_v63  ;;  %v4194_v56 = vpack.c.bf16 %v3188_v32, %v3187_v63  ;;  %v1784_v53 = vadd.f32 %v1783_v18, %v5995_v55  ;;  %v5518_v18 = vld [vmem:[#allocation5 + $0xa8] sm:$0xff] }
 0x3ed   :  { %v3321_v60 = vmul.f32 %v3188_v32, %v3188_v32  ;;  %v2482_v12 = vadd.f32 %v2481_v20, %v2313_v45  ;;  %v5998_v63 = vrot.slane %v5073_v37, 7 }
 0x3ee   :  { %v3251_v2 = vadd.f32 %v3250_v61, %v3188_v32  ;;  %v3383_v50 = vadd.f32 %v3382_v38, %v3320_v29  ;;  %4316 = vst [vmem:[#allocation10 + $0x48] sm:$0xff] %v4194_v56   ;;  %v2869_v22 = vadd.f32 %v5052_v3, %v1784_v53 }
 0x3ef   :  { %v3007_v3 = vrot.slane %v2482_v12, 1  ;;  %v2828_v32 = vsel %vm2655_vm0, 0.0, %v5998_v63 }
 0x3f0   :  { %v3384_v41 = vadd.f32 %v3383_v50, %v3321_v60 }
 0x3f2   :  { %v2145_v8 = vpop.f32.mrf.mxu2  ;;  %v2314_v59 = vpop.f32.mrf.mxu3 }
 0x3f3   :  { %v2315_v24 = vadd.f32 %v2314_v59, %v2145_v8  ;;  %v1786_v28 = vpop.f32.mrf.mxu1  ;;  %v2486_v54 = vpop.f32.mrf.mxu0 }
 0x3f4   :  { %v1787_v57 = vadd.f32 %v1786_v28, %v5057_v33 }
 0x3f5   :  { %v2484_v11 = vadd.f32 %v2483_v13, %v2315_v24 }
 0x3f6   :  { %v2870_v46 = vadd.f32 %v2827_v39, %v1787_v57  ;;  %1825 = vmatmul.bf16.gmra.mxu1 %v5504_v40  ;;  %2525 = vmatmul.bf16.gmra.mxu0 %v5504_v40 }
 0x3f7   :  { %v3008_v48 = vrot.slane %v2484_v11, 1  ;;  %2187 = vmatmul.bf16.gmra.mxu2 %v5477_v14  ;;  %2356 = vmatmul.bf16.gmra.mxu3 %v5490_v10 }
 0x3f9   :  { %v3009_v33 = vsel %vm2976_vm1, %v3007_v3, %v3008_v48  ;;  %v3147_v30 = vsel %vm2976_vm1, %v3008_v48, 0.0  ;;  %v6000_v3 = vld [vmem:[#allocation72_spill] sm:$0xff] }
 0x3fa   :  { %v3189_v49 = vadd.f32 %v3009_v33, %v2868_v5  ;;  %v3190_v51 = vadd.f32 %v3147_v30, %v2869_v22  ;;  %v2148_v17 = vpop.f32.mrf.mxu2  ;;  %v2317_v43 = vpop.f32.mrf.mxu3  ;;  %v5999_v22 = vld [vmem:[#allocation70_spill] sm:$0xff]  ;;  %v6001_v33 = vld [vmem:[#allocation71_spill] sm:$0xff] }
 0x3fb   :  { %v1788_v4 = vpop.f32.mrf.mxu1  ;;  %v2488_v31 = vpop.f32.mrf.mxu0  ;;  %v2318_v20 = vadd.f32 %v2317_v43, %v2148_v17  ;;  %v6002_v30 = vrot.slane %v6001_v33, 7  ;;  %v5532_v43 = vld [vmem:[#allocation5 + $0xb0] sm:$0xff] }
 0x3fc   :  { %v3252_v36 = vadd.f32 %v3251_v2, %v3189_v49  ;;  %v3322_v38 = vmul.f32 %v3189_v49, %v3189_v49  ;;  %v4199_v26 = vpack.c.bf16 %v3190_v51, %v3189_v49  ;;  %v1789_v34 = vadd.f32 %v1788_v4, %v5997_v23 }
 0x3fd   :  { %v3323_v1 = vmul.f32 %v3190_v51, %v3190_v51  ;;  %v2487_v5 = vadd.f32 %v2486_v54, %v2318_v20  ;;  %v2829_v49 = vsel %vm2655_vm0, 0.0, %v6002_v30 }
 0x3fe   :  { %v3253_v27 = vadd.f32 %v3252_v36, %v3190_v51  ;;  %v3385_v14 = vadd.f32 %v3384_v41, %v3322_v38  ;;  %4317 = vst [vmem:[#allocation10 + $0x50] sm:$0xff] %v4199_v26   ;;  %v2871_v0 = vadd.f32 %v5070_v19, %v1789_v34 }
 0x3ff   :  { %v3010_v19 = vrot.slane %v2487_v5, 1 }
 0x400   :  { %v3386_v16 = vadd.f32 %v3385_v14, %v3323_v1 }
 0x402   :  { %v2150_v9 = vpop.f32.mrf.mxu2  ;;  %v2319_v42 = vpop.f32.mrf.mxu3 }
 0x403   :  { %v2320_v44 = vadd.f32 %v2319_v42, %v2150_v9  ;;  %v1791_v15 = vpop.f32.mrf.mxu1  ;;  %v2491_v52 = vpop.f32.mrf.mxu0 }
 0x404   :  { %v1792_v58 = vadd.f32 %v1791_v15, %v5075_v25  ;;  %v6004_v15 = vld [vmem:[#allocation74_spill] sm:$0xff] }
 0x405   :  { %v2489_v7 = vadd.f32 %v2488_v31, %v2320_v44 }
 0x406   :  { %v2872_v47 = vadd.f32 %v2828_v32, %v1792_v58  ;;  %1830 = vmatmul.bf16.gmra.mxu1 %v5518_v18  ;;  %2530 = vmatmul.bf16.gmra.mxu0 %v5518_v18 }
 0x407   :  { %v3011_v13 = vrot.slane %v2489_v7, 1  ;;  %2192 = vmatmul.bf16.gmra.mxu2 %v5490_v10  ;;  %2361 = vmatmul.bf16.gmra.mxu3 %v5504_v40 }
 0x409   :  { %v3012_v25 = vsel %vm2976_vm1, %v3010_v19, %v3011_v13  ;;  %v3148_v37 = vsel %vm2976_vm1, %v3011_v13, 0.0 }
 0x40a   :  { %v3191_v61 = vadd.f32 %v3012_v25, %v2870_v46  ;;  %v3192_v29 = vadd.f32 %v3148_v37, %v2871_v0  ;;  %v2153_v56 = vpop.f32.mrf.mxu2  ;;  %v2322_v55 = vpop.f32.mrf.mxu3  ;;  %v6005_v25 = vld [vmem:[#allocation76_spill] sm:$0xff] }
 0x40b   :  { %v1793_v53 = vpop.f32.mrf.mxu1  ;;  %v2493_v2 = vpop.f32.mrf.mxu0  ;;  %v2323_v12 = vadd.f32 %v2322_v55, %v2153_v56 }
 0x40c   :  { %v3254_v60 = vadd.f32 %v3253_v27, %v3191_v61  ;;  %v3324_v50 = vmul.f32 %v3191_v61, %v3191_v61  ;;  %v4204_v45 = vpack.c.bf16 %v3192_v29, %v3191_v61  ;;  %v1794_v41 = vadd.f32 %v1793_v53, %v5999_v22  ;;  %v6006_v61 = vld [vmem:[#allocation75_spill] sm:$0xff] }
 0x40d   :  { %v3325_v59 = vmul.f32 %v3192_v29, %v3192_v29  ;;  %v2492_v62 = vadd.f32 %v2491_v52, %v2323_v12 }
 0x40e   :  { %v3255_v8 = vadd.f32 %v3254_v60, %v3192_v29  ;;  %v3387_v10 = vadd.f32 %v3386_v16, %v3324_v50  ;;  %4318 = vst [vmem:[#allocation10 + $0x58] sm:$0xff] %v4204_v45   ;;  %v2873_v24 = vadd.f32 %v5088_v35, %v1794_v41  ;;  %v6003_v16 = vld [vmem:[#allocation73_spill] sm:$0xff]  ;;  %v6007_v29 = vrot.slane %v6006_v61, 7 }
 0x40f   :  { %v3013_v35 = vrot.slane %v2492_v62, 1  ;;  %v6008_v62 = vld [vmem:[#allocation77_spill] sm:$0xff] }
 0x410   :  { %v3388_v28 = vadd.f32 %v3387_v10, %v3325_v59  ;;  %v2830_v56 = vsel %vm2655_vm0, 0.0, %v6007_v29 }
 0x412   :  { %v2155_v54 = vpop.f32.mrf.mxu2  ;;  %v2324_v57 = vpop.f32.mrf.mxu3 }
 0x413   :  { %v2325_v39 = vadd.f32 %v2324_v57, %v2155_v54  ;;  %v1796_v11 = vpop.f32.mrf.mxu1  ;;  %v2496_v46 = vpop.f32.mrf.mxu0 }
 0x414   :  { %v1797_v48 = vadd.f32 %v1796_v11, %v6000_v3 }
 0x415   :  { %v2494_v51 = vadd.f32 %v2493_v2, %v2325_v39  ;;  %v5546_v2 = vld [vmem:[#allocation5 + $0xb8] sm:$0xff] }
 0x416   :  { %v2874_v17 = vadd.f32 %v2829_v49, %v1797_v48  ;;  %1835 = vmatmul.bf16.gmra.mxu1 %v5532_v43  ;;  %2535 = vmatmul.bf16.gmra.mxu0 %v5532_v43  ;;  %v6009_v48 = vld [vmem:[#allocation78_spill] sm:$0xff] }
 0x417   :  { %v3014_v4 = vrot.slane %v2494_v51, 1  ;;  %2197 = vmatmul.bf16.gmra.mxu2 %v5504_v40  ;;  %2366 = vmatmul.bf16.gmra.mxu3 %v5518_v18 }
 0x419   :  { %v3015_v31 = vsel %vm2976_vm1, %v3013_v35, %v3014_v4  ;;  %v3149_v36 = vsel %vm2976_vm1, %v3014_v4, 0.0 }
 0x41a   :  { %v3193_v38 = vadd.f32 %v3015_v31, %v2872_v47  ;;  %v3194_v26 = vadd.f32 %v3149_v36, %v2873_v24  ;;  %v2158_v23 = vpop.f32.mrf.mxu2  ;;  %v2327_v34 = vpop.f32.mrf.mxu3  ;;  %v6010_v36 = vld [vmem:[#allocation80_spill] sm:$0xff] }
 0x41b   :  { %v1798_v27 = vpop.f32.mrf.mxu1  ;;  %v2498_v1 = vpop.f32.mrf.mxu0  ;;  %v2328_v44 = vadd.f32 %v2327_v34, %v2158_v23 }
 0x41c   :  { %v3256_v14 = vadd.f32 %v3255_v8, %v3193_v38  ;;  %v3326_v20 = vmul.f32 %v3193_v38, %v3193_v38  ;;  %v4209_v0 = vpack.c.bf16 %v3194_v26, %v3193_v38  ;;  %v1799_v9 = vadd.f32 %v1798_v27, %v6003_v16 }
 0x41d   :  { %v3327_v5 = vmul.f32 %v3194_v26, %v3194_v26  ;;  %v2497_v7 = vadd.f32 %v2496_v46, %v2328_v44 }
 0x41e   :  { %v3257_v42 = vadd.f32 %v3256_v14, %v3194_v26  ;;  %v3389_v40 = vadd.f32 %v3388_v28, %v3326_v20  ;;  %4319 = vst [vmem:[#allocation10 + $0x60] sm:$0xff] %v4209_v0   ;;  %v2875_v52 = vadd.f32 %v6004_v15, %v1799_v9  ;;  %v6011_v26 = vld [vmem:[#allocation79_spill] sm:$0xff] }
 0x41f   :  { %v3016_v60 = vrot.slane %v2497_v7, 1  ;;  %v6012_v23 = vrot.slane %v6011_v26, 7  ;;  %v5560_v14 = vld [vmem:[#allocation5 + $0xc0] sm:$0xff]  ;;  %v6013_v7 = vld [vmem:[#allocation53_spill] sm:$0xff] }
 0x420   :  { %v3390_v58 = vadd.f32 %v3389_v40, %v3327_v5 }
 0x421   :  { %v2831_v34 = vsel %vm2655_vm0, 0.0, %v6012_v23 }
 0x422   :  { %v2160_v63 = vpop.f32.mrf.mxu2  ;;  %v2329_v32 = vpop.f32.mrf.mxu3 }
 0x423   :  { %v2330_v47 = vadd.f32 %v2329_v32, %v2160_v63  ;;  %v1801_v19 = vpop.f32.mrf.mxu1  ;;  %v2501_v13 = vpop.f32.mrf.mxu0 }
 0x424   :  { %v1802_v37 = vadd.f32 %v1801_v19, %v6005_v25 }
 0x425   :  { %v2499_v55 = vadd.f32 %v2498_v1, %v2330_v47 }
 0x426   :  { %v2876_v53 = vadd.f32 %v2830_v56, %v1802_v37  ;;  %1840 = vmatmul.bf16.gmra.mxu1 %v5546_v2  ;;  %2540 = vmatmul.bf16.gmra.mxu0 %v5546_v2  ;;  %v6014_v37 = vld [vmem:[#allocation81_spill] sm:$0xff] }
 0x427   :  { %v3017_v50 = vrot.slane %v2499_v55, 1  ;;  %2202 = vmatmul.bf16.gmra.mxu2 %v5518_v18  ;;  %2371 = vmatmul.bf16.gmra.mxu3 %v5532_v43 }
 0x429   :  { %v3018_v45 = vsel %vm2976_vm1, %v3016_v60, %v3017_v50  ;;  %v3150_v22 = vsel %vm2976_vm1, %v3017_v50, 0.0 }
 0x42a   :  { %v3195_v41 = vadd.f32 %v3018_v45, %v2874_v17  ;;  %v3196_v8 = vadd.f32 %v3150_v22, %v2875_v52  ;;  %v2163_v59 = vpop.f32.mrf.mxu2  ;;  %v2332_v10 = vpop.f32.mrf.mxu3  ;;  %v6015_v22 = vld [vmem:[#allocation82_spill] sm:$0xff] }
 0x42b   :  { %v1803_v12 = vpop.f32.mrf.mxu1  ;;  %v2503_v24 = vpop.f32.mrf.mxu0  ;;  %v2333_v3 = vadd.f32 %v2332_v10, %v2163_v59 }
 0x42c   :  { %v3258_v28 = vadd.f32 %v3257_v42, %v3195_v41  ;;  %v3328_v54 = vmul.f32 %v3195_v41, %v3195_v41  ;;  %v4214_v57 = vpack.c.bf16 %v3196_v8, %v3195_v41  ;;  %v1804_v39 = vadd.f32 %v1803_v12, %v6008_v62 }
 0x42d   :  { %v3329_v46 = vmul.f32 %v3196_v8, %v3196_v8  ;;  %v2502_v17 = vadd.f32 %v2501_v13, %v2333_v3 }
 0x42e   :  { %v3259_v11 = vadd.f32 %v3258_v28, %v3196_v8  ;;  %v3391_v18 = vadd.f32 %v3390_v58, %v3328_v54  ;;  %4320 = vst [vmem:[#allocation10 + $0x68] sm:$0xff] %v4214_v57   ;;  %v2877_v33 = vadd.f32 %v6009_v48, %v1804_v39  ;;  %v6016_v8 = vld [vmem:[#allocation23_spill] sm:$0xff]  ;;  %v5574_v28 = vld [vmem:[#allocation5 + $0xc8] sm:$0xff] }
 0x42f   :  { %v3019_v20 = vrot.slane %v2502_v17, 1  ;;  %v6017_v59 = vrot.slane %v6016_v8, 7  ;;  %v6018_v17 = vld [vmem:[#allocation25_spill] sm:$0xff] }
 0x430   :  { %v3392_v30 = vadd.f32 %v3391_v18, %v3329_v46 }
 0x431   :  { %v2832_v10 = vsel %vm2655_vm0, 0.0, %v6017_v59 }
 0x432   :  { %v2165_v49 = vpop.f32.mrf.mxu2  ;;  %v2334_v51 = vpop.f32.mrf.mxu3 }
 0x433   :  { %v2335_v35 = vadd.f32 %v2334_v51, %v2165_v49  ;;  %v1806_v4 = vpop.f32.mrf.mxu1  ;;  %v2506_v31 = vpop.f32.mrf.mxu0 }
 0x434   :  { %v1807_v38 = vadd.f32 %v1806_v4, %v6010_v36 }
 0x435   :  { %v2504_v27 = vadd.f32 %v2503_v24, %v2335_v35 }
 0x436   :  { %v2878_v1 = vadd.f32 %v2831_v34, %v1807_v38  ;;  %1845 = vmatmul.bf16.gmra.mxu1 %v5560_v14  ;;  %2545 = vmatmul.bf16.gmra.mxu0 %v5560_v14  ;;  %v6019_v38 = vld [vmem:[#allocation83_spill] sm:$0xff] }
 0x437   :  { %v3020_v0 = vrot.slane %v2504_v27, 1  ;;  %2207 = vmatmul.bf16.gmra.mxu2 %v5532_v43  ;;  %2376 = vmatmul.bf16.gmra.mxu3 %v5546_v2 }
 0x439   :  { %v3021_v16 = vsel %vm2976_vm1, %v3019_v20, %v3020_v0  ;;  %v3151_v9 = vsel %vm2976_vm1, %v3020_v0, 0.0 }
 0x43a   :  { %v3197_v42 = vadd.f32 %v3021_v16, %v2876_v53  ;;  %v3198_v5 = vadd.f32 %v3151_v9, %v2877_v33  ;;  %v2168_v40 = vpop.f32.mrf.mxu2  ;;  %v2337_v44 = vpop.f32.mrf.mxu3  ;;  %v6020_v9 = vld [vmem:[#allocation84_spill] sm:$0xff] }
 0x43b   :  { %v1808_v15 = vpop.f32.mrf.mxu1  ;;  %v2508_v52 = vpop.f32.mrf.mxu0  ;;  %v2338_v25 = vadd.f32 %v2337_v44, %v2168_v40 }
 0x43c   :  { %v3260_v58 = vadd.f32 %v3259_v11, %v3197_v42  ;;  %v3330_v63 = vmul.f32 %v3197_v42, %v3197_v42  ;;  %v4219_v32 = vpack.c.bf16 %v3198_v5, %v3197_v42  ;;  %v1809_v47 = vadd.f32 %v1808_v15, %v6013_v7 }
 0x43d   :  { %v3331_v13 = vmul.f32 %v3198_v5, %v3198_v5  ;;  %v2507_v53 = vadd.f32 %v2506_v31, %v2338_v25 }
 0x43e   :  { %v3261_v19 = vadd.f32 %v3260_v58, %v3198_v5  ;;  %v3393_v43 = vadd.f32 %v3392_v30, %v3330_v63  ;;  %4321 = vst [vmem:[#allocation10 + $0x70] sm:$0xff] %v4219_v32   ;;  %v2879_v61 = vadd.f32 %v6014_v37, %v1809_v47  ;;  %v6021_v5 = vld [vmem:[#allocation27_spill] sm:$0xff]  ;;  %v5588_v58 = vld [vmem:[#allocation5 + $0xd0] sm:$0xff] }
 0x43f   :  { %v3022_v54 = vrot.slane %v2507_v53, 1  ;;  %v6022_v40 = vrot.slane %v6021_v5, 7  ;;  %v6023_v53 = vld [vmem:[#allocation29_spill] sm:$0xff] }
 0x440   :  { %v3394_v29 = vadd.f32 %v3393_v43, %v3331_v13 }
 0x441   :  { %v2833_v44 = vsel %vm2655_vm0, 0.0, %v6022_v40 }
 0x442   :  { %v2170_v56 = vpop.f32.mrf.mxu2  ;;  %v2339_v55 = vpop.f32.mrf.mxu3 }
 0x443   :  { %v2340_v60 = vadd.f32 %v2339_v55, %v2170_v56  ;;  %v1811_v50 = vpop.f32.mrf.mxu1  ;;  %v2511_v45 = vpop.f32.mrf.mxu0 }
 0x444   :  { %v1812_v41 = vadd.f32 %v1811_v50, %v6015_v22 }
 0x445   :  { %v2509_v12 = vadd.f32 %v2508_v52, %v2340_v60 }
 0x446   :  { %v2880_v24 = vadd.f32 %v2832_v10, %v1812_v41  ;;  %1850 = vmatmul.bf16.gmra.mxu1 %v5574_v28  ;;  %2550 = vmatmul.bf16.gmra.mxu0 %v5574_v28  ;;  %v6024_v41 = vld [vmem:[#allocation85_spill] sm:$0xff] }
 0x447   :  { %v3023_v57 = vrot.slane %v2509_v12, 1  ;;  %2212 = vmatmul.bf16.gmra.mxu2 %v5546_v2  ;;  %2381 = vmatmul.bf16.gmra.mxu3 %v5560_v14 }
 0x449   :  { %v3024_v62 = vsel %vm2976_vm1, %v3022_v54, %v3023_v57  ;;  %v3152_v39 = vsel %vm2976_vm1, %v3023_v57, 0.0 }
 0x44a   :  { %v3199_v11 = vadd.f32 %v3024_v62, %v2878_v1  ;;  %v3200_v46 = vadd.f32 %v3152_v39, %v2879_v61  ;;  %v2173_v18 = vpop.f32.mrf.mxu2  ;;  %v2342_v3 = vpop.f32.mrf.mxu3  ;;  %v6025_v39 = vld [vmem:[#allocation86_spill] sm:$0xff] }
 0x44b   :  { %v1813_v48 = vpop.f32.mrf.mxu1  ;;  %v2513_v33 = vpop.f32.mrf.mxu0  ;;  %v2343_v36 = vadd.f32 %v2342_v3, %v2173_v18 }
 0x44c   :  { %v3262_v30 = vadd.f32 %v3261_v19, %v3199_v11  ;;  %v3332_v49 = vmul.f32 %v3199_v11, %v3199_v11  ;;  %v4224_v51 = vpack.c.bf16 %v3200_v46, %v3199_v11  ;;  %v1814_v35 = vadd.f32 %v1813_v48, %v6018_v17 }
 0x44d   :  { %v3333_v31 = vmul.f32 %v3200_v46, %v3200_v46  ;;  %v2512_v1 = vadd.f32 %v2511_v45, %v2343_v36 }
 0x44e   :  { %v3263_v4 = vadd.f32 %v3262_v30, %v3200_v46  ;;  %v3395_v2 = vadd.f32 %v3394_v29, %v3332_v49  ;;  %4322 = vst [vmem:[#allocation10 + $0x78] sm:$0xff] %v4224_v51   ;;  %v2881_v26 = vadd.f32 %v6019_v38, %v1814_v35  ;;  %v6026_v46 = vld [vmem:[#allocation31_spill] sm:$0xff] }
 0x44f   :  { %v3025_v63 = vrot.slane %v2512_v1, 1  ;;  %v6027_v18 = vrot.slane %v6026_v46, 7  ;;  %v5602_v30 = vld [vmem:[#allocation5 + $0xd8] sm:$0xff]  ;;  %v6028_v1 = vld [vmem:[#allocation33_spill] sm:$0xff] }
 0x450   :  { %v3396_v23 = vadd.f32 %v3395_v2, %v3333_v31 }
 0x451   :  { %v2834_v3 = vsel %vm2655_vm0, 0.0, %v6027_v18 }
 0x452   :  { %v2175_v34 = vpop.f32.mrf.mxu2  ;;  %v2344_v27 = vpop.f32.mrf.mxu3 }
 0x453   :  { %v2345_v20 = vadd.f32 %v2344_v27, %v2175_v34  ;;  %v1816_v0 = vpop.f32.mrf.mxu1  ;;  %v2516_v16 = vpop.f32.mrf.mxu0 }
 0x454   :  { %v1817_v42 = vadd.f32 %v1816_v0, %v6020_v9 }
 0x455   :  { %v2514_v15 = vadd.f32 %v2513_v33, %v2345_v20 }
 0x456   :  { %v2882_v52 = vadd.f32 %v2833_v44, %v1817_v42  ;;  %1855 = vmatmul.bf16.gmra.mxu1 %v5588_v58  ;;  %2555 = vmatmul.bf16.gmra.mxu0 %v5588_v58  ;;  %v6029_v42 = vld [vmem:[#allocation87_spill] sm:$0xff] }
 0x457   :  { %v3026_v32 = vrot.slane %v2514_v15, 1  ;;  %2217 = vmatmul.bf16.gmra.mxu2 %v5560_v14  ;;  %2386 = vmatmul.bf16.gmra.mxu3 %v5574_v28 }
 0x459   :  { %v3027_v7 = vsel %vm2976_vm1, %v3025_v63, %v3026_v32  ;;  %v3153_v47 = vsel %vm2976_vm1, %v3026_v32, 0.0 }
 0x45a   :  { %v3201_v19 = vadd.f32 %v3027_v7, %v2880_v24  ;;  %v3202_v13 = vadd.f32 %v3153_v47, %v2881_v26  ;;  %v2178_v43 = vpop.f32.mrf.mxu2  ;;  %v2347_v25 = vpop.f32.mrf.mxu3  ;;  %v6030_v47 = vld [vmem:[#allocation88_spill] sm:$0xff] }
 0x45b   :  { %v1818_v37 = vpop.f32.mrf.mxu1  ;;  %v2518_v61 = vpop.f32.mrf.mxu0  ;;  %v2348_v22 = vadd.f32 %v2347_v25, %v2178_v43 }
 0x45c   :  { %v3264_v29 = vadd.f32 %v3263_v4, %v3201_v19  ;;  %v3334_v56 = vmul.f32 %v3201_v19, %v3201_v19  ;;  %v4229_v55 = vpack.c.bf16 %v3202_v13, %v3201_v19  ;;  %v1819_v60 = vadd.f32 %v1818_v37, %v6023_v53 }
 0x45d   :  { %v3335_v45 = vmul.f32 %v3202_v13, %v3202_v13  ;;  %v2517_v24 = vadd.f32 %v2516_v16, %v2348_v22 }
 0x45e   :  { %v3265_v50 = vadd.f32 %v3264_v29, %v3202_v13  ;;  %v3397_v14 = vadd.f32 %v3396_v23, %v3334_v56  ;;  %4323 = vst [vmem:[#allocation10 + $0x80] sm:$0xff] %v4229_v55   ;;  %v2883_v8 = vadd.f32 %v6024_v41, %v1819_v60  ;;  %v6031_v13 = vld [vmem:[#allocation35_spill] sm:$0xff] }
 0x45f   :  { %v3028_v49 = vrot.slane %v2517_v24, 1  ;;  %v6032_v43 = vrot.slane %v6031_v13, 7  ;;  %v5616_v29 = vld [vmem:[#allocation5 + $0xe0] sm:$0xff]  ;;  %v6033_v24 = vld [vmem:[#allocation37_spill] sm:$0xff] }
 0x460   :  { %v3398_v59 = vadd.f32 %v3397_v14, %v3335_v45 }
 0x461   :  { %v2835_v25 = vsel %vm2655_vm0, 0.0, %v6032_v43 }
 0x462   :  { %v2180_v10 = vpop.f32.mrf.mxu2  ;;  %v2349_v12 = vpop.f32.mrf.mxu3 }
 0x463   :  { %v2350_v54 = vadd.f32 %v2349_v12, %v2180_v10  ;;  %v1821_v57 = vpop.f32.mrf.mxu1  ;;  %v2521_v62 = vpop.f32.mrf.mxu0 }
 0x464   :  { %v1822_v11 = vadd.f32 %v1821_v57, %v6025_v39 }
 0x465   :  { %v2519_v48 = vadd.f32 %v2518_v61, %v2350_v54 }
 0x466   :  { %v2884_v33 = vadd.f32 %v2834_v3, %v1822_v11  ;;  %1860 = vmatmul.bf16.gmra.mxu1 %v5602_v30  ;;  %2560 = vmatmul.bf16.gmra.mxu0 %v5602_v30  ;;  %v6034_v11 = vld [vmem:[#allocation89_spill] sm:$0xff] }
 0x467   :  { %v3029_v51 = vrot.slane %v2519_v48, 1  ;;  %2222 = vmatmul.bf16.gmra.mxu2 %v5574_v28  ;;  %2391 = vmatmul.bf16.gmra.mxu3 %v5588_v58 }
 0x469   :  { %v3030_v17 = vsel %vm2976_vm1, %v3028_v49, %v3029_v51  ;;  %v3154_v35 = vsel %vm2976_vm1, %v3029_v51, 0.0 }
 0x46a   :  { %v3203_v4 = vadd.f32 %v3030_v17, %v2882_v52  ;;  %v3204_v31 = vadd.f32 %v3154_v35, %v2883_v8  ;;  %v2183_v2 = vpop.f32.mrf.mxu2  ;;  %v2352_v36 = vpop.f32.mrf.mxu3  ;;  %v6035_v35 = vld [vmem:[#allocation90_spill] sm:$0xff] }
 0x46b   :  { %v1823_v38 = vpop.f32.mrf.mxu1  ;;  %v2523_v26 = vpop.f32.mrf.mxu0  ;;  %v2353_v9 = vadd.f32 %v2352_v36, %v2183_v2 }
 0x46c   :  { %v3266_v23 = vadd.f32 %v3265_v50, %v3203_v4  ;;  %v3336_v34 = vmul.f32 %v3203_v4, %v3203_v4  ;;  %v4234_v27 = vpack.c.bf16 %v3204_v31, %v3203_v4  ;;  %v1824_v20 = vadd.f32 %v1823_v38, %v6028_v1 }
 0x46d   :  { %v3337_v16 = vmul.f32 %v3204_v31, %v3204_v31  ;;  %v2522_v52 = vadd.f32 %v2521_v62, %v2353_v9 }
 0x46e   :  { %v3267_v0 = vadd.f32 %v3266_v23, %v3204_v31  ;;  %v3399_v28 = vadd.f32 %v3398_v59, %v3336_v34  ;;  %4324 = vst [vmem:[#allocation10 + $0x88] sm:$0xff] %v4234_v27   ;;  %v2885_v5 = vadd.f32 %v6029_v42, %v1824_v20  ;;  %v6036_v31 = vld [vmem:[#allocation39_spill] sm:$0xff]  ;;  %v5630_v23 = vld [vmem:[#allocation5 + $0xe8] sm:$0xff] }
 0x46f   :  { %v3031_v56 = vrot.slane %v2522_v52, 1  ;;  %v6037_v2 = vrot.slane %v6036_v31, 7  ;;  %v6038_v52 = vld [vmem:[#allocation41_spill] sm:$0xff] }
 0x470   :  { %v3400_v40 = vadd.f32 %v3399_v28, %v3337_v16 }
 0x471   :  { %v2836_v36 = vsel %vm2655_vm0, 0.0, %v6037_v2 }
 0x472   :  { %v2185_v44 = vpop.f32.mrf.mxu2  ;;  %v2354_v15 = vpop.f32.mrf.mxu3 }
 0x473   :  { %v2355_v63 = vadd.f32 %v2354_v15, %v2185_v44  ;;  %v1826_v32 = vpop.f32.mrf.mxu1  ;;  %v2526_v7 = vpop.f32.mrf.mxu0 }
 0x474   :  { %v1827_v19 = vadd.f32 %v1826_v32, %v6030_v47 }
 0x475   :  { %v2524_v37 = vadd.f32 %v2523_v26, %v2355_v63 }
 0x476   :  { %v2886_v61 = vadd.f32 %v2835_v25, %v1827_v19  ;;  %1865 = vmatmul.bf16.gmra.mxu1 %v5616_v29  ;;  %2565 = vmatmul.bf16.gmra.mxu0 %v5616_v29  ;;  %v6039_v19 = vld [vmem:[#allocation91_spill] sm:$0xff] }
 0x477   :  { %v3032_v55 = vrot.slane %v2524_v37, 1  ;;  %2227 = vmatmul.bf16.gmra.mxu2 %v5588_v58  ;;  %2396 = vmatmul.bf16.gmra.mxu3 %v5602_v30 }
 0x479   :  { %v3033_v53 = vsel %vm2976_vm1, %v3031_v56, %v3032_v55  ;;  %v3155_v60 = vsel %vm2976_vm1, %v3032_v55, 0.0 }
 0x47a   :  { %v3205_v50 = vadd.f32 %v3033_v53, %v2884_v33  ;;  %v3206_v45 = vadd.f32 %v3155_v60, %v2885_v5  ;;  %v2188_v14 = vpop.f32.mrf.mxu2  ;;  %v2357_v22 = vpop.f32.mrf.mxu3  ;;  %v6040_v60 = vld [vmem:[#allocation92_spill] sm:$0xff] }
 0x47b   :  { %v1828_v41 = vpop.f32.mrf.mxu1  ;;  %v2528_v8 = vpop.f32.mrf.mxu0  ;;  %v2358_v39 = vadd.f32 %v2357_v22, %v2188_v14 }
 0x47c   :  { %v3268_v59 = vadd.f32 %v3267_v0, %v3205_v50  ;;  %v3338_v10 = vmul.f32 %v3205_v50, %v3205_v50  ;;  %v4239_v12 = vpack.c.bf16 %v3206_v45, %v3205_v50  ;;  %v1829_v54 = vadd.f32 %v1828_v41, %v6033_v24 }
 0x47d   :  { %v3339_v62 = vmul.f32 %v3206_v45, %v3206_v45  ;;  %v2527_v33 = vadd.f32 %v2526_v7, %v2358_v39 }
 0x47e   :  { %v3269_v57 = vadd.f32 %v3268_v59, %v3206_v45  ;;  %v3401_v58 = vadd.f32 %v3400_v40, %v3338_v10  ;;  %4325 = vst [vmem:[#allocation10 + $0x90] sm:$0xff] %v4239_v12   ;;  %v2887_v46 = vadd.f32 %v6034_v11, %v1829_v54  ;;  %v6041_v45 = vld [vmem:[#allocation43_spill] sm:$0xff]  ;;  %v5644_v59 = vld [vmem:[#allocation5 + $0xf0] sm:$0xff] }
 0x47f   :  { %v3034_v34 = vrot.slane %v2527_v33, 1  ;;  %v6042_v14 = vrot.slane %v6041_v45, 7  ;;  %v6043_v33 = vld [vmem:[#allocation45_spill] sm:$0xff] }
 0x480   :  { %v3402_v18 = vadd.f32 %v3401_v58, %v3339_v62 }
 0x481   :  { %v2837_v22 = vsel %vm2655_vm0, 0.0, %v6042_v14 }
 0x482   :  { %v2190_v3 = vpop.f32.mrf.mxu2  ;;  %v2359_v48 = vpop.f32.mrf.mxu3 }
 0x483   :  { %v2360_v49 = vadd.f32 %v2359_v48, %v2190_v3  ;;  %v1831_v51 = vpop.f32.mrf.mxu1  ;;  %v2531_v17 = vpop.f32.mrf.mxu0 }
 0x484   :  { %v1832_v4 = vadd.f32 %v1831_v51, %v6035_v35 }
 0x485   :  { %v2529_v38 = vadd.f32 %v2528_v8, %v2360_v49 }
 0x486   :  { %v2888_v26 = vadd.f32 %v2836_v36, %v1832_v4  ;;  %1870 = vmatmul.bf16.gmra.mxu1 %v5630_v23  ;;  %2570 = vmatmul.bf16.gmra.mxu0 %v5630_v23  ;;  %v6044_v4 = vld [vmem:[#allocation93_spill] sm:$0xff] }
 0x487   :  { %v3035_v27 = vrot.slane %v2529_v38, 1  ;;  %2232 = vmatmul.bf16.gmra.mxu2 %v5602_v30  ;;  %2401 = vmatmul.bf16.gmra.mxu3 %v5616_v29 }
 0x489   :  { %v3036_v1 = vsel %vm2976_vm1, %v3034_v34, %v3035_v27  ;;  %v3156_v20 = vsel %vm2976_vm1, %v3035_v27, 0.0 }
 0x48a   :  { %v3207_v0 = vadd.f32 %v3036_v1, %v2886_v61  ;;  %v3208_v16 = vadd.f32 %v3156_v20, %v2887_v46  ;;  %v2193_v28 = vpop.f32.mrf.mxu2  ;;  %v2362_v9 = vpop.f32.mrf.mxu3 }
 0x48b   :  { %v1833_v42 = vpop.f32.mrf.mxu1  ;;  %v2533_v5 = vpop.f32.mrf.mxu0  ;;  %v2363_v47 = vadd.f32 %v2362_v9, %v2193_v28 }
 0x48c   :  { %v3270_v40 = vadd.f32 %v3269_v57, %v3207_v0  ;;  %v3340_v44 = vmul.f32 %v3207_v0, %v3207_v0  ;;  %v4244_v15 = vpack.c.bf16 %v3208_v16, %v3207_v0  ;;  %v1834_v63 = vadd.f32 %v1833_v42, %v6038_v52  ;;  %v4425_v42 = vld [vmem:[#allocation5 + $0xf8] sm:$0xff] }
 0x48d   :  { %v3341_v7 = vmul.f32 %v3208_v16, %v3208_v16  ;;  %v2532_v61 = vadd.f32 %v2531_v17, %v2363_v47  ;;  %v6045_v0 = vrot.slane %v5223_v6, 7 }
 0x48e   :  { %v3271_v32 = vadd.f32 %v3270_v40, %v3208_v16  ;;  %v3403_v30 = vadd.f32 %v3402_v18, %v3340_v44  ;;  %4326 = vst [vmem:[#allocation10 + $0x98] sm:$0xff] %v4244_v15   ;;  %v2889_v13 = vadd.f32 %v6039_v19, %v1834_v63 }
 0x48f   :  { %v3037_v10 = vrot.slane %v2532_v61, 1  ;;  %v2838_v16 = vsel %vm2655_vm0, 0.0, %v6045_v0 }
 0x490   :  { %v3404_v43 = vadd.f32 %v3403_v30, %v3341_v7 }
 0x492   :  { %v2195_v25 = vpop.f32.mrf.mxu2  ;;  %v2364_v37 = vpop.f32.mrf.mxu3 }
 0x493   :  { %v2365_v56 = vadd.f32 %v2364_v37, %v2195_v25  ;;  %v1836_v55 = vpop.f32.mrf.mxu1  ;;  %v2536_v53 = vpop.f32.mrf.mxu0 }
 0x494   :  { %v1837_v50 = vadd.f32 %v1836_v55, %v6040_v60 }
 0x495   :  { %v2534_v41 = vadd.f32 %v2533_v5, %v2365_v56  ;;  %v6047_v56 = vld [vmem:[#allocation94_spill] sm:$0xff] }
 0x496   :  { %v2890_v8 = vadd.f32 %v2837_v22, %v1837_v50  ;;  %1875 = vmatmul.bf16.gmra.mxu1 %v5644_v59  ;;  %2575 = vmatmul.bf16.gmra.mxu0 %v5644_v59 }
 0x497   :  { %v3038_v12 = vrot.slane %v2534_v41, 1  ;;  %2237 = vmatmul.bf16.gmra.mxu2 %v5616_v29  ;;  %2406 = vmatmul.bf16.gmra.mxu3 %v5630_v23 }
 0x499   :  { %v3039_v24 = vsel %vm2976_vm1, %v3037_v10, %v3038_v12  ;;  %v3157_v54 = vsel %vm2976_vm1, %v3038_v12, 0.0  ;;  %v6049_v12 = vld [vmem:[#allocation51_spill] sm:$0xff] }
 0x49a   :  { %v3209_v57 = vadd.f32 %v3039_v24, %v2888_v26  ;;  %v3210_v62 = vadd.f32 %v3157_v54, %v2889_v13  ;;  %v2198_v58 = vpop.f32.mrf.mxu2  ;;  %v2367_v39 = vpop.f32.mrf.mxu3  ;;  %v6046_v13 = vld [vmem:[#allocation47_spill] sm:$0xff]  ;;  %v6050_v24 = vrot.slane %v6049_v12, 7 }
 0x49b   :  { %v1838_v11 = vpop.f32.mrf.mxu1  ;;  %v2538_v46 = vpop.f32.mrf.mxu0  ;;  %v2368_v35 = vadd.f32 %v2367_v39, %v2198_v58  ;;  %v6051_v58 = vld [vmem:[#allocation49_spill] sm:$0xff] }
 0x49c   :  { %v3272_v18 = vadd.f32 %v3271_v32, %v3209_v57  ;;  %v3342_v3 = vmul.f32 %v3209_v57, %v3209_v57  ;;  %v4249_v48 = vpack.c.bf16 %v3210_v62, %v3209_v57  ;;  %v1839_v49 = vadd.f32 %v1838_v11, %v6043_v33 }
 0x49d   :  { %v3343_v17 = vmul.f32 %v3210_v62, %v3210_v62  ;;  %v2537_v26 = vadd.f32 %v2536_v53, %v2368_v35  ;;  %v2839_v54 = vsel %vm2655_vm0, 0.0, %v6050_v24 }
 0x49e   :  { %v3273_v51 = vadd.f32 %v3272_v18, %v3210_v62  ;;  %v3405_v29 = vadd.f32 %v3404_v43, %v3342_v3  ;;  %4327 = vst [vmem:[#allocation10 + $0xa0] sm:$0xff] %v4249_v48   ;;  %v2891_v31 = vadd.f32 %v6044_v4, %v1839_v49 }
 0x49f   :  { %v3040_v5 = vrot.slane %v2537_v26, 1 }
 0x4a0   :  { %v3406_v2 = vadd.f32 %v3405_v29, %v3343_v17 }
 0x4a2   :  { %v2200_v36 = vpop.f32.mrf.mxu2  ;;  %v2369_v38 = vpop.f32.mrf.mxu3 }
 0x4a3   :  { %v2370_v34 = vadd.f32 %v2369_v38, %v2200_v36  ;;  %v1841_v27 = vpop.f32.mrf.mxu1  ;;  %v2541_v1 = vpop.f32.mrf.mxu0 }
 0x4a4   :  { %v1842_v20 = vadd.f32 %v1841_v27, %v5225_v21 }
 0x4a5   :  { %v2539_v28 = vadd.f32 %v2538_v46, %v2370_v34  ;;  %v6053_v34 = vld [vmem:[#allocation22_spill] sm:$0xff] }
 0x4a6   :  { %v2892_v9 = vadd.f32 %v2838_v16, %v1842_v20  ;;  %1880 = vmatmul.bf16.gmra.mxu1 %v4425_v42  ;;  %2580 = vmatmul.bf16.gmra.mxu0 %v4425_v42 }
 0x4a7   :  { %v3041_v40 = vrot.slane %v2539_v28, 1  ;;  %2242 = vmatmul.bf16.gmra.mxu2 %v5630_v23  ;;  %2411 = vmatmul.bf16.gmra.mxu3 %v5644_v59 }
 0x4a9   :  { %v3042_v44 = vsel %vm2976_vm1, %v3040_v5, %v3041_v40  ;;  %v3158_v15 = vsel %vm2976_vm1, %v3041_v40, 0.0  ;;  %v6054_v5 = vld [vmem:[#allocation96_spill] sm:$0xff] }
 0x4aa   :  { %v3211_v21 = vadd.f32 %v3042_v44, %v2890_v8  ;;  %v3212_v52 = vadd.f32 %v3158_v15, %v2891_v31  ;;  %v2203_v6 = vpop.f32.mrf.mxu2  ;;  %v2372_v63 = vpop.f32.mrf.mxu3  ;;  %v6048_v8 = vld [vmem:[#allocation95_spill] sm:$0xff]  ;;  %v6052_v31 = vld [vmem:[#allocation54_spill] sm:$0xff]  ;;  %v6055_v44 = vld [vmem:[#allocation24_spill] sm:$0xff] }
 0x4ab   :  { %v1843_v32 = vpop.f32.mrf.mxu1  ;;  %v2543_v7 = vpop.f32.mrf.mxu0  ;;  %v2373_v61 = vadd.f32 %v2372_v63, %v2203_v6  ;;  %v6056_v15 = vrot.slane %v6055_v44, 7 }
 0x4ac   :  { %v3274_v30 = vadd.f32 %v3273_v51, %v3211_v21  ;;  %v3344_v47 = vmul.f32 %v3211_v21, %v3211_v21  ;;  %v4254_v19 = vpack.c.bf16 %v3212_v52, %v3211_v21  ;;  %v1844_v43 = vadd.f32 %v1843_v32, %v6046_v13 }
 0x4ad   :  { %v3345_v37 = vmul.f32 %v3212_v52, %v3212_v52  ;;  %v2542_v45 = vadd.f32 %v2541_v1, %v2373_v61  ;;  %v2840_v21 = vsel %vm2655_vm0, 0.0, %v6056_v15 }
 0x4ae   :  { %v3275_v25 = vadd.f32 %v3274_v30, %v3212_v52  ;;  %v3407_v23 = vadd.f32 %v3406_v2, %v3344_v47  ;;  %4328 = vst [vmem:[#allocation10 + $0xa8] sm:$0xff] %v4254_v19   ;;  %v2893_v55 = vadd.f32 %v6047_v56, %v1844_v43 }
 0x4af   :  { %v3043_v39 = vrot.slane %v2542_v45, 1 }
 0x4b0   :  { %v3408_v53 = vadd.f32 %v3407_v23, %v3345_v37 }
 0x4b2   :  { %v2205_v60 = vpop.f32.mrf.mxu2  ;;  %v2374_v50 = vpop.f32.mrf.mxu3 }
 0x4b3   :  { %v2375_v14 = vadd.f32 %v2374_v50, %v2205_v60  ;;  %v1846_v22 = vpop.f32.mrf.mxu1  ;;  %v2546_v41 = vpop.f32.mrf.mxu0 }
 0x4b4   :  { %v1847_v10 = vadd.f32 %v1846_v22, %v6048_v8  ;;  %v6058_v22 = vld [vmem:[#allocation97_spill] sm:$0xff] }
 0x4b5   :  { %v2544_v57 = vadd.f32 %v2543_v7, %v2375_v14 }
 0x4b6   :  { %v2894_v62 = vadd.f32 %v2839_v54, %v1847_v10  ;;  %1885 = vmatmul.bf16.gmra.mxu1 %v6051_v58  ;;  %2585 = vmatmul.bf16.gmra.mxu0 %v6051_v58  ;;  %v6059_v58 = vld [vmem:[#allocation98_spill] sm:$0xff] }
 0x4b7   :  { %v3044_v11 = vrot.slane %v2544_v57, 1  ;;  %2247 = vmatmul.bf16.gmra.mxu2 %v5644_v59  ;;  %2416 = vmatmul.bf16.gmra.mxu3 %v4425_v42 }
 0x4b9   :  { %v3045_v46 = vsel %vm2976_vm1, %v3043_v39, %v3044_v11  ;;  %v3159_v18 = vsel %vm2976_vm1, %v3044_v11, 0.0  ;;  %v6060_v11 = vld [vmem:[#allocation28_spill] sm:$0xff] }
 0x4ba   :  { %v3213_v3 = vadd.f32 %v3045_v46, %v2892_v9  ;;  %v3214_v48 = vadd.f32 %v3159_v18, %v2893_v55  ;;  %v2208_v33 = vpop.f32.mrf.mxu2  ;;  %v2377_v49 = vpop.f32.mrf.mxu3  ;;  %v6057_v55 = vld [vmem:[#allocation26_spill] sm:$0xff]  ;;  %v6061_v46 = vrot.slane %v6060_v11, 7 }
 0x4bb   :  { %v1848_v51 = vpop.f32.mrf.mxu1  ;;  %v2548_v17 = vpop.f32.mrf.mxu0  ;;  %v2378_v59 = vadd.f32 %v2377_v49, %v2208_v33 }
 0x4bc   :  { %v3276_v29 = vadd.f32 %v3275_v25, %v3213_v3  ;;  %v3346_v35 = vmul.f32 %v3213_v3, %v3213_v3  ;;  %v4259_v4 = vpack.c.bf16 %v3214_v48, %v3213_v3  ;;  %v1849_v2 = vadd.f32 %v1848_v51, %v6052_v31 }
 0x4bd   :  { %v3347_v38 = vmul.f32 %v3214_v48, %v3214_v48  ;;  %v2547_v16 = vadd.f32 %v2546_v41, %v2378_v59  ;;  %v2841_v18 = vsel %vm2655_vm0, 0.0, %v6061_v46 }
 0x4be   :  { %v3277_v36 = vadd.f32 %v3276_v29, %v3214_v48  ;;  %v3409_v26 = vadd.f32 %v3408_v53, %v3346_v35  ;;  %4329 = vst [vmem:[#allocation10 + $0xb0] sm:$0xff] %v4259_v4   ;;  %v2895_v27 = vadd.f32 %v6053_v34, %v1849_v2  ;;  %v6062_v34 = vld [vmem:[#allocation30_spill] sm:$0xff] }
 0x4bf   :  { %v3046_v63 = vrot.slane %v2547_v16, 1 }
 0x4c0   :  { %v3410_v1 = vadd.f32 %v3409_v26, %v3347_v38 }
 0x4c2   :  { %v2210_v20 = vpop.f32.mrf.mxu2  ;;  %v2379_v0 = vpop.f32.mrf.mxu3 }
 0x4c3   :  { %v2380_v28 = vadd.f32 %v2379_v0, %v2210_v20  ;;  %v1851_v9 = vpop.f32.mrf.mxu1  ;;  %v2551_v42 = vpop.f32.mrf.mxu0 }
 0x4c4   :  { %v1852_v40 = vadd.f32 %v1851_v9, %v6054_v5 }
 0x4c5   :  { %v2549_v52 = vadd.f32 %v2548_v17, %v2380_v28  ;;  %v6063_v28 = vld [vmem:[#allocation99_spill] sm:$0xff] }
 0x4c6   :  { %v2896_v6 = vadd.f32 %v2840_v21, %v1852_v40 }
 0x4c7   :  { %v3047_v32 = vrot.slane %v2549_v52, 1 }
 0x4c9   :  { %v3048_v7 = vsel %vm2976_vm1, %v3046_v63, %v3047_v32  ;;  %v3160_v30 = vsel %vm2976_vm1, %v3047_v32, 0.0  ;;  %v6065_v32 = vld [vmem:[#allocation32_spill] sm:$0xff] }
 0x4ca   :  { %v3215_v47 = vadd.f32 %v3048_v7, %v2894_v62  ;;  %v3216_v19 = vadd.f32 %v3160_v30, %v2895_v27  ;;  %v2213_v13 = vpop.f32.mrf.mxu2  ;;  %v2382_v43 = vpop.f32.mrf.mxu3  ;;  %v6066_v7 = vrot.slane %v6065_v32, 7 }
 0x4cb   :  { %v1853_v25 = vpop.f32.mrf.mxu1  ;;  %v2553_v37 = vpop.f32.mrf.mxu0  ;;  %v2383_v14 = vadd.f32 %v2382_v43, %v2213_v13 }
 0x4cc   :  { %v3278_v23 = vadd.f32 %v3277_v36, %v3215_v47  ;;  %v3348_v61 = vmul.f32 %v3215_v47, %v3215_v47  ;;  %v4264_v56 = vpack.c.bf16 %v3216_v19, %v3215_v47  ;;  %v1854_v53 = vadd.f32 %v1853_v25, %v6057_v55 }
 0x4cd   :  { %v3349_v50 = vmul.f32 %v3216_v19, %v3216_v19  ;;  %v2552_v24 = vadd.f32 %v2551_v42, %v2383_v14  ;;  %v2842_v30 = vsel %vm2655_vm0, 0.0, %v6066_v7 }
 0x4ce   :  { %v3279_v60 = vadd.f32 %v3278_v23, %v3216_v19  ;;  %v3411_v45 = vadd.f32 %v3410_v1, %v3348_v61  ;;  %4330 = vst [vmem:[#allocation10 + $0xb8] sm:$0xff] %v4264_v56   ;;  %v2897_v41 = vadd.f32 %v6058_v22, %v1854_v53  ;;  %v6067_v22 = vld [vmem:[#allocation34_spill] sm:$0xff] }
 0x4cf   :  { %v3049_v33 = vrot.slane %v2552_v24, 1 }
 0x4d0   :  { %v3412_v8 = vadd.f32 %v3411_v45, %v3349_v50 }
 0x4d2   :  { %v2215_v10 = vpop.f32.mrf.mxu2  ;;  %v2384_v12 = vpop.f32.mrf.mxu3 }
 0x4d3   :  { %v2385_v54 = vadd.f32 %v2384_v12, %v2215_v10  ;;  %v1856_v57 = vpop.f32.mrf.mxu1  ;;  %v2556_v62 = vpop.f32.mrf.mxu0 }
 0x4d4   :  { %v1857_v39 = vadd.f32 %v1856_v57, %v6059_v58 }
 0x4d5   :  { %v2554_v3 = vadd.f32 %v2553_v37, %v2385_v54  ;;  %v6068_v54 = vld [vmem:[#allocation101_spill] sm:$0xff] }
 0x4d6   :  { %v2898_v48 = vadd.f32 %v2841_v18, %v1857_v39 }
 0x4d7   :  { %v3050_v49 = vrot.slane %v2554_v3, 1 }
 0x4d9   :  { %v3051_v51 = vsel %vm2976_vm1, %v3049_v33, %v3050_v49  ;;  %v3161_v17 = vsel %vm2976_vm1, %v3050_v49, 0.0  ;;  %v6070_v49 = vld [vmem:[#allocation36_spill] sm:$0xff] }
 0x4da   :  { %v3217_v29 = vadd.f32 %v3051_v51, %v2896_v6  ;;  %v3218_v35 = vadd.f32 %v3161_v17, %v2897_v41  ;;  %v2218_v4 = vpop.f32.mrf.mxu2  ;;  %v2387_v31 = vpop.f32.mrf.mxu3  ;;  %v6064_v6 = vld [vmem:[#allocation100_spill] sm:$0xff]  ;;  %v6071_v51 = vrot.slane %v6070_v49, 7 }
 0x4db   :  { %v1858_v2 = vpop.f32.mrf.mxu1  ;;  %v2558_v36 = vpop.f32.mrf.mxu0  ;;  %v2388_v16 = vadd.f32 %v2387_v31, %v2218_v4 }
 0x4dc   :  { %v3280_v38 = vadd.f32 %v3279_v60, %v3217_v29  ;;  %v3350_v26 = vmul.f32 %v3217_v29, %v3217_v29  ;;  %v4269_v59 = vpack.c.bf16 %v3218_v35, %v3217_v29  ;;  %v1859_v27 = vadd.f32 %v1858_v2, %v6062_v34 }
 0x4dd   :  { %v3351_v20 = vmul.f32 %v3218_v35, %v3218_v35  ;;  %v2557_v44 = vadd.f32 %v2556_v62, %v2388_v16  ;;  %v2843_v17 = vsel %vm2655_vm0, 0.0, %v6071_v51 }
 0x4de   :  { %v3281_v1 = vadd.f32 %v3280_v38, %v3218_v35  ;;  %v3413_v0 = vadd.f32 %v3412_v8, %v3350_v26  ;;  %4331 = vst [vmem:[#allocation10 + $0xc0] sm:$0xff] %v4269_v59   ;;  %v2899_v9 = vadd.f32 %v6063_v28, %v1859_v27  ;;  %v6072_v28 = vld [vmem:[#allocation38_spill] sm:$0xff] }
 0x4df   :  { %v3052_v13 = vrot.slane %v2557_v44, 1 }
 0x4e0   :  { %v3414_v42 = vadd.f32 %v3413_v0, %v3351_v20 }
 0x4e2   :  { %v2220_v5 = vpop.f32.mrf.mxu2  ;;  %v2389_v40 = vpop.f32.mrf.mxu3 }
 0x4e3   :  { %v2390_v15 = vadd.f32 %v2389_v40, %v2220_v5  ;;  %v1861_v21 = vpop.f32.mrf.mxu1  ;;  %v2561_v52 = vpop.f32.mrf.mxu0 }
 0x4e4   :  { %v1862_v63 = vadd.f32 %v1861_v21, %v6064_v6 }
 0x4e5   :  { %v2559_v47 = vadd.f32 %v2558_v36, %v2390_v15  ;;  %v6073_v15 = vld [vmem:[#allocation103_spill] sm:$0xff] }
 0x4e6   :  { %v2900_v19 = vadd.f32 %v2842_v30, %v1862_v63 }
 0x4e7   :  { %v3053_v43 = vrot.slane %v2559_v47, 1 }
 0x4e9   :  { %v3054_v25 = vsel %vm2976_vm1, %v3052_v13, %v3053_v43  ;;  %v3162_v37 = vsel %vm2976_vm1, %v3053_v43, 0.0  ;;  %v6075_v43 = vld [vmem:[#allocation40_spill] sm:$0xff] }
 0x4ea   :  { %v3219_v23 = vadd.f32 %v3054_v25, %v2898_v48  ;;  %v3220_v61 = vadd.f32 %v3162_v37, %v2899_v9  ;;  %v2223_v56 = vpop.f32.mrf.mxu2  ;;  %v2392_v55 = vpop.f32.mrf.mxu3  ;;  %v6069_v48 = vld [vmem:[#allocation102_spill] sm:$0xff]  ;;  %v6076_v25 = vrot.slane %v6075_v43, 7 }
 0x4eb   :  { %v1863_v53 = vpop.f32.mrf.mxu1  ;;  %v2563_v60 = vpop.f32.mrf.mxu0  ;;  %v2393_v24 = vadd.f32 %v2392_v55, %v2223_v56 }
 0x4ec   :  { %v3282_v50 = vadd.f32 %v3281_v1, %v3219_v23  ;;  %v3352_v45 = vmul.f32 %v3219_v23, %v3219_v23  ;;  %v4274_v14 = vpack.c.bf16 %v3220_v61, %v3219_v23  ;;  %v1864_v41 = vadd.f32 %v1863_v53, %v6067_v22 }
 0x4ed   :  { %v3353_v10 = vmul.f32 %v3220_v61, %v3220_v61  ;;  %v2562_v11 = vadd.f32 %v2561_v52, %v2393_v24  ;;  %v2844_v37 = vsel %vm2655_vm0, 0.0, %v6076_v25 }
 0x4ee   :  { %v3283_v8 = vadd.f32 %v3282_v50, %v3220_v61  ;;  %v3415_v12 = vadd.f32 %v3414_v42, %v3352_v45  ;;  %4332 = vst [vmem:[#allocation10 + $0xc8] sm:$0xff] %v4274_v14   ;;  %v2901_v57 = vadd.f32 %v6068_v54, %v1864_v41  ;;  %v6077_v54 = vld [vmem:[#allocation42_spill] sm:$0xff] }
 0x4ef   :  { %v3055_v4 = vrot.slane %v2562_v11, 1 }
 0x4f0   :  { %v3416_v62 = vadd.f32 %v3415_v12, %v3353_v10 }
 0x4f2   :  { %v2225_v58 = vpop.f32.mrf.mxu2  ;;  %v2394_v39 = vpop.f32.mrf.mxu3 }
 0x4f3   :  { %v2395_v46 = vadd.f32 %v2394_v39, %v2225_v58  ;;  %v1866_v18 = vpop.f32.mrf.mxu1  ;;  %v2566_v3 = vpop.f32.mrf.mxu0 }
 0x4f4   :  { %v1867_v33 = vadd.f32 %v1866_v18, %v6069_v48 }
 0x4f5   :  { %v2564_v29 = vadd.f32 %v2563_v60, %v2395_v46  ;;  %v6078_v46 = vld [vmem:[#allocation105_spill] sm:$0xff] }
 0x4f6   :  { %v2902_v35 = vadd.f32 %v2843_v17, %v1867_v33 }
 0x4f7   :  { %v3056_v31 = vrot.slane %v2564_v29, 1 }
 0x4f9   :  { %v3057_v2 = vsel %vm2976_vm1, %v3055_v4, %v3056_v31  ;;  %v3163_v36 = vsel %vm2976_vm1, %v3056_v31, 0.0  ;;  %v6080_v31 = vld [vmem:[#allocation44_spill] sm:$0xff] }
 0x4fa   :  { %v3221_v38 = vadd.f32 %v3057_v2, %v2900_v19  ;;  %v3222_v26 = vadd.f32 %v3163_v36, %v2901_v57  ;;  %v2228_v59 = vpop.f32.mrf.mxu2  ;;  %v2397_v34 = vpop.f32.mrf.mxu3  ;;  %v6074_v19 = vld [vmem:[#allocation104_spill] sm:$0xff]  ;;  %v6081_v2 = vrot.slane %v6080_v31, 7 }
 0x4fb   :  { %v1868_v27 = vpop.f32.mrf.mxu1  ;;  %v2568_v1 = vpop.f32.mrf.mxu0  ;;  %v2398_v44 = vadd.f32 %v2397_v34, %v2228_v59 }
 0x4fc   :  { %v3284_v20 = vadd.f32 %v3283_v8, %v3221_v38  ;;  %v3354_v0 = vmul.f32 %v3221_v38, %v3221_v38  ;;  %v4279_v16 = vpack.c.bf16 %v3222_v26, %v3221_v38  ;;  %v1869_v9 = vadd.f32 %v1868_v27, %v6072_v28 }
 0x4fd   :  { %v3355_v5 = vmul.f32 %v3222_v26, %v3222_v26  ;;  %v2567_v32 = vadd.f32 %v2566_v3, %v2398_v44  ;;  %v2845_v36 = vsel %vm2655_vm0, 0.0, %v6081_v2 }
 0x4fe   :  { %v3285_v42 = vadd.f32 %v3284_v20, %v3222_v26  ;;  %v3417_v40 = vadd.f32 %v3416_v62, %v3354_v0  ;;  %4333 = vst [vmem:[#allocation10 + $0xd0] sm:$0xff] %v4279_v16   ;;  %v2903_v21 = vadd.f32 %v6073_v15, %v1869_v9  ;;  %v6082_v15 = vld [vmem:[#allocation46_spill] sm:$0xff] }
 0x4ff   :  { %v3058_v56 = vrot.slane %v2567_v32, 1 }
 0x500   :  { %v3418_v52 = vadd.f32 %v3417_v40, %v3355_v5 }
 0x502   :  { %v2230_v6 = vpop.f32.mrf.mxu2  ;;  %v2399_v63 = vpop.f32.mrf.mxu3 }
 0x503   :  { %v2400_v7 = vadd.f32 %v2399_v63, %v2230_v6  ;;  %v1871_v30 = vpop.f32.mrf.mxu1  ;;  %v2571_v47 = vpop.f32.mrf.mxu0 }
 0x504   :  { %v1872_v13 = vadd.f32 %v1871_v30, %v6074_v19 }
 0x505   :  { %v2569_v23 = vadd.f32 %v2568_v1, %v2400_v7  ;;  %v6083_v7 = vld [vmem:[#allocation107_spill] sm:$0xff] }
 0x506   :  { %v2904_v61 = vadd.f32 %v2844_v37, %v1872_v13 }
 0x507   :  { %v3059_v55 = vrot.slane %v2569_v23, 1  ;;  %v6084_v23 = vld [vmem:[#allocation108_spill] sm:$0xff] }
 0x509   :  { %v3060_v53 = vsel %vm2976_vm1, %v3058_v56, %v3059_v55  ;;  %v3164_v60 = vsel %vm2976_vm1, %v3059_v55, 0.0  ;;  %v6085_v56 = vld [vmem:[#allocation48_spill] sm:$0xff] }
 0x50a   :  { %v3223_v50 = vadd.f32 %v3060_v53, %v2902_v35  ;;  %v3224_v45 = vadd.f32 %v3164_v60, %v2903_v21  ;;  %v2233_v14 = vpop.f32.mrf.mxu2  ;;  %v2402_v22 = vpop.f32.mrf.mxu3  ;;  %v6079_v35 = vld [vmem:[#allocation106_spill] sm:$0xff]  ;;  %v6086_v55 = vrot.slane %v6085_v56, 7 }
 0x50b   :  { %v1873_v41 = vpop.f32.mrf.mxu1  ;;  %v2573_v8 = vpop.f32.mrf.mxu0  ;;  %v2403_v11 = vadd.f32 %v2402_v22, %v2233_v14 }
 0x50c   :  { %v3286_v10 = vadd.f32 %v3285_v42, %v3223_v50  ;;  %v3356_v12 = vmul.f32 %v3223_v50, %v3223_v50  ;;  %v4284_v24 = vpack.c.bf16 %v3224_v45, %v3223_v50  ;;  %v1874_v57 = vadd.f32 %v1873_v41, %v6077_v54 }
 0x50d   :  { %v3357_v58 = vmul.f32 %v3224_v45, %v3224_v45  ;;  %v2572_v49 = vadd.f32 %v2571_v47, %v2403_v11  ;;  %v2846_v53 = vsel %vm2655_vm0, 0.0, %v6086_v55  ;;  %v6087_v11 = vld [vmem:[#allocation50_spill] sm:$0xff] }
 0x50e   :  { %v3287_v62 = vadd.f32 %v3286_v10, %v3224_v45  ;;  %v3419_v39 = vadd.f32 %v3418_v52, %v3356_v12  ;;  %4334 = vst [vmem:[#allocation10 + $0xd8] sm:$0xff] %v4284_v24   ;;  %v2905_v18 = vadd.f32 %v6078_v46, %v1874_v57 }
 0x50f   :  { %v3061_v59 = vrot.slane %v2572_v49, 1  ;;  %v6088_v49 = vld [vmem:[#allocation109_spill] sm:$0xff] }
 0x510   :  { %v3420_v3 = vadd.f32 %v3419_v39, %v3357_v58 }
 0x512   :  { %v2235_v48 = vpop.f32.mrf.mxu2  ;;  %v2404_v33 = vpop.f32.mrf.mxu3 }
 0x513   :  { %v2405_v51 = vadd.f32 %v2404_v33, %v2235_v48  ;;  %v1876_v17 = vpop.f32.mrf.mxu1  ;;  %v2576_v29 = vpop.f32.mrf.mxu0 }
 0x514   :  { %v1877_v4 = vadd.f32 %v1876_v17, %v6079_v35 }
 0x515   :  { %v2574_v38 = vadd.f32 %v2573_v8, %v2405_v51 }
 0x516   :  { %v2906_v26 = vadd.f32 %v2845_v36, %v1877_v4 }
 0x517   :  { %v3062_v34 = vrot.slane %v2574_v38, 1  ;;  %v6089_v38 = vld [vmem:[#allocation110_spill] sm:$0xff] }
 0x519   :  { %v3063_v27 = vsel %vm2976_vm1, %v3061_v59, %v3062_v34  ;;  %v3165_v1 = vsel %vm2976_vm1, %v3062_v34, 0.0  ;;  %v6090_v59 = vld [vmem:[#allocation52_spill] sm:$0xff] }
 0x51a   :  { %v3225_v20 = vadd.f32 %v3063_v27, %v2904_v61  ;;  %v3226_v0 = vadd.f32 %v3165_v1, %v2905_v18  ;;  %v2238_v16 = vpop.f32.mrf.mxu2  ;;  %v2407_v28 = vpop.f32.mrf.mxu3  ;;  %v6091_v34 = vrot.slane %v6090_v59, 7 }
 0x51b   :  { %v1878_v9 = vpop.f32.mrf.mxu1  ;;  %v2578_v42 = vpop.f32.mrf.mxu0  ;;  %v2408_v32 = vadd.f32 %v2407_v28, %v2238_v16 }
 0x51c   :  { %v3288_v5 = vadd.f32 %v3287_v62, %v3225_v20  ;;  %v3358_v40 = vmul.f32 %v3225_v20, %v3225_v20  ;;  %v4289_v44 = vpack.c.bf16 %v3226_v0, %v3225_v20  ;;  %v1879_v21 = vadd.f32 %v1878_v9, %v6082_v15 }
 0x51d   :  { %v3359_v6 = vmul.f32 %v3226_v0, %v3226_v0  ;;  %v2577_v43 = vadd.f32 %v2576_v29, %v2408_v32  ;;  %v2847_v27 = vsel %vm2655_vm0, 0.0, %v6091_v34  ;;  %v6092_v32 = vld [vmem:[#allocation55_spill] sm:$0xff] }
 0x51e   :  { %v3289_v52 = vadd.f32 %v3288_v5, %v3226_v0  ;;  %v3421_v63 = vadd.f32 %v3420_v3, %v3358_v40  ;;  %4335 = vst [vmem:[#allocation10 + $0xe0] sm:$0xff] %v4289_v44   ;;  %v2907_v30 = vadd.f32 %v6083_v7, %v1879_v21 }
 0x51f   :  { %v3064_v14 = vrot.slane %v2577_v43, 1  ;;  %v6093_v43 = vld [vmem:[#allocation111_spill] sm:$0xff] }
 0x520   :  { %v3422_v47 = vadd.f32 %v3421_v63, %v3359_v6 }
 0x522   :  { %v2240_v19 = vpop.f32.mrf.mxu2  ;;  %v2409_v13 = vpop.f32.mrf.mxu3 }
 0x523   :  { %v2410_v25 = vadd.f32 %v2409_v13, %v2240_v19  ;;  %v1881_v37 = vpop.f32.mrf.mxu1  ;;  %v2581_v50 = vpop.f32.mrf.mxu0 }
 0x524   :  { %v1882_v61 = vadd.f32 %v1881_v37, %v6084_v23 }
 0x525   :  { %v2579_v60 = vadd.f32 %v2578_v42, %v2410_v25 }
 0x526   :  { %v2908_v45 = vadd.f32 %v2846_v53, %v1882_v61 }
 0x527   :  { %v3065_v22 = vrot.slane %v2579_v60, 1 }
 0x529   :  { %v3066_v41 = vsel %vm2976_vm1, %v3064_v14, %v3065_v22  ;;  %v3166_v8 = vsel %vm2976_vm1, %v3065_v22, 0.0 }
 0x52a   :  { %v3227_v10 = vadd.f32 %v3066_v41, %v2906_v26  ;;  %v3228_v12 = vadd.f32 %v3166_v8, %v2907_v30  ;;  %v2243_v24 = vpop.f32.mrf.mxu2  ;;  %v2412_v54 = vpop.f32.mrf.mxu3 }
 0x52b   :  { %v1883_v57 = vpop.f32.mrf.mxu1  ;;  %v2413_v33 = vadd.f32 %v2412_v54, %v2243_v24  ;;  %v2583_v17 = vpop.f32.mrf.mxu0 }
 0x52c   :  { %v3290_v62 = vadd.f32 %v3289_v52, %v3227_v10  ;;  %v3360_v58 = vmul.f32 %v3227_v10, %v3227_v10  ;;  %v4294_v39 = vpack.c.bf16 %v3228_v12, %v3227_v10  ;;  %v1884_v46 = vadd.f32 %v1883_v57, %v6087_v11 }
 0x52d   :  { %v3361_v3 = vmul.f32 %v3228_v12, %v3228_v12  ;;  %v2582_v31 = vadd.f32 %v2581_v50, %v2413_v33 }
 0x52e   :  { %v3291_v18 = vadd.f32 %v3290_v62, %v3228_v12  ;;  %v3423_v48 = vadd.f32 %v3422_v47, %v3360_v58  ;;  %4336 = vst [vmem:[#allocation10 + $0xe8] sm:$0xff] %v4294_v39   ;;  %v2909_v51 = vadd.f32 %v6088_v49, %v1884_v46 }
 0x52f   :  { %v3067_v0 = vrot.slane %v2582_v31, 1 }
 0x530   :  { %v3424_v29 = vadd.f32 %v3423_v48, %v3361_v3 }
 0x532   :  { %v2245_v35 = vpop.f32.mrf.mxu2  ;;  %v2414_v4 = vpop.f32.mrf.mxu3 }
 0x533   :  { %v2415_v2 = vadd.f32 %v2414_v4, %v2245_v35  ;;  %v1886_v36 = vpop.f32.mrf.mxu1  ;;  %v2586_v42 = vpop.f32.mrf.mxu0 }
 0x534   :  { %v1887_v26 = vadd.f32 %v1886_v36, %v6089_v38 }
 0x535   :  { %v2584_v1 = vadd.f32 %v2583_v17, %v2415_v2 }
 0x536   :  { %v2910_v20 = vadd.f32 %v2847_v27, %v1887_v26 }
 0x537   :  { %v3068_v16 = vrot.slane %v2584_v1, 1 }
 0x539   :  { %v3069_v28 = vsel %vm2976_vm1, %v3067_v0, %v3068_v16  ;;  %v3167_v9 = vsel %vm2976_vm1, %v3068_v16, 0.0 }
 0x53a   :  { %v3229_v5 = vadd.f32 %v3069_v28, %v2908_v45  ;;  %v3230_v40 = vadd.f32 %v3167_v9, %v2909_v51  ;;  %v2248_v44 = vpop.f32.mrf.mxu2  ;;  %v2417_v15 = vpop.f32.mrf.mxu3 }
 0x53b   :  { %v1888_v21 = vpop.f32.mrf.mxu1  ;;  %v2418_v13 = vadd.f32 %v2417_v15, %v2248_v44  ;;  %v2588_v53 = vpop.f32.mrf.mxu0 }
 0x53c   :  { %v3292_v52 = vadd.f32 %v3291_v18, %v3229_v5  ;;  %v3362_v6 = vmul.f32 %v3229_v5, %v3229_v5  ;;  %v4299_v63 = vpack.c.bf16 %v3230_v40, %v3229_v5  ;;  %v1889_v7 = vadd.f32 %v1888_v21, %v6092_v32 }
 0x53d   :  { %v3363_v47 = vmul.f32 %v3230_v40, %v3230_v40  ;;  %v2587_v56 = vadd.f32 %v2586_v42, %v2418_v13 }
 0x53e   :  { %v3293_v30 = vadd.f32 %v3292_v52, %v3230_v40  ;;  %v3425_v19 = vadd.f32 %v3424_v29, %v3362_v6  ;;  %4337 = vst [vmem:[#allocation10 + $0xf0] sm:$0xff] %v4299_v63   ;;  %v2911_v25 = vadd.f32 %v6093_v43, %v1889_v7 }
 0x53f   :  { %v3070_v50 = vrot.slane %v2587_v56, 1 }
 0x540   :  { %v3426_v37 = vadd.f32 %v3425_v19, %v3363_v47 }
 0x542   :  { %v2250_v23 = vpop.f32.mrf.mxu2  ;;  %v2419_v61 = vpop.f32.mrf.mxu3 }
 0x543   :  { %v2420_v55 = vadd.f32 %v2419_v61, %v2250_v23 }
 0x545   :  { %v2589_v60 = vadd.f32 %v2588_v53, %v2420_v55 }
 0x547   :  { %v3071_v45 = vrot.slane %v2589_v60, 1 }
 0x549   :  { %v3072_v14 = vsel %vm2976_vm1, %v3070_v50, %v3071_v45  ;;  %v3168_v22 = vsel %vm2976_vm1, %v3071_v45, 0.0 }
 0x54a   :  { %v3231_v41 = vadd.f32 %v3072_v14, %v2910_v20  ;;  %v3232_v8 = vadd.f32 %v3168_v22, %v2911_v25 }
 0x54c   :  { %v3294_v10 = vadd.f32 %v3293_v30, %v3231_v41  ;;  %v3364_v12 = vmul.f32 %v3231_v41, %v3231_v41  ;;  %v4304_v24 = vpack.c.bf16 %v3232_v8, %v3231_v41  ;;  %v3365_v57 = vmul.f32 %v3232_v8, %v3232_v8 }
 0x54e   :  { %v3295_v54 = vadd.f32 %v3294_v10, %v3232_v8  ;;  %v3427_v62 = vadd.f32 %v3426_v37, %v3364_v12  ;;  %4338 = vst [vmem:[#allocation10 + $0xf8] sm:$0xff] %v4304_v24  }
 0x54f   :  { %3577 = dma.vmem_to_hbm [thread:$0]  %s3570_s0, 4096, %s3572_s16, [#allocation4], %s4541_s18, %s4541_s18, %s4542_s19  }
 0x550   :  { %v3296_v58 = vrot.slane %v3295_v54, 4  ;;  %v3428_v39 = vadd.f32 %v3427_v62, %v3365_v57 }
 0x552   :  { %v3297_v11 = vadd.f32 %v3296_v58, %v3295_v54  ;;  %v3429_v46 = vrot.slane %v3428_v39, 4 }
 0x554   :  { %v3298_v18 = vrot.slane %v3297_v11, 2  ;;  %v3430_v3 = vadd.f32 %v3429_v46, %v3428_v39 }
 0x556   :  { %v3299_v48 = vadd.f32 %v3298_v18, %v3297_v11  ;;  %v3431_v33 = vrot.slane %v3430_v3, 2 }
 0x558   :  { %v3300_v49 = vrot.slane %v3299_v48, 1  ;;  %v3432_v51 = vadd.f32 %v3431_v33, %v3430_v3 }
 0x55a   :  { %v3433_v17 = vrot.slane %v3432_v51, 1  ;;  %v3301_v29 = vadd.f32 %v3300_v49, %v3299_v48 }
 0x55c   :  { %v3434_v35 = vadd.f32 %v3433_v17, %v3432_v51 }
 0x55e   :  { %v3435_v4 = vsel %vm2655_vm0, %v3301_v29, %v3434_v35 }
 0x55f   :  { %3436 = vst [vmem:[#allocation11] sm:$0x3] %v3435_v4 }
 0x560   :  { %3588 = dma.vmem_to_hbm [thread:$0]  %s3584_s17, 32, %s3586_s22, [#allocation12]  }
 0x561   :  { %4528 = dma.done.wait [#allocation4], 4096  }
 0x562   :  { %4529 = vsyncadd [#allocation4], 4294963200 }
 0x563   :  { %4530 = dma.done.wait [#allocation12], 32  }
 0x564   :  { %4531 = vsyncadd [#allocation12], 4294967264 }
 0x565   :  { %3597 = vsyncpa [#allocation3], 1 }
 0x566   :  { %3598 = vsyncpa [#allocation6], 1 }
 0x567   :  { %3599 = vsyncpa [#allocation9], 1 }
 0x568   :  { %3600 = vsyncpa [#allocation4], 1 }
 0x569   :  { %3601 = vsyncpa [#allocation12], 1 }

</bundles_post_ra>
